<compile_context>
chip_gen: v5e
topology: v5e:2x2
jax: 0.10.0
libtpu: 0.0.40
codegen_flags: <defaults>
</compile_context>

<pallas_src>
import functools

import jax
import jax.numpy as jnp
from jax.experimental import pallas as pl
from jax.experimental.pallas import tpu as pltpu

SUBLANE = 8
LANE = 128


def _round_up(n, m):
    return ((n + m - 1) // m) * m


def _vmem_capacity_bytes():
    """Physical per-core VMEM; fallback 64 MiB (v7x) is a safe lower bound."""
    try:
        info = pltpu.get_tpu_info()
        cap = getattr(info, "vmem_capacity_bytes", None)
        if cap:
            return int(cap)
    except Exception:
        pass
    return 64 << 20


def _pick_tile_t(T, Bp, Fp, Hp, act_bytes, budget_bytes, cap=256):
    """Largest timestep chunk whose VMEM footprint fits the per-generation budget.

    Footprint per chunk row: double-buffered bf16 x/out blocks + f32 gate scratch;
    fixed: single-buffered resident weights/bias + f32 h/c state.  The caller pads T
    up to a multiple of tile_t, so awkward/prime T never degenerates to tile_t == 1.
    """
    G = 4 * Hp
    per_row = (2 * Fp * act_bytes        # x chunk (double-buffered)
               + 2 * Hp * act_bytes      # out chunk (double-buffered)
               + G * 4)                  # gx scratch (f32)
    fixed = ((Fp + Hp) * G * act_bytes   # resident W_ih^T / W_hh^T (single-buffered)
             + G * 4                     # bias
             + 2 * Bp * Hp * 4)          # h / c state
    avail = max(budget_bytes - fixed, per_row * Bp)
    tile_t = max(1, min(T, cap, avail // (per_row * Bp)))
    # keep sublane tiles dense for sub-32-bit activations when Bp is only 8-aligned
    if act_bytes < 4 and Bp % 16 != 0 and tile_t > 1:
        tile_t -= tile_t % 2
    return int(tile_t)


# ----------------------------- LSTM layer kernels -----------------------------

def _lstm_chunk(x_ref, wih_ref, whh_ref, b_ref, h_scr, c_scr, gx_scr,
                out_ref, t_total, tile_t, store_seq):
    """Run tile_t timesteps of one LSTM layer on the current chunk.

    x_ref:   (tile_t*Bp, Fp)   bf16 input rows (T-major, B-minor)
    gx_scr:  (tile_t*Bp, 4Hp)  f32 hoisted input projection
    h_scr/c_scr: (Bp, Hp)      f32 recurrent state (persists across grid steps)
    """
    chunk = pl.program_id(0)
    Bp, Hp = h_scr.shape

    @pl.when(chunk == 0)
    def _():
        h_scr[...] = jnp.zeros_like(h_scr)
        c_scr[...] = jnp.zeros_like(c_scr)

    # Hoisted input projection: ONE wide bf16 MXU matmul over the whole chunk,
    # accumulated in f32.  Only h @ W_hh stays on the serial per-step path.
    gx_scr[...] = (jnp.dot(x_ref[...], wih_ref[...],
                           preferred_element_type=jnp.float32) + b_ref[...])

    whh = whh_ref[...]                        # resident bf16 (Hp, 4Hp)
    needs_mask = (t_total % tile_t) != 0      # static: only a ragged tail pays

    def body(t, carry):
        h, c = carry
        r0 = pl.multiple_of(t * Bp, Bp)
        g = gx_scr[pl.ds(r0, Bp), :] + jnp.dot(
            h.astype(whh.dtype), whh, preferred_element_type=jnp.float32)
        # sigmoid via the tanh identity: a single EUP push instead of exp+div.
        i_f = 0.5 * jnp.tanh(0.5 * g[:, :2 * Hp]) + 0.5       # i,f in one pass
        g_g = jnp.tanh(g[:, 2 * Hp:3 * Hp])
        o_g = 0.5 * jnp.tanh(0.5 * g[:, 3 * Hp:]) + 0.5
        c_new = i_f[:, Hp:] * c + i_f[:, :Hp] * g_g            # f*c + i*g
        h_new = o_g * jnp.tanh(c_new)
        if needs_mask:                                          # ragged last chunk
            valid = (chunk * tile_t + t) < t_total
            h_new = jnp.where(valid, h_new, h)
            c_new = jnp.where(valid, c_new, c)
        if store_seq:
            out_ref[pl.ds(r0, Bp), :] = h_new.astype(out_ref.dtype)
        return (h_new, c_new)

    # Cap the unroll: full unroll of large chunks bloats code and spills vregs.
    h, c = jax.lax.fori_loop(0, tile_t, body, (h_scr[...], c_scr[...]),
                             unroll=min(tile_t, 8))
    h_scr[...] = h
    c_scr[...] = c
    return h, c


def _lstm_seq_kernel(t_total, tile_t, x_ref, wih_ref, whh_ref, b_ref, out_ref,
                     h_scr, c_scr, gx_scr):
    """Intermediate layer: emits the full hidden sequence (bf16, lane-dense)."""
    _lstm_chunk(x_ref, wih_ref, whh_ref, b_ref, h_scr, c_scr, gx_scr,
                out_ref=out_ref, t_total=t_total, tile_t=tile_t, store_seq=True)


def _lstm_last_fc_kernel(t_total, tile_t, x_ref, wih_ref, whh_ref, b_ref,
                         wfc_ref, bfc_ref, out_ref, h_scr, c_scr, gx_scr):
    """Last layer fused with the FC head: no (T,B,H) writeback, only (Bp, Cp)."""
    chunk = pl.program_id(0)

    @pl.when(chunk == 0)
    def _():
        out_ref[...] = jnp.zeros_like(out_ref)   # defined value on every chunk

    h, _ = _lstm_chunk(x_ref, wih_ref, whh_ref, b_ref, h_scr, c_scr, gx_scr,
                       out_ref=None, t_total=t_total, tile_t=tile_t,
                       store_seq=False)

    @pl.when(chunk == pl.num_programs(0) - 1)
    def _():
        out_ref[...] = (jnp.dot(h.astype(wfc_ref.dtype), wfc_ref[...],
                                preferred_element_type=jnp.float32) + bfc_ref[...])


# ------------------------------ layer wrappers ------------------------------

def _lstm_layer_seq(x2d, layer, t_total, T_pad, Bp, tile_t, Hp, act_dtype,
                    vmem_limit):
    """x2d: (T_pad*Bp, Fp) time-major/batch-minor rows. Returns (T_pad*Bp, Hp)."""
    Fp = x2d.shape[1]
    G = 4 * Hp
    nchunks = T_pad // tile_t
    rows = tile_t * Bp
    abytes = jnp.dtype(act_dtype).itemsize
    ce = pl.CostEstimate(
        flops=2 * T_pad * Bp * (Fp + Hp) * G,
        transcendentals=5 * T_pad * Bp * Hp,
        bytes_accessed=int(abytes * (x2d.size + T_pad * Bp * Hp + (Fp + Hp) * G)
                           + 4 * G))
    kernel = functools.partial(_lstm_seq_kernel, t_total, tile_t)
    return pl.pallas_call(
        kernel,
        out_shape=jax.ShapeDtypeStruct((T_pad * Bp, Hp), act_dtype),
        grid_spec=pltpu.PrefetchScalarGridSpec(
            num_scalar_prefetch=0,
            grid=(nchunks,),
            in_specs=[
                # chunk of timestep rows: default double-buffered pipelining
                pl.BlockSpec((rows, Fp), lambda c: (c, 0)),
                # resident constant-index operands: single-buffered
                pl.BlockSpec((Fp, G), lambda c: (0, 0),
                             pipeline_mode=pl.Buffered(1)),
                pl.BlockSpec((Hp, G), lambda c: (0, 0),
                             pipeline_mode=pl.Buffered(1)),
                pl.BlockSpec((1, G), lambda c: (0, 0),
                             pipeline_mode=pl.Buffered(1)),
            ],
            out_specs=pl.BlockSpec((rows, Hp), lambda c: (c, 0)),
            scratch_shapes=[
                pltpu.VMEM((Bp, Hp), jnp.float32),            # h state
                pltpu.VMEM((Bp, Hp), jnp.float32),            # c state
                pltpu.VMEM((rows, G), jnp.float32),           # hoisted x-projection
            ],
        ),
        compiler_params=pltpu.CompilerParams(
            dimension_semantics=("arbitrary",),               # recurrence: sequential
            vmem_limit_bytes=vmem_limit),
        cost_estimate=ce,
    )(x2d, layer["wih_t"], layer["whh_t"], layer["bias"])


def _lstm_last_fc(x2d, layer, wfc_t, bfc, t_total, T_pad, Bp, tile_t, Hp,
                  act_dtype, vmem_limit):
    """Last LSTM layer + FC head fused. Returns (Bp, Cp) padded f32 logits."""
    Fp = x2d.shape[1]
    G = 4 * Hp
    Cp = wfc_t.shape[1]
    nchunks = T_pad // tile_t
    rows = tile_t * Bp
    abytes = jnp.dtype(act_dtype).itemsize
    ce = pl.CostEstimate(
        flops=2 * T_pad * Bp * (Fp + Hp) * G + 2 * Bp * Hp * Cp,
        transcendentals=5 * T_pad * Bp * Hp,
        bytes_accessed=int(abytes * (x2d.size + (Fp + Hp) * G + Hp * Cp)
                           + 4 * (G + Cp + Bp * Cp)))
    kernel = functools.partial(_lstm_last_fc_kernel, t_total, tile_t)
    return pl.pallas_call(
        kernel,
        out_shape=jax.ShapeDtypeStruct((Bp, Cp), jnp.float32),
        grid_spec=pltpu.PrefetchScalarGridSpec(
            num_scalar_prefetch=0,
            grid=(nchunks,),
            in_specs=[
                pl.BlockSpec((rows, Fp), lambda c: (c, 0)),
                pl.BlockSpec((Fp, G), lambda c: (0, 0),
                             pipeline_mode=pl.Buffered(1)),
                pl.BlockSpec((Hp, G), lambda c: (0, 0),
                             pipeline_mode=pl.Buffered(1)),
                pl.BlockSpec((1, G), lambda c: (0, 0),
                             pipeline_mode=pl.Buffered(1)),
                pl.BlockSpec((Hp, Cp), lambda c: (0, 0),
                             pipeline_mode=pl.Buffered(1)),   # FC weight (resident)
                pl.BlockSpec((1, Cp), lambda c: (0, 0),
                             pipeline_mode=pl.Buffered(1)),   # FC bias
            ],
            out_specs=pl.BlockSpec((Bp, Cp), lambda c: (0, 0)),
            scratch_shapes=[
                pltpu.VMEM((Bp, Hp), jnp.float32),
                pltpu.VMEM((Bp, Hp), jnp.float32),
                pltpu.VMEM((rows, G), jnp.float32),
            ],
        ),
        compiler_params=pltpu.CompilerParams(
            dimension_semantics=("arbitrary",),
            vmem_limit_bytes=vmem_limit),
        cost_estimate=ce,
    )(x2d, layer["wih_t"], layer["whh_t"], layer["bias"], wfc_t, bfc)


# ------------------------- one-time parameter preparation -------------------------

def prepare_params(params, input_size, hidden_size, num_classes,
                   matmul_dtype=jnp.bfloat16):
    """Hoisted out of the forward pass: transpose, combine biases, pad to
    (8,128)-aligned shapes with a per-gate H_pad layout (i|f|g|o blocks), cast the
    MXU operands to bf16 (biases and gate math stay f32)."""
    H = hidden_size
    Hp = _round_up(H, LANE)
    Cp = _round_up(num_classes, LANE)
    cap = _vmem_capacity_bytes()
    prep = {"lstm": [], "H": H, "Hp": Hp, "C": num_classes, "Cp": Cp,
            "act_dtype": matmul_dtype,
            "vmem_limit": int(cap * 0.85),     # scoped VMEM ceiling for the compiler
            "tile_budget": int(cap * 0.55)}    # what tile_t sizing may consume
    for li, layer in enumerate(params["lstm"]):
        in_sz = input_size if li == 0 else hidden_size
        Fp = _round_up(in_sz, LANE)
        wih, whh = layer["w_ih"], layer["w_hh"]        # (4H, in_sz), (4H, H)
        b = layer["b_ih"] + layer["b_hh"]              # (4H,)
        wih_p = jnp.zeros((4 * Hp, Fp), jnp.float32)
        whh_p = jnp.zeros((4 * Hp, Hp), jnp.float32)
        b_p = jnp.zeros((4 * Hp,), jnp.float32)
        for g in range(4):                              # per-gate 128-aligned blocks
            wih_p = wih_p.at[g * Hp:g * Hp + H, :in_sz].set(wih[g * H:(g + 1) * H, :])
            whh_p = whh_p.at[g * Hp:g * Hp + H, :H].set(whh[g * H:(g + 1) * H, :])
            b_p = b_p.at[g * Hp:g * Hp + H].set(b[g * H:(g + 1) * H])
        prep["lstm"].append({
            "wih_t": wih_p.T.astype(matmul_dtype),      # (Fp, 4*Hp) bf16
            "whh_t": whh_p.T.astype(matmul_dtype),      # (Hp, 4*Hp) bf16
            "bias": b_p.reshape(1, 4 * Hp),             # f32
            "in_pad": Fp,
        })
    wfc_p = jnp.zeros((Cp, Hp), jnp.float32).at[:num_classes, :H].set(params["fc_w"])
    bfc_p = jnp.zeros((Cp,), jnp.float32).at[:num_classes].set(params["fc_b"])
    prep["fc_w_t"] = wfc_p.T.astype(matmul_dtype)       # (Hp, Cp) bf16
    prep["fc_b"] = bfc_p.reshape(1, Cp)                 # f32
    return prep


# ------------------------------ full forward pass ------------------------------

def recurrent_net_forward(x, prep):
    """x: (B, T, I) batch_first (PyTorch convention). Returns logits (B, num_classes).

    NOTE: `prep` carries Python ints/dtypes used as static shapes -> jit this as a
    closure over `prep` (see __main__), not with `prep` as a traced argument.
    """
    B, T, I = x.shape
    Bp = _round_up(B, SUBLANE)
    Hp = prep["Hp"]
    act_dtype = prep["act_dtype"]
    I0p = prep["lstm"][0]["in_pad"]
    abytes = jnp.dtype(act_dtype).itemsize

    tile_t = _pick_tile_t(T, Bp, max(I0p, Hp), Hp, abytes, prep["tile_budget"])
    T_pad = _round_up(T, tile_t)    # ragged tail masked inside the kernel

    # time-major, pad batch/feature/time, flatten (T_pad, Bp) -> dense 2D rows.
    x_tm = jnp.transpose(x, (1, 0, 2))                               # (T, B, I)
    x_pad = (jnp.zeros((T_pad, Bp, I0p), act_dtype)
             .at[:T, :B, :I].set(x_tm.astype(act_dtype)))
    h2d = x_pad.reshape(T_pad * Bp, I0p)

    # TODO(synk): fuse the layer loop into one pallas_call (grid=(L, nchunks)) with a
    # VMEM ping-pong for the inter-layer sequence, and add a "parallel" batch-tile
    # grid axis for v7x's two TensorCores, when sizes warrant it.
    for layer in prep["lstm"][:-1]:
        h2d = _lstm_layer_seq(h2d, layer, T, T_pad, Bp, tile_t, Hp,
                              act_dtype, prep["vmem_limit"])
    logits_p = _lstm_last_fc(h2d, prep["lstm"][-1], prep["fc_w_t"], prep["fc_b"],
                             T, T_pad, Bp, tile_t, Hp, act_dtype,
                             prep["vmem_limit"])
    return logits_p[:B, :prep["C"]]


# -------------------------- deterministic parameter init --------------------------

def init_params(key, input_size, hidden_size, num_layers, num_classes):
    params = {"lstm": []}
    k_lstm = 1.0 / jnp.sqrt(hidden_size)
    keys = jax.random.split(key, 4 * num_layers + 2)
    for layer in range(num_layers):
        in_sz = input_size if layer == 0 else hidden_size
        k0, k1, k2, k3 = keys[4 * layer: 4 * layer + 4]
        params["lstm"].append({
            "w_ih": jax.random.uniform(k0, (4 * hidden_size, in_sz),
                                       jnp.float32, -k_lstm, k_lstm),
            "w_hh": jax.random.uniform(k1, (4 * hidden_size, hidden_size),
                                       jnp.float32, -k_lstm, k_lstm),
            "b_ih": jax.random.uniform(k2, (4 * hidden_size,),
                                       jnp.float32, -k_lstm, k_lstm),
            "b_hh": jax.random.uniform(k3, (4 * hidden_size,),
                                       jnp.float32, -k_lstm, k_lstm),
        })
    k_fc = 1.0 / jnp.sqrt(hidden_size)
    params["fc_w"] = jax.random.uniform(keys[-2], (num_classes, hidden_size),
                                        jnp.float32, -k_fc, k_fc)
    params["fc_b"] = jax.random.uniform(keys[-1], (num_classes,),
                                        jnp.float32, -k_fc, k_fc)
    return params


# ------------------------------ pure-JAX reference ------------------------------

def _reference_forward(x, params):
    h_seq = jnp.transpose(x, (1, 0, 2)).astype(jnp.float32)   # (T, B, I)
    for layer in params["lstm"]:
        B = h_seq.shape[1]
        H = layer["w_hh"].shape[1]
        wih_t, whh_t = layer["w_ih"].T, layer["w_hh"].T
        b = layer["b_ih"] + layer["b_hh"]

        def step(carry, x_t):
            h, c = carry
            g = x_t @ wih_t + h @ whh_t + b
            i = jax.nn.sigmoid(g[:, 0 * H:1 * H])
            f = jax.nn.sigmoid(g[:, 1 * H:2 * H])
            gg = jnp.tanh(g[:, 2 * H:3 * H])
            o = jax.nn.sigmoid(g[:, 3 * H:4 * H])
            c = f * c + i * gg
            h = o * jnp.tanh(c)
            return (h, c), h

        init = (jnp.zeros((B, H), jnp.float32), jnp.zeros((B, H), jnp.float32))
        _, h_seq = jax.lax.scan(step, init, h_seq)
    return h_seq[-1] @ params["fc_w"].T + params["fc_b"]


# ------------------------------------ main ------------------------------------

if __name__ == "__main__":
    batch, seq_len = 2, 8
    input_size, hidden_size, num_layers, num_classes = 16, 32, 2, 10

    key = jax.random.PRNGKey(0)
    k_x, k_p = jax.random.split(key)
    x = jax.random.normal(k_x, (batch, seq_len, input_size), jnp.float32)
    params = init_params(k_p, input_size, hidden_size, num_layers, num_classes)

    prep = prepare_params(params, input_size, hidden_size, num_classes)  # one-time
    # Closure over prep: arrays become jit constants, shape ints stay static.
    fwd = jax.jit(lambda xx: recurrent_net_forward(xx, prep))

    out = jax.block_until_ready(fwd(x))

    ref = _reference_forward(x, params)
    assert out.shape == (batch, num_classes)
    # bf16 MXU operands (f32 accumulation / gate math) -> looser tolerance vs f32 ref.
    err = float(jnp.max(jnp.abs(out - ref)))
    assert jnp.allclose(out, ref, atol=5e-2, rtol=5e-2), f"mismatch vs ref: {err}"

    print("KERNEL_OK")
</pallas_src>

<mosaic_0001>
module attributes {stable_mosaic.version = 11 : i64} {
  func.func @_lstm_seq_kernel(%arg0: i32, %arg1: memref<64x128xbf16, #tpu.memory_space<vmem>>, %arg2: memref<128x512xbf16, #tpu.memory_space<vmem>>, %arg3: memref<128x512xbf16, #tpu.memory_space<vmem>>, %arg4: memref<1x512xf32, #tpu.memory_space<vmem>>, %arg5: memref<64x128xbf16, #tpu.memory_space<vmem>>, %arg6: memref<8x128xf32, #tpu.memory_space<vmem>>, %arg7: memref<8x128xf32, #tpu.memory_space<vmem>>, %arg8: memref<64x512xf32, #tpu.memory_space<vmem>>) attributes {dimension_semantics = [#tpu.dimension_semantics<arbitrary>], iteration_bounds = array<i64: 1>, scalar_prefetch = 0 : i64, scratch_operands = 3 : i64, tpu.core_type = #tpu.core_type<tc>, window_params = [{transform_indices = @transform_0, window_bounds = array<i64: 64, 128>}, {pipeline_mode = #tpu.pipeline_mode<synchronous>, transform_indices = @transform_1, window_bounds = array<i64: 128, 512>}, {pipeline_mode = #tpu.pipeline_mode<synchronous>, transform_indices = @transform_2, window_bounds = array<i64: 128, 512>}, {pipeline_mode = #tpu.pipeline_mode<synchronous>, transform_indices = @transform_3, window_bounds = array<i64: 1, 512>}, {transform_indices = @transform_4, window_bounds = array<i64: 64, 128>}]} {
    %c0_i32 = arith.constant 0 : i32
    %0 = arith.cmpi eq, %arg0, %c0_i32 : i32
    %1 = arith.extui %0 : i1 to i32
    %c0_i32_0 = arith.constant 0 : i32
    %2 = arith.cmpi ne, %1, %c0_i32_0 : i32
    scf.if %2 {
      %cst_99 = arith.constant 0.000000e+00 : f32
      %295 = vector.broadcast %cst_99 : f32 to vector<8x128xf32>
      %c0_100 = arith.constant 0 : index
      %c0_101 = arith.constant 0 : index
      %296 = vector.load %arg6[%c0_100, %c0_101] : memref<8x128xf32, #tpu.memory_space<vmem>>, vector<8x128xf32>
      tpu.vector_store %arg6[%c0_100, %c0_101], %295 {strides = array<i32>} : memref<8x128xf32, #tpu.memory_space<vmem>>, vector<8x128xf32>,
      %cst_102 = arith.constant 0.000000e+00 : f32
      %297 = vector.broadcast %cst_102 : f32 to vector<8x128xf32>
      %c0_103 = arith.constant 0 : index
      %c0_104 = arith.constant 0 : index
      %298 = vector.load %arg7[%c0_103, %c0_104] : memref<8x128xf32, #tpu.memory_space<vmem>>, vector<8x128xf32>
      tpu.vector_store %arg7[%c0_103, %c0_104], %297 {strides = array<i32>} : memref<8x128xf32, #tpu.memory_space<vmem>>, vector<8x128xf32>,
    } else {
    }
    %c0 = arith.constant 0 : index
    %c0_1 = arith.constant 0 : index
    %3 = vector.load %arg1[%c0, %c0_1] : memref<64x128xbf16, #tpu.memory_space<vmem>>, vector<64x128xbf16>
    %c0_2 = arith.constant 0 : index
    %c0_3 = arith.constant 0 : index
    %4 = vector.load %arg2[%c0_2, %c0_3] : memref<128x512xbf16, #tpu.memory_space<vmem>>, vector<128x512xbf16>
    %cst = arith.constant dense<0.000000e+00> : vector<64x512xf32>
    %5 = tpu.matmul %3, %4, %cst {dimension_numbers = #tpu.dot_dimension_numbers<[1], [0], [0], [1], [0, 0, 1, 1], [], []>} : vector<64x128xbf16>, vector<128x512xbf16>, vector<64x512xf32> -> vector<64x512xf32>
    %c0_4 = arith.constant 0 : index
    %c0_5 = arith.constant 0 : index
    %6 = vector.load %arg4[%c0_4, %c0_5] : memref<1x512xf32, #tpu.memory_space<vmem>>, vector<1x512xf32>
    %7 = vector.broadcast %6 : vector<1x512xf32> to vector<64x512xf32>
    %8 = arith.addf %5, %7 : vector<64x512xf32>
    %c0_6 = arith.constant 0 : index
    %c0_7 = arith.constant 0 : index
    %9 = vector.load %arg8[%c0_6, %c0_7] : memref<64x512xf32, #tpu.memory_space<vmem>>, vector<64x512xf32>
    tpu.vector_store %arg8[%c0_6, %c0_7], %8 {strides = array<i32>} : memref<64x512xf32, #tpu.memory_space<vmem>>, vector<64x512xf32>,
    %c0_8 = arith.constant 0 : index
    %c0_9 = arith.constant 0 : index
    %10 = vector.load %arg3[%c0_8, %c0_9] : memref<128x512xbf16, #tpu.memory_space<vmem>>, vector<128x512xbf16>
    %c0_10 = arith.constant 0 : index
    %c0_11 = arith.constant 0 : index
    %11 = vector.load %arg6[%c0_10, %c0_11] : memref<8x128xf32, #tpu.memory_space<vmem>>, vector<8x128xf32>
    %c0_12 = arith.constant 0 : index
    %c0_13 = arith.constant 0 : index
    %12 = vector.load %arg7[%c0_12, %c0_13] : memref<8x128xf32, #tpu.memory_space<vmem>>, vector<8x128xf32>
    %c0_i32_14 = arith.constant 0 : i32
    %c8_i32 = arith.constant 8 : i32
    %13 = arith.muli %c0_i32_14, %c8_i32 : i32
    %14 = tpu.assume_multiple %13, 8 : i32
    %15 = arith.index_cast %14 : i32 to index
    %c0_15 = arith.constant 0 : index
    %16 = vector.load %arg8[%15, %c0_15] : memref<64x512xf32, #tpu.memory_space<vmem>>, vector<8x512xf32>
    %17 = arith.truncf %11 : vector<8x128xf32> to vector<8x128xbf16>
    %cst_16 = arith.constant dense<0.000000e+00> : vector<8x512xf32>
    %18 = tpu.matmul %17, %10, %cst_16 {dimension_numbers = #tpu.dot_dimension_numbers<[1], [0], [0], [1], [0, 0, 1, 1], [], []>} : vector<8x128xbf16>, vector<128x512xbf16>, vector<8x512xf32> -> vector<8x512xf32>
    %19 = arith.addf %16, %18 : vector<8x512xf32>
    %20 = vector.extract_strided_slice %19 {offsets = [0, 0], sizes = [8, 256], strides = [1, 1]} : vector<8x512xf32> to vector<8x256xf32>
    %cst_17 = arith.constant 5.000000e-01 : f32
    %21 = vector.broadcast %cst_17 : f32 to vector<8x256xf32>
    %22 = arith.mulf %21, %20 : vector<8x256xf32>
    %23 = math.tanh %22 : vector<8x256xf32>
    %cst_18 = arith.constant 5.000000e-01 : f32
    %24 = vector.broadcast %cst_18 : f32 to vector<8x256xf32>
    %25 = arith.mulf %24, %23 : vector<8x256xf32>
    %cst_19 = arith.constant 5.000000e-01 : f32
    %26 = vector.broadcast %cst_19 : f32 to vector<8x256xf32>
    %27 = arith.addf %25, %26 : vector<8x256xf32>
    %28 = vector.extract_strided_slice %19 {offsets = [0, 256], sizes = [8, 128], strides = [1, 1]} : vector<8x512xf32> to vector<8x128xf32>
    %29 = math.tanh %28 : vector<8x128xf32>
    %30 = vector.extract_strided_slice %19 {offsets = [0, 384], sizes = [8, 128], strides = [1, 1]} : vector<8x512xf32> to vector<8x128xf32>
    %cst_20 = arith.constant 5.000000e-01 : f32
    %31 = vector.broadcast %cst_20 : f32 to vector<8x128xf32>
    %32 = arith.mulf %31, %30 : vector<8x128xf32>
    %33 = math.tanh %32 : vector<8x128xf32>
    %cst_21 = arith.constant 5.000000e-01 : f32
    %34 = vector.broadcast %cst_21 : f32 to vector<8x128xf32>
    %35 = arith.mulf %34, %33 : vector<8x128xf32>
    %cst_22 = arith.constant 5.000000e-01 : f32
    %36 = vector.broadcast %cst_22 : f32 to vector<8x128xf32>
    %37 = arith.addf %35, %36 : vector<8x128xf32>
    %38 = vector.extract_strided_slice %27 {offsets = [0, 128], sizes = [8, 128], strides = [1, 1]} : vector<8x256xf32> to vector<8x128xf32>
    %39 = arith.mulf %38, %12 : vector<8x128xf32>
    %40 = vector.extract_strided_slice %27 {offsets = [0, 0], sizes = [8, 128], strides = [1, 1]} : vector<8x256xf32> to vector<8x128xf32>
    %41 = arith.mulf %40, %29 : vector<8x128xf32>
    %42 = arith.addf %39, %41 : vector<8x128xf32>
    %43 = math.tanh %42 : vector<8x128xf32>
    %44 = arith.mulf %37, %43 : vector<8x128xf32>
    %45 = arith.truncf %44 : vector<8x128xf32> to vector<8x128xbf16>
    %46 = arith.index_cast %14 : i32 to index
    %c0_23 = arith.constant 0 : index
    %47 = vector.load %arg5[%46, %c0_23] : memref<64x128xbf16, #tpu.memory_space<vmem>>, vector<8x128xbf16>
    tpu.vector_store %arg5[%46, %c0_23], %45 {strides = array<i32>} : memref<64x128xbf16, #tpu.memory_space<vmem>>, vector<8x128xbf16>,
    %c1_i32 = arith.constant 1 : i32
    %c8_i32_24 = arith.constant 8 : i32
    %48 = arith.muli %c1_i32, %c8_i32_24 : i32
    %49 = tpu.assume_multiple %48, 8 : i32
    %50 = arith.index_cast %49 : i32 to index
    %c0_25 = arith.constant 0 : index
    %51 = vector.load %arg8[%50, %c0_25] : memref<64x512xf32, #tpu.memory_space<vmem>>, vector<8x512xf32>
    %52 = arith.truncf %44 : vector<8x128xf32> to vector<8x128xbf16>
    %cst_26 = arith.constant dense<0.000000e+00> : vector<8x512xf32>
    %53 = tpu.matmul %52, %10, %cst_26 {dimension_numbers = #tpu.dot_dimension_numbers<[1], [0], [0], [1], [0, 0, 1, 1], [], []>} : vector<8x128xbf16>, vector<128x512xbf16>, vector<8x512xf32> -> vector<8x512xf32>
    %54 = arith.addf %51, %53 : vector<8x512xf32>
    %55 = vector.extract_strided_slice %54 {offsets = [0, 0], sizes = [8, 256], strides = [1, 1]} : vector<8x512xf32> to vector<8x256xf32>
    %cst_27 = arith.constant 5.000000e-01 : f32
    %56 = vector.broadcast %cst_27 : f32 to vector<8x256xf32>
    %57 = arith.mulf %56, %55 : vector<8x256xf32>
    %58 = math.tanh %57 : vector<8x256xf32>
    %cst_28 = arith.constant 5.000000e-01 : f32
    %59 = vector.broadcast %cst_28 : f32 to vector<8x256xf32>
    %60 = arith.mulf %59, %58 : vector<8x256xf32>
    %cst_29 = arith.constant 5.000000e-01 : f32
    %61 = vector.broadcast %cst_29 : f32 to vector<8x256xf32>
    %62 = arith.addf %60, %61 : vector<8x256xf32>
    %63 = vector.extract_strided_slice %54 {offsets = [0, 256], sizes = [8, 128], strides = [1, 1]} : vector<8x512xf32> to vector<8x128xf32>
    %64 = math.tanh %63 : vector<8x128xf32>
    %65 = vector.extract_strided_slice %54 {offsets = [0, 384], sizes = [8, 128], strides = [1, 1]} : vector<8x512xf32> to vector<8x128xf32>
    %cst_30 = arith.constant 5.000000e-01 : f32
    %66 = vector.broadcast %cst_30 : f32 to vector<8x128xf32>
    %67 = arith.mulf %66, %65 : vector<8x128xf32>
    %68 = math.tanh %67 : vector<8x128xf32>
    %cst_31 = arith.constant 5.000000e-01 : f32
    %69 = vector.broadcast %cst_31 : f32 to vector<8x128xf32>
    %70 = arith.mulf %69, %68 : vector<8x128xf32>
    %cst_32 = arith.constant 5.000000e-01 : f32
    %71 = vector.broadcast %cst_32 : f32 to vector<8x128xf32>
    %72 = arith.addf %70, %71 : vector<8x128xf32>
    %73 = vector.extract_strided_slice %62 {offsets = [0, 128], sizes = [8, 128], strides = [1, 1]} : vector<8x256xf32> to vector<8x128xf32>
    %74 = arith.mulf %73, %42 : vector<8x128xf32>
    %75 = vector.extract_strided_slice %62 {offsets = [0, 0], sizes = [8, 128], strides = [1, 1]} : vector<8x256xf32> to vector<8x128xf32>
    %76 = arith.mulf %75, %64 : vector<8x128xf32>
    %77 = arith.addf %74, %76 : vector<8x128xf32>
    %78 = math.tanh %77 : vector<8x128xf32>
    %79 = arith.mulf %72, %78 : vector<8x128xf32>
    %80 = arith.truncf %79 : vector<8x128xf32> to vector<8x128xbf16>
    %81 = arith.index_cast %49 : i32 to index
    %c0_33 = arith.constant 0 : index
    %82 = vector.load %arg5[%81, %c0_33] : memref<64x128xbf16, #tpu.memory_space<vmem>>, vector<8x128xbf16>
    tpu.vector_store %arg5[%81, %c0_33], %80 {strides = array<i32>} : memref<64x128xbf16, #tpu.memory_space<vmem>>, vector<8x128xbf16>,
    %c2_i32 = arith.constant 2 : i32
    %c8_i32_34 = arith.constant 8 : i32
    %83 = arith.muli %c2_i32, %c8_i32_34 : i32
    %84 = tpu.assume_multiple %83, 8 : i32
    %85 = arith.index_cast %84 : i32 to index
    %c0_35 = arith.constant 0 : index
    %86 = vector.load %arg8[%85, %c0_35] : memref<64x512xf32, #tpu.memory_space<vmem>>, vector<8x512xf32>
    %87 = arith.truncf %79 : vector<8x128xf32> to vector<8x128xbf16>
    %cst_36 = arith.constant dense<0.000000e+00> : vector<8x512xf32>
    %88 = tpu.matmul %87, %10, %cst_36 {dimension_numbers = #tpu.dot_dimension_numbers<[1], [0], [0], [1], [0, 0, 1, 1], [], []>} : vector<8x128xbf16>, vector<128x512xbf16>, vector<8x512xf32> -> vector<8x512xf32>
    %89 = arith.addf %86, %88 : vector<8x512xf32>
    %90 = vector.extract_strided_slice %89 {offsets = [0, 0], sizes = [8, 256], strides = [1, 1]} : vector<8x512xf32> to vector<8x256xf32>
    %cst_37 = arith.constant 5.000000e-01 : f32
    %91 = vector.broadcast %cst_37 : f32 to vector<8x256xf32>
    %92 = arith.mulf %91, %90 : vector<8x256xf32>
    %93 = math.tanh %92 : vector<8x256xf32>
    %cst_38 = arith.constant 5.000000e-01 : f32
    %94 = vector.broadcast %cst_38 : f32 to vector<8x256xf32>
    %95 = arith.mulf %94, %93 : vector<8x256xf32>
    %cst_39 = arith.constant 5.000000e-01 : f32
    %96 = vector.broadcast %cst_39 : f32 to vector<8x256xf32>
    %97 = arith.addf %95, %96 : vector<8x256xf32>
    %98 = vector.extract_strided_slice %89 {offsets = [0, 256], sizes = [8, 128], strides = [1, 1]} : vector<8x512xf32> to vector<8x128xf32>
    %99 = math.tanh %98 : vector<8x128xf32>
    %100 = vector.extract_strided_slice %89 {offsets = [0, 384], sizes = [8, 128], strides = [1, 1]} : vector<8x512xf32> to vector<8x128xf32>
    %cst_40 = arith.constant 5.000000e-01 : f32
    %101 = vector.broadcast %cst_40 : f32 to vector<8x128xf32>
    %102 = arith.mulf %101, %100 : vector<8x128xf32>
    %103 = math.tanh %102 : vector<8x128xf32>
    %cst_41 = arith.constant 5.000000e-01 : f32
    %104 = vector.broadcast %cst_41 : f32 to vector<8x128xf32>
    %105 = arith.mulf %104, %103 : vector<8x128xf32>
    %cst_42 = arith.constant 5.000000e-01 : f32
    %106 = vector.broadcast %cst_42 : f32 to vector<8x128xf32>
    %107 = arith.addf %105, %106 : vector<8x128xf32>
    %108 = vector.extract_strided_slice %97 {offsets = [0, 128], sizes = [8, 128], strides = [1, 1]} : vector<8x256xf32> to vector<8x128xf32>
    %109 = arith.mulf %108, %77 : vector<8x128xf32>
    %110 = vector.extract_strided_slice %97 {offsets = [0, 0], sizes = [8, 128], strides = [1, 1]} : vector<8x256xf32> to vector<8x128xf32>
    %111 = arith.mulf %110, %99 : vector<8x128xf32>
    %112 = arith.addf %109, %111 : vector<8x128xf32>
    %113 = math.tanh %112 : vector<8x128xf32>
    %114 = arith.mulf %107, %113 : vector<8x128xf32>
    %115 = arith.truncf %114 : vector<8x128xf32> to vector<8x128xbf16>
    %116 = arith.index_cast %84 : i32 to index
    %c0_43 = arith.constant 0 : index
    %117 = vector.load %arg5[%116, %c0_43] : memref<64x128xbf16, #tpu.memory_space<vmem>>, vector<8x128xbf16>
    tpu.vector_store %arg5[%116, %c0_43], %115 {strides = array<i32>} : memref<64x128xbf16, #tpu.memory_space<vmem>>, vector<8x128xbf16>,
    %c3_i32 = arith.constant 3 : i32
    %c8_i32_44 = arith.constant 8 : i32
    %118 = arith.muli %c3_i32, %c8_i32_44 : i32
    %119 = tpu.assume_multiple %118, 8 : i32
    %120 = arith.index_cast %119 : i32 to index
    %c0_45 = arith.constant 0 : index
    %121 = vector.load %arg8[%120, %c0_45] : memref<64x512xf32, #tpu.memory_space<vmem>>, vector<8x512xf32>
    %122 = arith.truncf %114 : vector<8x128xf32> to vector<8x128xbf16>
    %cst_46 = arith.constant dense<0.000000e+00> : vector<8x512xf32>
    %123 = tpu.matmul %122, %10, %cst_46 {dimension_numbers = #tpu.dot_dimension_numbers<[1], [0], [0], [1], [0, 0, 1, 1], [], []>} : vector<8x128xbf16>, vector<128x512xbf16>, vector<8x512xf32> -> vector<8x512xf32>
    %124 = arith.addf %121, %123 : vector<8x512xf32>
    %125 = vector.extract_strided_slice %124 {offsets = [0, 0], sizes = [8, 256], strides = [1, 1]} : vector<8x512xf32> to vector<8x256xf32>
    %cst_47 = arith.constant 5.000000e-01 : f32
    %126 = vector.broadcast %cst_47 : f32 to vector<8x256xf32>
    %127 = arith.mulf %126, %125 : vector<8x256xf32>
    %128 = math.tanh %127 : vector<8x256xf32>
    %cst_48 = arith.constant 5.000000e-01 : f32
    %129 = vector.broadcast %cst_48 : f32 to vector<8x256xf32>
    %130 = arith.mulf %129, %128 : vector<8x256xf32>
    %cst_49 = arith.constant 5.000000e-01 : f32
    %131 = vector.broadcast %cst_49 : f32 to vector<8x256xf32>
    %132 = arith.addf %130, %131 : vector<8x256xf32>
    %133 = vector.extract_strided_slice %124 {offsets = [0, 256], sizes = [8, 128], strides = [1, 1]} : vector<8x512xf32> to vector<8x128xf32>
    %134 = math.tanh %133 : vector<8x128xf32>
    %135 = vector.extract_strided_slice %124 {offsets = [0, 384], sizes = [8, 128], strides = [1, 1]} : vector<8x512xf32> to vector<8x128xf32>
    %cst_50 = arith.constant 5.000000e-01 : f32
    %136 = vector.broadcast %cst_50 : f32 to vector<8x128xf32>
    %137 = arith.mulf %136, %135 : vector<8x128xf32>
    %138 = math.tanh %137 : vector<8x128xf32>
    %cst_51 = arith.constant 5.000000e-01 : f32
    %139 = vector.broadcast %cst_51 : f32 to vector<8x128xf32>
    %140 = arith.mulf %139, %138 : vector<8x128xf32>
    %cst_52 = arith.constant 5.000000e-01 : f32
    %141 = vector.broadcast %cst_52 : f32 to vector<8x128xf32>
    %142 = arith.addf %140, %141 : vector<8x128xf32>
    %143 = vector.extract_strided_slice %132 {offsets = [0, 128], sizes = [8, 128], strides = [1, 1]} : vector<8x256xf32> to vector<8x128xf32>
    %144 = arith.mulf %143, %112 : vector<8x128xf32>
    %145 = vector.extract_strided_slice %132 {offsets = [0, 0], sizes = [8, 128], strides = [1, 1]} : vector<8x256xf32> to vector<8x128xf32>
    %146 = arith.mulf %145, %134 : vector<8x128xf32>
    %147 = arith.addf %144, %146 : vector<8x128xf32>
    %148 = math.tanh %147 : vector<8x128xf32>
    %149 = arith.mulf %142, %148 : vector<8x128xf32>
    %150 = arith.truncf %149 : vector<8x128xf32> to vector<8x128xbf16>
    %151 = arith.index_cast %119 : i32 to index
    %c0_53 = arith.constant 0 : index
    %152 = vector.load %arg5[%151, %c0_53] : memref<64x128xbf16, #tpu.memory_space<vmem>>, vector<8x128xbf16>
    tpu.vector_store %arg5[%151, %c0_53], %150 {strides = array<i32>} : memref<64x128xbf16, #tpu.memory_space<vmem>>, vector<8x128xbf16>,
    %c4_i32 = arith.constant 4 : i32
    %c8_i32_54 = arith.constant 8 : i32
    %153 = arith.muli %c4_i32, %c8_i32_54 : i32
    %154 = tpu.assume_multiple %153, 8 : i32
    %155 = arith.index_cast %154 : i32 to index
    %c0_55 = arith.constant 0 : index
    %156 = vector.load %arg8[%155, %c0_55] : memref<64x512xf32, #tpu.memory_space<vmem>>, vector<8x512xf32>
    %157 = arith.truncf %149 : vector<8x128xf32> to vector<8x128xbf16>
    %cst_56 = arith.constant dense<0.000000e+00> : vector<8x512xf32>
    %158 = tpu.matmul %157, %10, %cst_56 {dimension_numbers = #tpu.dot_dimension_numbers<[1], [0], [0], [1], [0, 0, 1, 1], [], []>} : vector<8x128xbf16>, vector<128x512xbf16>, vector<8x512xf32> -> vector<8x512xf32>
    %159 = arith.addf %156, %158 : vector<8x512xf32>
    %160 = vector.extract_strided_slice %159 {offsets = [0, 0], sizes = [8, 256], strides = [1, 1]} : vector<8x512xf32> to vector<8x256xf32>
    %cst_57 = arith.constant 5.000000e-01 : f32
    %161 = vector.broadcast %cst_57 : f32 to vector<8x256xf32>
    %162 = arith.mulf %161, %160 : vector<8x256xf32>
    %163 = math.tanh %162 : vector<8x256xf32>
    %cst_58 = arith.constant 5.000000e-01 : f32
    %164 = vector.broadcast %cst_58 : f32 to vector<8x256xf32>
    %165 = arith.mulf %164, %163 : vector<8x256xf32>
    %cst_59 = arith.constant 5.000000e-01 : f32
    %166 = vector.broadcast %cst_59 : f32 to vector<8x256xf32>
    %167 = arith.addf %165, %166 : vector<8x256xf32>
    %168 = vector.extract_strided_slice %159 {offsets = [0, 256], sizes = [8, 128], strides = [1, 1]} : vector<8x512xf32> to vector<8x128xf32>
    %169 = math.tanh %168 : vector<8x128xf32>
    %170 = vector.extract_strided_slice %159 {offsets = [0, 384], sizes = [8, 128], strides = [1, 1]} : vector<8x512xf32> to vector<8x128xf32>
    %cst_60 = arith.constant 5.000000e-01 : f32
    %171 = vector.broadcast %cst_60 : f32 to vector<8x128xf32>
    %172 = arith.mulf %171, %170 : vector<8x128xf32>
    %173 = math.tanh %172 : vector<8x128xf32>
    %cst_61 = arith.constant 5.000000e-01 : f32
    %174 = vector.broadcast %cst_61 : f32 to vector<8x128xf32>
    %175 = arith.mulf %174, %173 : vector<8x128xf32>
    %cst_62 = arith.constant 5.000000e-01 : f32
    %176 = vector.broadcast %cst_62 : f32 to vector<8x128xf32>
    %177 = arith.addf %175, %176 : vector<8x128xf32>
    %178 = vector.extract_strided_slice %167 {offsets = [0, 128], sizes = [8, 128], strides = [1, 1]} : vector<8x256xf32> to vector<8x128xf32>
    %179 = arith.mulf %178, %147 : vector<8x128xf32>
    %180 = vector.extract_strided_slice %167 {offsets = [0, 0], sizes = [8, 128], strides = [1, 1]} : vector<8x256xf32> to vector<8x128xf32>
    %181 = arith.mulf %180, %169 : vector<8x128xf32>
    %182 = arith.addf %179, %181 : vector<8x128xf32>
    %183 = math.tanh %182 : vector<8x128xf32>
    %184 = arith.mulf %177, %183 : vector<8x128xf32>
    %185 = arith.truncf %184 : vector<8x128xf32> to vector<8x128xbf16>
    %186 = arith.index_cast %154 : i32 to index
    %c0_63 = arith.constant 0 : index
    %187 = vector.load %arg5[%186, %c0_63] : memref<64x128xbf16, #tpu.memory_space<vmem>>, vector<8x128xbf16>
    tpu.vector_store %arg5[%186, %c0_63], %185 {strides = array<i32>} : memref<64x128xbf16, #tpu.memory_space<vmem>>, vector<8x128xbf16>,
    %c5_i32 = arith.constant 5 : i32
    %c8_i32_64 = arith.constant 8 : i32
    %188 = arith.muli %c5_i32, %c8_i32_64 : i32
    %189 = tpu.assume_multiple %188, 8 : i32
    %190 = arith.index_cast %189 : i32 to index
    %c0_65 = arith.constant 0 : index
    %191 = vector.load %arg8[%190, %c0_65] : memref<64x512xf32, #tpu.memory_space<vmem>>, vector<8x512xf32>
    %192 = arith.truncf %184 : vector<8x128xf32> to vector<8x128xbf16>
    %cst_66 = arith.constant dense<0.000000e+00> : vector<8x512xf32>
    %193 = tpu.matmul %192, %10, %cst_66 {dimension_numbers = #tpu.dot_dimension_numbers<[1], [0], [0], [1], [0, 0, 1, 1], [], []>} : vector<8x128xbf16>, vector<128x512xbf16>, vector<8x512xf32> -> vector<8x512xf32>
    %194 = arith.addf %191, %193 : vector<8x512xf32>
    %195 = vector.extract_strided_slice %194 {offsets = [0, 0], sizes = [8, 256], strides = [1, 1]} : vector<8x512xf32> to vector<8x256xf32>
    %cst_67 = arith.constant 5.000000e-01 : f32
    %196 = vector.broadcast %cst_67 : f32 to vector<8x256xf32>
    %197 = arith.mulf %196, %195 : vector<8x256xf32>
    %198 = math.tanh %197 : vector<8x256xf32>
    %cst_68 = arith.constant 5.000000e-01 : f32
    %199 = vector.broadcast %cst_68 : f32 to vector<8x256xf32>
    %200 = arith.mulf %199, %198 : vector<8x256xf32>
    %cst_69 = arith.constant 5.000000e-01 : f32
    %201 = vector.broadcast %cst_69 : f32 to vector<8x256xf32>
    %202 = arith.addf %200, %201 : vector<8x256xf32>
    %203 = vector.extract_strided_slice %194 {offsets = [0, 256], sizes = [8, 128], strides = [1, 1]} : vector<8x512xf32> to vector<8x128xf32>
    %204 = math.tanh %203 : vector<8x128xf32>
    %205 = vector.extract_strided_slice %194 {offsets = [0, 384], sizes = [8, 128], strides = [1, 1]} : vector<8x512xf32> to vector<8x128xf32>
    %cst_70 = arith.constant 5.000000e-01 : f32
    %206 = vector.broadcast %cst_70 : f32 to vector<8x128xf32>
    %207 = arith.mulf %206, %205 : vector<8x128xf32>
    %208 = math.tanh %207 : vector<8x128xf32>
    %cst_71 = arith.constant 5.000000e-01 : f32
    %209 = vector.broadcast %cst_71 : f32 to vector<8x128xf32>
    %210 = arith.mulf %209, %208 : vector<8x128xf32>
    %cst_72 = arith.constant 5.000000e-01 : f32
    %211 = vector.broadcast %cst_72 : f32 to vector<8x128xf32>
    %212 = arith.addf %210, %211 : vector<8x128xf32>
    %213 = vector.extract_strided_slice %202 {offsets = [0, 128], sizes = [8, 128], strides = [1, 1]} : vector<8x256xf32> to vector<8x128xf32>
    %214 = arith.mulf %213, %182 : vector<8x128xf32>
    %215 = vector.extract_strided_slice %202 {offsets = [0, 0], sizes = [8, 128], strides = [1, 1]} : vector<8x256xf32> to vector<8x128xf32>
    %216 = arith.mulf %215, %204 : vector<8x128xf32>
    %217 = arith.addf %214, %216 : vector<8x128xf32>
    %218 = math.tanh %217 : vector<8x128xf32>
    %219 = arith.mulf %212, %218 : vector<8x128xf32>
    %220 = arith.truncf %219 : vector<8x128xf32> to vector<8x128xbf16>
    %221 = arith.index_cast %189 : i32 to index
    %c0_73 = arith.constant 0 : index
    %222 = vector.load %arg5[%221, %c0_73] : memref<64x128xbf16, #tpu.memory_space<vmem>>, vector<8x128xbf16>
    tpu.vector_store %arg5[%221, %c0_73], %220 {strides = array<i32>} : memref<64x128xbf16, #tpu.memory_space<vmem>>, vector<8x128xbf16>,
    %c6_i32 = arith.constant 6 : i32
    %c8_i32_74 = arith.constant 8 : i32
    %223 = arith.muli %c6_i32, %c8_i32_74 : i32
    %224 = tpu.assume_multiple %223, 8 : i32
    %225 = arith.index_cast %224 : i32 to index
    %c0_75 = arith.constant 0 : index
    %226 = vector.load %arg8[%225, %c0_75] : memref<64x512xf32, #tpu.memory_space<vmem>>, vector<8x512xf32>
    %227 = arith.truncf %219 : vector<8x128xf32> to vector<8x128xbf16>
    %cst_76 = arith.constant dense<0.000000e+00> : vector<8x512xf32>
    %228 = tpu.matmul %227, %10, %cst_76 {dimension_numbers = #tpu.dot_dimension_numbers<[1], [0], [0], [1], [0, 0, 1, 1], [], []>} : vector<8x128xbf16>, vector<128x512xbf16>, vector<8x512xf32> -> vector<8x512xf32>
    %229 = arith.addf %226, %228 : vector<8x512xf32>
    %230 = vector.extract_strided_slice %229 {offsets = [0, 0], sizes = [8, 256], strides = [1, 1]} : vector<8x512xf32> to vector<8x256xf32>
    %cst_77 = arith.constant 5.000000e-01 : f32
    %231 = vector.broadcast %cst_77 : f32 to vector<8x256xf32>
    %232 = arith.mulf %231, %230 : vector<8x256xf32>
    %233 = math.tanh %232 : vector<8x256xf32>
    %cst_78 = arith.constant 5.000000e-01 : f32
    %234 = vector.broadcast %cst_78 : f32 to vector<8x256xf32>
    %235 = arith.mulf %234, %233 : vector<8x256xf32>
    %cst_79 = arith.constant 5.000000e-01 : f32
    %236 = vector.broadcast %cst_79 : f32 to vector<8x256xf32>
    %237 = arith.addf %235, %236 : vector<8x256xf32>
    %238 = vector.extract_strided_slice %229 {offsets = [0, 256], sizes = [8, 128], strides = [1, 1]} : vector<8x512xf32> to vector<8x128xf32>
    %239 = math.tanh %238 : vector<8x128xf32>
    %240 = vector.extract_strided_slice %229 {offsets = [0, 384], sizes = [8, 128], strides = [1, 1]} : vector<8x512xf32> to vector<8x128xf32>
    %cst_80 = arith.constant 5.000000e-01 : f32
    %241 = vector.broadcast %cst_80 : f32 to vector<8x128xf32>
    %242 = arith.mulf %241, %240 : vector<8x128xf32>
    %243 = math.tanh %242 : vector<8x128xf32>
    %cst_81 = arith.constant 5.000000e-01 : f32
    %244 = vector.broadcast %cst_81 : f32 to vector<8x128xf32>
    %245 = arith.mulf %244, %243 : vector<8x128xf32>
    %cst_82 = arith.constant 5.000000e-01 : f32
    %246 = vector.broadcast %cst_82 : f32 to vector<8x128xf32>
    %247 = arith.addf %245, %246 : vector<8x128xf32>
    %248 = vector.extract_strided_slice %237 {offsets = [0, 128], sizes = [8, 128], strides = [1, 1]} : vector<8x256xf32> to vector<8x128xf32>
    %249 = arith.mulf %248, %217 : vector<8x128xf32>
    %250 = vector.extract_strided_slice %237 {offsets = [0, 0], sizes = [8, 128], strides = [1, 1]} : vector<8x256xf32> to vector<8x128xf32>
    %251 = arith.mulf %250, %239 : vector<8x128xf32>
    %252 = arith.addf %249, %251 : vector<8x128xf32>
    %253 = math.tanh %252 : vector<8x128xf32>
    %254 = arith.mulf %247, %253 : vector<8x128xf32>
    %255 = arith.truncf %254 : vector<8x128xf32> to vector<8x128xbf16>
    %256 = arith.index_cast %224 : i32 to index
    %c0_83 = arith.constant 0 : index
    %257 = vector.load %arg5[%256, %c0_83] : memref<64x128xbf16, #tpu.memory_space<vmem>>, vector<8x128xbf16>
    tpu.vector_store %arg5[%256, %c0_83], %255 {strides = array<i32>} : memref<64x128xbf16, #tpu.memory_space<vmem>>, vector<8x128xbf16>,
    %c7_i32 = arith.constant 7 : i32
    %c8_i32_84 = arith.constant 8 : i32
    %258 = arith.muli %c7_i32, %c8_i32_84 : i32
    %259 = tpu.assume_multiple %258, 8 : i32
    %260 = arith.index_cast %259 : i32 to index
    %c0_85 = arith.constant 0 : index
    %261 = vector.load %arg8[%260, %c0_85] : memref<64x512xf32, #tpu.memory_space<vmem>>, vector<8x512xf32>
    %262 = arith.truncf %254 : vector<8x128xf32> to vector<8x128xbf16>
    %cst_86 = arith.constant dense<0.000000e+00> : vector<8x512xf32>
    %263 = tpu.matmul %262, %10, %cst_86 {dimension_numbers = #tpu.dot_dimension_numbers<[1], [0], [0], [1], [0, 0, 1, 1], [], []>} : vector<8x128xbf16>, vector<128x512xbf16>, vector<8x512xf32> -> vector<8x512xf32>
    %264 = arith.addf %261, %263 : vector<8x512xf32>
    %265 = vector.extract_strided_slice %264 {offsets = [0, 0], sizes = [8, 256], strides = [1, 1]} : vector<8x512xf32> to vector<8x256xf32>
    %cst_87 = arith.constant 5.000000e-01 : f32
    %266 = vector.broadcast %cst_87 : f32 to vector<8x256xf32>
    %267 = arith.mulf %266, %265 : vector<8x256xf32>
    %268 = math.tanh %267 : vector<8x256xf32>
    %cst_88 = arith.constant 5.000000e-01 : f32
    %269 = vector.broadcast %cst_88 : f32 to vector<8x256xf32>
    %270 = arith.mulf %269, %268 : vector<8x256xf32>
    %cst_89 = arith.constant 5.000000e-01 : f32
    %271 = vector.broadcast %cst_89 : f32 to vector<8x256xf32>
    %272 = arith.addf %270, %271 : vector<8x256xf32>
    %273 = vector.extract_strided_slice %264 {offsets = [0, 256], sizes = [8, 128], strides = [1, 1]} : vector<8x512xf32> to vector<8x128xf32>
    %274 = math.tanh %273 : vector<8x128xf32>
    %275 = vector.extract_strided_slice %264 {offsets = [0, 384], sizes = [8, 128], strides = [1, 1]} : vector<8x512xf32> to vector<8x128xf32>
    %cst_90 = arith.constant 5.000000e-01 : f32
    %276 = vector.broadcast %cst_90 : f32 to vector<8x128xf32>
    %277 = arith.mulf %276, %275 : vector<8x128xf32>
    %278 = math.tanh %277 : vector<8x128xf32>
    %cst_91 = arith.constant 5.000000e-01 : f32
    %279 = vector.broadcast %cst_91 : f32 to vector<8x128xf32>
    %280 = arith.mulf %279, %278 : vector<8x128xf32>
    %cst_92 = arith.constant 5.000000e-01 : f32
    %281 = vector.broadcast %cst_92 : f32 to vector<8x128xf32>
    %282 = arith.addf %280, %281 : vector<8x128xf32>
    %283 = vector.extract_strided_slice %272 {offsets = [0, 128], sizes = [8, 128], strides = [1, 1]} : vector<8x256xf32> to vector<8x128xf32>
    %284 = arith.mulf %283, %252 : vector<8x128xf32>
    %285 = vector.extract_strided_slice %272 {offsets = [0, 0], sizes = [8, 128], strides = [1, 1]} : vector<8x256xf32> to vector<8x128xf32>
    %286 = arith.mulf %285, %274 : vector<8x128xf32>
    %287 = arith.addf %284, %286 : vector<8x128xf32>
    %288 = math.tanh %287 : vector<8x128xf32>
    %289 = arith.mulf %282, %288 : vector<8x128xf32>
    %290 = arith.truncf %289 : vector<8x128xf32> to vector<8x128xbf16>
    %291 = arith.index_cast %259 : i32 to index
    %c0_93 = arith.constant 0 : index
    %292 = vector.load %arg5[%291, %c0_93] : memref<64x128xbf16, #tpu.memory_space<vmem>>, vector<8x128xbf16>
    tpu.vector_store %arg5[%291, %c0_93], %290 {strides = array<i32>} : memref<64x128xbf16, #tpu.memory_space<vmem>>, vector<8x128xbf16>,
    %c8_i32_94 = arith.constant 8 : i32
    %c0_95 = arith.constant 0 : index
    %c0_96 = arith.constant 0 : index
    %293 = vector.load %arg6[%c0_95, %c0_96] : memref<8x128xf32, #tpu.memory_space<vmem>>, vector<8x128xf32>
    tpu.vector_store %arg6[%c0_95, %c0_96], %289 {strides = array<i32>} : memref<8x128xf32, #tpu.memory_space<vmem>>, vector<8x128xf32>,
    %c0_97 = arith.constant 0 : index
    %c0_98 = arith.constant 0 : index
    %294 = vector.load %arg7[%c0_97, %c0_98] : memref<8x128xf32, #tpu.memory_space<vmem>>, vector<8x128xf32>
    tpu.vector_store %arg7[%c0_97, %c0_98], %287 {strides = array<i32>} : memref<8x128xf32, #tpu.memory_space<vmem>>, vector<8x128xf32>,
    return
  }
  func.func @transform_0(%arg0: i32) -> (i32, i32) {
    %c0_i32 = arith.constant 0 : i32
    %c0_i32_0 = arith.constant 0 : i32
    return %arg0, %c0_i32 : i32, i32
  }
  func.func @transform_1(%arg0: i32) -> (i32, i32) {
    %c0_i32 = arith.constant 0 : i32
    %c0_i32_0 = arith.constant 0 : i32
    %c0_i32_1 = arith.constant 0 : i32
    return %c0_i32, %c0_i32_0 : i32, i32
  }
  func.func @transform_2(%arg0: i32) -> (i32, i32) {
    %c0_i32 = arith.constant 0 : i32
    %c0_i32_0 = arith.constant 0 : i32
    %c0_i32_1 = arith.constant 0 : i32
    return %c0_i32, %c0_i32_0 : i32, i32
  }
  func.func @transform_3(%arg0: i32) -> (i32, i32) {
    %c0_i32 = arith.constant 0 : i32
    %c0_i32_0 = arith.constant 0 : i32
    %c0_i32_1 = arith.constant 0 : i32
    return %c0_i32, %c0_i32_0 : i32, i32
  }
  func.func @transform_4(%arg0: i32) -> (i32, i32) {
    %c0_i32 = arith.constant 0 : i32
    %c0_i32_0 = arith.constant 0 : i32
    return %arg0, %c0_i32 : i32, i32
  }
}

module attributes {stable_mosaic.version = 11 : i64} {
  func.func @_lstm_last_fc_kernel(%arg0: i32, %arg1: memref<64x128xbf16, #tpu.memory_space<vmem>>, %arg2: memref<128x512xbf16, #tpu.memory_space<vmem>>, %arg3: memref<128x512xbf16, #tpu.memory_space<vmem>>, %arg4: memref<1x512xf32, #tpu.memory_space<vmem>>, %arg5: memref<128x128xbf16, #tpu.memory_space<vmem>>, %arg6: memref<1x128xf32, #tpu.memory_space<vmem>>, %arg7: memref<8x128xf32, #tpu.memory_space<vmem>>, %arg8: memref<8x128xf32, #tpu.memory_space<vmem>>, %arg9: memref<8x128xf32, #tpu.memory_space<vmem>>, %arg10: memref<64x512xf32, #tpu.memory_space<vmem>>) attributes {dimension_semantics = [#tpu.dimension_semantics<arbitrary>], iteration_bounds = array<i64: 1>, scalar_prefetch = 0 : i64, scratch_operands = 3 : i64, tpu.core_type = #tpu.core_type<tc>, window_params = [{transform_indices = @transform_0, window_bounds = array<i64: 64, 128>}, {pipeline_mode = #tpu.pipeline_mode<synchronous>, transform_indices = @transform_1, window_bounds = array<i64: 128, 512>}, {pipeline_mode = #tpu.pipeline_mode<synchronous>, transform_indices = @transform_2, window_bounds = array<i64: 128, 512>}, {pipeline_mode = #tpu.pipeline_mode<synchronous>, transform_indices = @transform_3, window_bounds = array<i64: 1, 512>}, {pipeline_mode = #tpu.pipeline_mode<synchronous>, transform_indices = @transform_4, window_bounds = array<i64: 128, 128>}, {pipeline_mode = #tpu.pipeline_mode<synchronous>, transform_indices = @transform_5, window_bounds = array<i64: 1, 128>}, {pipeline_mode = #tpu.pipeline_mode<synchronous>, transform_indices = @transform_6, window_bounds = array<i64: 8, 128>}]} {
    %c0_i32 = arith.constant 0 : i32
    %0 = arith.cmpi eq, %arg0, %c0_i32 : i32
    %1 = arith.extui %0 : i1 to i32
    %c0_i32_0 = arith.constant 0 : i32
    %2 = arith.cmpi ne, %1, %c0_i32_0 : i32
    scf.if %2 {
      %cst_95 = arith.constant 0.000000e+00 : f32
      %277 = vector.broadcast %cst_95 : f32 to vector<8x128xf32>
      %c0_96 = arith.constant 0 : index
      %c0_97 = arith.constant 0 : index
      %278 = vector.load %arg7[%c0_96, %c0_97] : memref<8x128xf32, #tpu.memory_space<vmem>>, vector<8x128xf32>
      tpu.vector_store %arg7[%c0_96, %c0_97], %277 {strides = array<i32>} : memref<8x128xf32, #tpu.memory_space<vmem>>, vector<8x128xf32>,
    } else {
    }
    %c0_i32_1 = arith.constant 0 : i32
    %3 = arith.cmpi eq, %arg0, %c0_i32_1 : i32
    %4 = arith.extui %3 : i1 to i32
    %c0_i32_2 = arith.constant 0 : i32
    %5 = arith.cmpi ne, %4, %c0_i32_2 : i32
    scf.if %5 {
      %cst_95 = arith.constant 0.000000e+00 : f32
      %277 = vector.broadcast %cst_95 : f32 to vector<8x128xf32>
      %c0_96 = arith.constant 0 : index
      %c0_97 = arith.constant 0 : index
      %278 = vector.load %arg8[%c0_96, %c0_97] : memref<8x128xf32, #tpu.memory_space<vmem>>, vector<8x128xf32>
      tpu.vector_store %arg8[%c0_96, %c0_97], %277 {strides = array<i32>} : memref<8x128xf32, #tpu.memory_space<vmem>>, vector<8x128xf32>,
      %cst_98 = arith.constant 0.000000e+00 : f32
      %279 = vector.broadcast %cst_98 : f32 to vector<8x128xf32>
      %c0_99 = arith.constant 0 : index
      %c0_100 = arith.constant 0 : index
      %280 = vector.load %arg9[%c0_99, %c0_100] : memref<8x128xf32, #tpu.memory_space<vmem>>, vector<8x128xf32>
      tpu.vector_store %arg9[%c0_99, %c0_100], %279 {strides = array<i32>} : memref<8x128xf32, #tpu.memory_space<vmem>>, vector<8x128xf32>,
    } else {
    }
    %c0 = arith.constant 0 : index
    %c0_3 = arith.constant 0 : index
    %6 = vector.load %arg1[%c0, %c0_3] : memref<64x128xbf16, #tpu.memory_space<vmem>>, vector<64x128xbf16>
    %c0_4 = arith.constant 0 : index
    %c0_5 = arith.constant 0 : index
    %7 = vector.load %arg2[%c0_4, %c0_5] : memref<128x512xbf16, #tpu.memory_space<vmem>>, vector<128x512xbf16>
    %cst = arith.constant dense<0.000000e+00> : vector<64x512xf32>
    %8 = tpu.matmul %6, %7, %cst {dimension_numbers = #tpu.dot_dimension_numbers<[1], [0], [0], [1], [0, 0, 1, 1], [], []>} : vector<64x128xbf16>, vector<128x512xbf16>, vector<64x512xf32> -> vector<64x512xf32>
    %c0_6 = arith.constant 0 : index
    %c0_7 = arith.constant 0 : index
    %9 = vector.load %arg4[%c0_6, %c0_7] : memref<1x512xf32, #tpu.memory_space<vmem>>, vector<1x512xf32>
    %10 = vector.broadcast %9 : vector<1x512xf32> to vector<64x512xf32>
    %11 = arith.addf %8, %10 : vector<64x512xf32>
    %c0_8 = arith.constant 0 : index
    %c0_9 = arith.constant 0 : index
    %12 = vector.load %arg10[%c0_8, %c0_9] : memref<64x512xf32, #tpu.memory_space<vmem>>, vector<64x512xf32>
    tpu.vector_store %arg10[%c0_8, %c0_9], %11 {strides = array<i32>} : memref<64x512xf32, #tpu.memory_space<vmem>>, vector<64x512xf32>,
    %c0_10 = arith.constant 0 : index
    %c0_11 = arith.constant 0 : index
    %13 = vector.load %arg3[%c0_10, %c0_11] : memref<128x512xbf16, #tpu.memory_space<vmem>>, vector<128x512xbf16>
    %c0_12 = arith.constant 0 : index
    %c0_13 = arith.constant 0 : index
    %14 = vector.load %arg8[%c0_12, %c0_13] : memref<8x128xf32, #tpu.memory_space<vmem>>, vector<8x128xf32>
    %c0_14 = arith.constant 0 : index
    %c0_15 = arith.constant 0 : index
    %15 = vector.load %arg9[%c0_14, %c0_15] : memref<8x128xf32, #tpu.memory_space<vmem>>, vector<8x128xf32>
    %c0_i32_16 = arith.constant 0 : i32
    %c8_i32 = arith.constant 8 : i32
    %16 = arith.muli %c0_i32_16, %c8_i32 : i32
    %17 = tpu.assume_multiple %16, 8 : i32
    %18 = arith.index_cast %17 : i32 to index
    %c0_17 = arith.constant 0 : index
    %19 = vector.load %arg10[%18, %c0_17] : memref<64x512xf32, #tpu.memory_space<vmem>>, vector<8x512xf32>
    %20 = arith.truncf %14 : vector<8x128xf32> to vector<8x128xbf16>
    %cst_18 = arith.constant dense<0.000000e+00> : vector<8x512xf32>
    %21 = tpu.matmul %20, %13, %cst_18 {dimension_numbers = #tpu.dot_dimension_numbers<[1], [0], [0], [1], [0, 0, 1, 1], [], []>} : vector<8x128xbf16>, vector<128x512xbf16>, vector<8x512xf32> -> vector<8x512xf32>
    %22 = arith.addf %19, %21 : vector<8x512xf32>
    %23 = vector.extract_strided_slice %22 {offsets = [0, 0], sizes = [8, 256], strides = [1, 1]} : vector<8x512xf32> to vector<8x256xf32>
    %cst_19 = arith.constant 5.000000e-01 : f32
    %24 = vector.broadcast %cst_19 : f32 to vector<8x256xf32>
    %25 = arith.mulf %24, %23 : vector<8x256xf32>
    %26 = math.tanh %25 : vector<8x256xf32>
    %cst_20 = arith.constant 5.000000e-01 : f32
    %27 = vector.broadcast %cst_20 : f32 to vector<8x256xf32>
    %28 = arith.mulf %27, %26 : vector<8x256xf32>
    %cst_21 = arith.constant 5.000000e-01 : f32
    %29 = vector.broadcast %cst_21 : f32 to vector<8x256xf32>
    %30 = arith.addf %28, %29 : vector<8x256xf32>
    %31 = vector.extract_strided_slice %22 {offsets = [0, 256], sizes = [8, 128], strides = [1, 1]} : vector<8x512xf32> to vector<8x128xf32>
    %32 = math.tanh %31 : vector<8x128xf32>
    %33 = vector.extract_strided_slice %22 {offsets = [0, 384], sizes = [8, 128], strides = [1, 1]} : vector<8x512xf32> to vector<8x128xf32>
    %cst_22 = arith.constant 5.000000e-01 : f32
    %34 = vector.broadcast %cst_22 : f32 to vector<8x128xf32>
    %35 = arith.mulf %34, %33 : vector<8x128xf32>
    %36 = math.tanh %35 : vector<8x128xf32>
    %cst_23 = arith.constant 5.000000e-01 : f32
    %37 = vector.broadcast %cst_23 : f32 to vector<8x128xf32>
    %38 = arith.mulf %37, %36 : vector<8x128xf32>
    %cst_24 = arith.constant 5.000000e-01 : f32
    %39 = vector.broadcast %cst_24 : f32 to vector<8x128xf32>
    %40 = arith.addf %38, %39 : vector<8x128xf32>
    %41 = vector.extract_strided_slice %30 {offsets = [0, 128], sizes = [8, 128], strides = [1, 1]} : vector<8x256xf32> to vector<8x128xf32>
    %42 = arith.mulf %41, %15 : vector<8x128xf32>
    %43 = vector.extract_strided_slice %30 {offsets = [0, 0], sizes = [8, 128], strides = [1, 1]} : vector<8x256xf32> to vector<8x128xf32>
    %44 = arith.mulf %43, %32 : vector<8x128xf32>
    %45 = arith.addf %42, %44 : vector<8x128xf32>
    %46 = math.tanh %45 : vector<8x128xf32>
    %47 = arith.mulf %40, %46 : vector<8x128xf32>
    %c1_i32 = arith.constant 1 : i32
    %c8_i32_25 = arith.constant 8 : i32
    %48 = arith.muli %c1_i32, %c8_i32_25 : i32
    %49 = tpu.assume_multiple %48, 8 : i32
    %50 = arith.index_cast %49 : i32 to index
    %c0_26 = arith.constant 0 : index
    %51 = vector.load %arg10[%50, %c0_26] : memref<64x512xf32, #tpu.memory_space<vmem>>, vector<8x512xf32>
    %52 = arith.truncf %47 : vector<8x128xf32> to vector<8x128xbf16>
    %cst_27 = arith.constant dense<0.000000e+00> : vector<8x512xf32>
    %53 = tpu.matmul %52, %13, %cst_27 {dimension_numbers = #tpu.dot_dimension_numbers<[1], [0], [0], [1], [0, 0, 1, 1], [], []>} : vector<8x128xbf16>, vector<128x512xbf16>, vector<8x512xf32> -> vector<8x512xf32>
    %54 = arith.addf %51, %53 : vector<8x512xf32>
    %55 = vector.extract_strided_slice %54 {offsets = [0, 0], sizes = [8, 256], strides = [1, 1]} : vector<8x512xf32> to vector<8x256xf32>
    %cst_28 = arith.constant 5.000000e-01 : f32
    %56 = vector.broadcast %cst_28 : f32 to vector<8x256xf32>
    %57 = arith.mulf %56, %55 : vector<8x256xf32>
    %58 = math.tanh %57 : vector<8x256xf32>
    %cst_29 = arith.constant 5.000000e-01 : f32
    %59 = vector.broadcast %cst_29 : f32 to vector<8x256xf32>
    %60 = arith.mulf %59, %58 : vector<8x256xf32>
    %cst_30 = arith.constant 5.000000e-01 : f32
    %61 = vector.broadcast %cst_30 : f32 to vector<8x256xf32>
    %62 = arith.addf %60, %61 : vector<8x256xf32>
    %63 = vector.extract_strided_slice %54 {offsets = [0, 256], sizes = [8, 128], strides = [1, 1]} : vector<8x512xf32> to vector<8x128xf32>
    %64 = math.tanh %63 : vector<8x128xf32>
    %65 = vector.extract_strided_slice %54 {offsets = [0, 384], sizes = [8, 128], strides = [1, 1]} : vector<8x512xf32> to vector<8x128xf32>
    %cst_31 = arith.constant 5.000000e-01 : f32
    %66 = vector.broadcast %cst_31 : f32 to vector<8x128xf32>
    %67 = arith.mulf %66, %65 : vector<8x128xf32>
    %68 = math.tanh %67 : vector<8x128xf32>
    %cst_32 = arith.constant 5.000000e-01 : f32
    %69 = vector.broadcast %cst_32 : f32 to vector<8x128xf32>
    %70 = arith.mulf %69, %68 : vector<8x128xf32>
    %cst_33 = arith.constant 5.000000e-01 : f32
    %71 = vector.broadcast %cst_33 : f32 to vector<8x128xf32>
    %72 = arith.addf %70, %71 : vector<8x128xf32>
    %73 = vector.extract_strided_slice %62 {offsets = [0, 128], sizes = [8, 128], strides = [1, 1]} : vector<8x256xf32> to vector<8x128xf32>
    %74 = arith.mulf %73, %45 : vector<8x128xf32>
    %75 = vector.extract_strided_slice %62 {offsets = [0, 0], sizes = [8, 128], strides = [1, 1]} : vector<8x256xf32> to vector<8x128xf32>
    %76 = arith.mulf %75, %64 : vector<8x128xf32>
    %77 = arith.addf %74, %76 : vector<8x128xf32>
    %78 = math.tanh %77 : vector<8x128xf32>
    %79 = arith.mulf %72, %78 : vector<8x128xf32>
    %c2_i32 = arith.constant 2 : i32
    %c8_i32_34 = arith.constant 8 : i32
    %80 = arith.muli %c2_i32, %c8_i32_34 : i32
    %81 = tpu.assume_multiple %80, 8 : i32
    %82 = arith.index_cast %81 : i32 to index
    %c0_35 = arith.constant 0 : index
    %83 = vector.load %arg10[%82, %c0_35] : memref<64x512xf32, #tpu.memory_space<vmem>>, vector<8x512xf32>
    %84 = arith.truncf %79 : vector<8x128xf32> to vector<8x128xbf16>
    %cst_36 = arith.constant dense<0.000000e+00> : vector<8x512xf32>
    %85 = tpu.matmul %84, %13, %cst_36 {dimension_numbers = #tpu.dot_dimension_numbers<[1], [0], [0], [1], [0, 0, 1, 1], [], []>} : vector<8x128xbf16>, vector<128x512xbf16>, vector<8x512xf32> -> vector<8x512xf32>
    %86 = arith.addf %83, %85 : vector<8x512xf32>
    %87 = vector.extract_strided_slice %86 {offsets = [0, 0], sizes = [8, 256], strides = [1, 1]} : vector<8x512xf32> to vector<8x256xf32>
    %cst_37 = arith.constant 5.000000e-01 : f32
    %88 = vector.broadcast %cst_37 : f32 to vector<8x256xf32>
    %89 = arith.mulf %88, %87 : vector<8x256xf32>
    %90 = math.tanh %89 : vector<8x256xf32>
    %cst_38 = arith.constant 5.000000e-01 : f32
    %91 = vector.broadcast %cst_38 : f32 to vector<8x256xf32>
    %92 = arith.mulf %91, %90 : vector<8x256xf32>
    %cst_39 = arith.constant 5.000000e-01 : f32
    %93 = vector.broadcast %cst_39 : f32 to vector<8x256xf32>
    %94 = arith.addf %92, %93 : vector<8x256xf32>
    %95 = vector.extract_strided_slice %86 {offsets = [0, 256], sizes = [8, 128], strides = [1, 1]} : vector<8x512xf32> to vector<8x128xf32>
    %96 = math.tanh %95 : vector<8x128xf32>
    %97 = vector.extract_strided_slice %86 {offsets = [0, 384], sizes = [8, 128], strides = [1, 1]} : vector<8x512xf32> to vector<8x128xf32>
    %cst_40 = arith.constant 5.000000e-01 : f32
    %98 = vector.broadcast %cst_40 : f32 to vector<8x128xf32>
    %99 = arith.mulf %98, %97 : vector<8x128xf32>
    %100 = math.tanh %99 : vector<8x128xf32>
    %cst_41 = arith.constant 5.000000e-01 : f32
    %101 = vector.broadcast %cst_41 : f32 to vector<8x128xf32>
    %102 = arith.mulf %101, %100 : vector<8x128xf32>
    %cst_42 = arith.constant 5.000000e-01 : f32
    %103 = vector.broadcast %cst_42 : f32 to vector<8x128xf32>
    %104 = arith.addf %102, %103 : vector<8x128xf32>
    %105 = vector.extract_strided_slice %94 {offsets = [0, 128], sizes = [8, 128], strides = [1, 1]} : vector<8x256xf32> to vector<8x128xf32>
    %106 = arith.mulf %105, %77 : vector<8x128xf32>
    %107 = vector.extract_strided_slice %94 {offsets = [0, 0], sizes = [8, 128], strides = [1, 1]} : vector<8x256xf32> to vector<8x128xf32>
    %108 = arith.mulf %107, %96 : vector<8x128xf32>
    %109 = arith.addf %106, %108 : vector<8x128xf32>
    %110 = math.tanh %109 : vector<8x128xf32>
    %111 = arith.mulf %104, %110 : vector<8x128xf32>
    %c3_i32 = arith.constant 3 : i32
    %c8_i32_43 = arith.constant 8 : i32
    %112 = arith.muli %c3_i32, %c8_i32_43 : i32
    %113 = tpu.assume_multiple %112, 8 : i32
    %114 = arith.index_cast %113 : i32 to index
    %c0_44 = arith.constant 0 : index
    %115 = vector.load %arg10[%114, %c0_44] : memref<64x512xf32, #tpu.memory_space<vmem>>, vector<8x512xf32>
    %116 = arith.truncf %111 : vector<8x128xf32> to vector<8x128xbf16>
    %cst_45 = arith.constant dense<0.000000e+00> : vector<8x512xf32>
    %117 = tpu.matmul %116, %13, %cst_45 {dimension_numbers = #tpu.dot_dimension_numbers<[1], [0], [0], [1], [0, 0, 1, 1], [], []>} : vector<8x128xbf16>, vector<128x512xbf16>, vector<8x512xf32> -> vector<8x512xf32>
    %118 = arith.addf %115, %117 : vector<8x512xf32>
    %119 = vector.extract_strided_slice %118 {offsets = [0, 0], sizes = [8, 256], strides = [1, 1]} : vector<8x512xf32> to vector<8x256xf32>
    %cst_46 = arith.constant 5.000000e-01 : f32
    %120 = vector.broadcast %cst_46 : f32 to vector<8x256xf32>
    %121 = arith.mulf %120, %119 : vector<8x256xf32>
    %122 = math.tanh %121 : vector<8x256xf32>
    %cst_47 = arith.constant 5.000000e-01 : f32
    %123 = vector.broadcast %cst_47 : f32 to vector<8x256xf32>
    %124 = arith.mulf %123, %122 : vector<8x256xf32>
    %cst_48 = arith.constant 5.000000e-01 : f32
    %125 = vector.broadcast %cst_48 : f32 to vector<8x256xf32>
    %126 = arith.addf %124, %125 : vector<8x256xf32>
    %127 = vector.extract_strided_slice %118 {offsets = [0, 256], sizes = [8, 128], strides = [1, 1]} : vector<8x512xf32> to vector<8x128xf32>
    %128 = math.tanh %127 : vector<8x128xf32>
    %129 = vector.extract_strided_slice %118 {offsets = [0, 384], sizes = [8, 128], strides = [1, 1]} : vector<8x512xf32> to vector<8x128xf32>
    %cst_49 = arith.constant 5.000000e-01 : f32
    %130 = vector.broadcast %cst_49 : f32 to vector<8x128xf32>
    %131 = arith.mulf %130, %129 : vector<8x128xf32>
    %132 = math.tanh %131 : vector<8x128xf32>
    %cst_50 = arith.constant 5.000000e-01 : f32
    %133 = vector.broadcast %cst_50 : f32 to vector<8x128xf32>
    %134 = arith.mulf %133, %132 : vector<8x128xf32>
    %cst_51 = arith.constant 5.000000e-01 : f32
    %135 = vector.broadcast %cst_51 : f32 to vector<8x128xf32>
    %136 = arith.addf %134, %135 : vector<8x128xf32>
    %137 = vector.extract_strided_slice %126 {offsets = [0, 128], sizes = [8, 128], strides = [1, 1]} : vector<8x256xf32> to vector<8x128xf32>
    %138 = arith.mulf %137, %109 : vector<8x128xf32>
    %139 = vector.extract_strided_slice %126 {offsets = [0, 0], sizes = [8, 128], strides = [1, 1]} : vector<8x256xf32> to vector<8x128xf32>
    %140 = arith.mulf %139, %128 : vector<8x128xf32>
    %141 = arith.addf %138, %140 : vector<8x128xf32>
    %142 = math.tanh %141 : vector<8x128xf32>
    %143 = arith.mulf %136, %142 : vector<8x128xf32>
    %c4_i32 = arith.constant 4 : i32
    %c8_i32_52 = arith.constant 8 : i32
    %144 = arith.muli %c4_i32, %c8_i32_52 : i32
    %145 = tpu.assume_multiple %144, 8 : i32
    %146 = arith.index_cast %145 : i32 to index
    %c0_53 = arith.constant 0 : index
    %147 = vector.load %arg10[%146, %c0_53] : memref<64x512xf32, #tpu.memory_space<vmem>>, vector<8x512xf32>
    %148 = arith.truncf %143 : vector<8x128xf32> to vector<8x128xbf16>
    %cst_54 = arith.constant dense<0.000000e+00> : vector<8x512xf32>
    %149 = tpu.matmul %148, %13, %cst_54 {dimension_numbers = #tpu.dot_dimension_numbers<[1], [0], [0], [1], [0, 0, 1, 1], [], []>} : vector<8x128xbf16>, vector<128x512xbf16>, vector<8x512xf32> -> vector<8x512xf32>
    %150 = arith.addf %147, %149 : vector<8x512xf32>
    %151 = vector.extract_strided_slice %150 {offsets = [0, 0], sizes = [8, 256], strides = [1, 1]} : vector<8x512xf32> to vector<8x256xf32>
    %cst_55 = arith.constant 5.000000e-01 : f32
    %152 = vector.broadcast %cst_55 : f32 to vector<8x256xf32>
    %153 = arith.mulf %152, %151 : vector<8x256xf32>
    %154 = math.tanh %153 : vector<8x256xf32>
    %cst_56 = arith.constant 5.000000e-01 : f32
    %155 = vector.broadcast %cst_56 : f32 to vector<8x256xf32>
    %156 = arith.mulf %155, %154 : vector<8x256xf32>
    %cst_57 = arith.constant 5.000000e-01 : f32
    %157 = vector.broadcast %cst_57 : f32 to vector<8x256xf32>
    %158 = arith.addf %156, %157 : vector<8x256xf32>
    %159 = vector.extract_strided_slice %150 {offsets = [0, 256], sizes = [8, 128], strides = [1, 1]} : vector<8x512xf32> to vector<8x128xf32>
    %160 = math.tanh %159 : vector<8x128xf32>
    %161 = vector.extract_strided_slice %150 {offsets = [0, 384], sizes = [8, 128], strides = [1, 1]} : vector<8x512xf32> to vector<8x128xf32>
    %cst_58 = arith.constant 5.000000e-01 : f32
    %162 = vector.broadcast %cst_58 : f32 to vector<8x128xf32>
    %163 = arith.mulf %162, %161 : vector<8x128xf32>
    %164 = math.tanh %163 : vector<8x128xf32>
    %cst_59 = arith.constant 5.000000e-01 : f32
    %165 = vector.broadcast %cst_59 : f32 to vector<8x128xf32>
    %166 = arith.mulf %165, %164 : vector<8x128xf32>
    %cst_60 = arith.constant 5.000000e-01 : f32
    %167 = vector.broadcast %cst_60 : f32 to vector<8x128xf32>
    %168 = arith.addf %166, %167 : vector<8x128xf32>
    %169 = vector.extract_strided_slice %158 {offsets = [0, 128], sizes = [8, 128], strides = [1, 1]} : vector<8x256xf32> to vector<8x128xf32>
    %170 = arith.mulf %169, %141 : vector<8x128xf32>
    %171 = vector.extract_strided_slice %158 {offsets = [0, 0], sizes = [8, 128], strides = [1, 1]} : vector<8x256xf32> to vector<8x128xf32>
    %172 = arith.mulf %171, %160 : vector<8x128xf32>
    %173 = arith.addf %170, %172 : vector<8x128xf32>
    %174 = math.tanh %173 : vector<8x128xf32>
    %175 = arith.mulf %168, %174 : vector<8x128xf32>
    %c5_i32 = arith.constant 5 : i32
    %c8_i32_61 = arith.constant 8 : i32
    %176 = arith.muli %c5_i32, %c8_i32_61 : i32
    %177 = tpu.assume_multiple %176, 8 : i32
    %178 = arith.index_cast %177 : i32 to index
    %c0_62 = arith.constant 0 : index
    %179 = vector.load %arg10[%178, %c0_62] : memref<64x512xf32, #tpu.memory_space<vmem>>, vector<8x512xf32>
    %180 = arith.truncf %175 : vector<8x128xf32> to vector<8x128xbf16>
    %cst_63 = arith.constant dense<0.000000e+00> : vector<8x512xf32>
    %181 = tpu.matmul %180, %13, %cst_63 {dimension_numbers = #tpu.dot_dimension_numbers<[1], [0], [0], [1], [0, 0, 1, 1], [], []>} : vector<8x128xbf16>, vector<128x512xbf16>, vector<8x512xf32> -> vector<8x512xf32>
    %182 = arith.addf %179, %181 : vector<8x512xf32>
    %183 = vector.extract_strided_slice %182 {offsets = [0, 0], sizes = [8, 256], strides = [1, 1]} : vector<8x512xf32> to vector<8x256xf32>
    %cst_64 = arith.constant 5.000000e-01 : f32
    %184 = vector.broadcast %cst_64 : f32 to vector<8x256xf32>
    %185 = arith.mulf %184, %183 : vector<8x256xf32>
    %186 = math.tanh %185 : vector<8x256xf32>
    %cst_65 = arith.constant 5.000000e-01 : f32
    %187 = vector.broadcast %cst_65 : f32 to vector<8x256xf32>
    %188 = arith.mulf %187, %186 : vector<8x256xf32>
    %cst_66 = arith.constant 5.000000e-01 : f32
    %189 = vector.broadcast %cst_66 : f32 to vector<8x256xf32>
    %190 = arith.addf %188, %189 : vector<8x256xf32>
    %191 = vector.extract_strided_slice %182 {offsets = [0, 256], sizes = [8, 128], strides = [1, 1]} : vector<8x512xf32> to vector<8x128xf32>
    %192 = math.tanh %191 : vector<8x128xf32>
    %193 = vector.extract_strided_slice %182 {offsets = [0, 384], sizes = [8, 128], strides = [1, 1]} : vector<8x512xf32> to vector<8x128xf32>
    %cst_67 = arith.constant 5.000000e-01 : f32
    %194 = vector.broadcast %cst_67 : f32 to vector<8x128xf32>
    %195 = arith.mulf %194, %193 : vector<8x128xf32>
    %196 = math.tanh %195 : vector<8x128xf32>
    %cst_68 = arith.constant 5.000000e-01 : f32
    %197 = vector.broadcast %cst_68 : f32 to vector<8x128xf32>
    %198 = arith.mulf %197, %196 : vector<8x128xf32>
    %cst_69 = arith.constant 5.000000e-01 : f32
    %199 = vector.broadcast %cst_69 : f32 to vector<8x128xf32>
    %200 = arith.addf %198, %199 : vector<8x128xf32>
    %201 = vector.extract_strided_slice %190 {offsets = [0, 128], sizes = [8, 128], strides = [1, 1]} : vector<8x256xf32> to vector<8x128xf32>
    %202 = arith.mulf %201, %173 : vector<8x128xf32>
    %203 = vector.extract_strided_slice %190 {offsets = [0, 0], sizes = [8, 128], strides = [1, 1]} : vector<8x256xf32> to vector<8x128xf32>
    %204 = arith.mulf %203, %192 : vector<8x128xf32>
    %205 = arith.addf %202, %204 : vector<8x128xf32>
    %206 = math.tanh %205 : vector<8x128xf32>
    %207 = arith.mulf %200, %206 : vector<8x128xf32>
    %c6_i32 = arith.constant 6 : i32
    %c8_i32_70 = arith.constant 8 : i32
    %208 = arith.muli %c6_i32, %c8_i32_70 : i32
    %209 = tpu.assume_multiple %208, 8 : i32
    %210 = arith.index_cast %209 : i32 to index
    %c0_71 = arith.constant 0 : index
    %211 = vector.load %arg10[%210, %c0_71] : memref<64x512xf32, #tpu.memory_space<vmem>>, vector<8x512xf32>
    %212 = arith.truncf %207 : vector<8x128xf32> to vector<8x128xbf16>
    %cst_72 = arith.constant dense<0.000000e+00> : vector<8x512xf32>
    %213 = tpu.matmul %212, %13, %cst_72 {dimension_numbers = #tpu.dot_dimension_numbers<[1], [0], [0], [1], [0, 0, 1, 1], [], []>} : vector<8x128xbf16>, vector<128x512xbf16>, vector<8x512xf32> -> vector<8x512xf32>
    %214 = arith.addf %211, %213 : vector<8x512xf32>
    %215 = vector.extract_strided_slice %214 {offsets = [0, 0], sizes = [8, 256], strides = [1, 1]} : vector<8x512xf32> to vector<8x256xf32>
    %cst_73 = arith.constant 5.000000e-01 : f32
    %216 = vector.broadcast %cst_73 : f32 to vector<8x256xf32>
    %217 = arith.mulf %216, %215 : vector<8x256xf32>
    %218 = math.tanh %217 : vector<8x256xf32>
    %cst_74 = arith.constant 5.000000e-01 : f32
    %219 = vector.broadcast %cst_74 : f32 to vector<8x256xf32>
    %220 = arith.mulf %219, %218 : vector<8x256xf32>
    %cst_75 = arith.constant 5.000000e-01 : f32
    %221 = vector.broadcast %cst_75 : f32 to vector<8x256xf32>
    %222 = arith.addf %220, %221 : vector<8x256xf32>
    %223 = vector.extract_strided_slice %214 {offsets = [0, 256], sizes = [8, 128], strides = [1, 1]} : vector<8x512xf32> to vector<8x128xf32>
    %224 = math.tanh %223 : vector<8x128xf32>
    %225 = vector.extract_strided_slice %214 {offsets = [0, 384], sizes = [8, 128], strides = [1, 1]} : vector<8x512xf32> to vector<8x128xf32>
    %cst_76 = arith.constant 5.000000e-01 : f32
    %226 = vector.broadcast %cst_76 : f32 to vector<8x128xf32>
    %227 = arith.mulf %226, %225 : vector<8x128xf32>
    %228 = math.tanh %227 : vector<8x128xf32>
    %cst_77 = arith.constant 5.000000e-01 : f32
    %229 = vector.broadcast %cst_77 : f32 to vector<8x128xf32>
    %230 = arith.mulf %229, %228 : vector<8x128xf32>
    %cst_78 = arith.constant 5.000000e-01 : f32
    %231 = vector.broadcast %cst_78 : f32 to vector<8x128xf32>
    %232 = arith.addf %230, %231 : vector<8x128xf32>
    %233 = vector.extract_strided_slice %222 {offsets = [0, 128], sizes = [8, 128], strides = [1, 1]} : vector<8x256xf32> to vector<8x128xf32>
    %234 = arith.mulf %233, %205 : vector<8x128xf32>
    %235 = vector.extract_strided_slice %222 {offsets = [0, 0], sizes = [8, 128], strides = [1, 1]} : vector<8x256xf32> to vector<8x128xf32>
    %236 = arith.mulf %235, %224 : vector<8x128xf32>
    %237 = arith.addf %234, %236 : vector<8x128xf32>
    %238 = math.tanh %237 : vector<8x128xf32>
    %239 = arith.mulf %232, %238 : vector<8x128xf32>
    %c7_i32 = arith.constant 7 : i32
    %c8_i32_79 = arith.constant 8 : i32
    %240 = arith.muli %c7_i32, %c8_i32_79 : i32
    %241 = tpu.assume_multiple %240, 8 : i32
    %242 = arith.index_cast %241 : i32 to index
    %c0_80 = arith.constant 0 : index
    %243 = vector.load %arg10[%242, %c0_80] : memref<64x512xf32, #tpu.memory_space<vmem>>, vector<8x512xf32>
    %244 = arith.truncf %239 : vector<8x128xf32> to vector<8x128xbf16>
    %cst_81 = arith.constant dense<0.000000e+00> : vector<8x512xf32>
    %245 = tpu.matmul %244, %13, %cst_81 {dimension_numbers = #tpu.dot_dimension_numbers<[1], [0], [0], [1], [0, 0, 1, 1], [], []>} : vector<8x128xbf16>, vector<128x512xbf16>, vector<8x512xf32> -> vector<8x512xf32>
    %246 = arith.addf %243, %245 : vector<8x512xf32>
    %247 = vector.extract_strided_slice %246 {offsets = [0, 0], sizes = [8, 256], strides = [1, 1]} : vector<8x512xf32> to vector<8x256xf32>
    %cst_82 = arith.constant 5.000000e-01 : f32
    %248 = vector.broadcast %cst_82 : f32 to vector<8x256xf32>
    %249 = arith.mulf %248, %247 : vector<8x256xf32>
    %250 = math.tanh %249 : vector<8x256xf32>
    %cst_83 = arith.constant 5.000000e-01 : f32
    %251 = vector.broadcast %cst_83 : f32 to vector<8x256xf32>
    %252 = arith.mulf %251, %250 : vector<8x256xf32>
    %cst_84 = arith.constant 5.000000e-01 : f32
    %253 = vector.broadcast %cst_84 : f32 to vector<8x256xf32>
    %254 = arith.addf %252, %253 : vector<8x256xf32>
    %255 = vector.extract_strided_slice %246 {offsets = [0, 256], sizes = [8, 128], strides = [1, 1]} : vector<8x512xf32> to vector<8x128xf32>
    %256 = math.tanh %255 : vector<8x128xf32>
    %257 = vector.extract_strided_slice %246 {offsets = [0, 384], sizes = [8, 128], strides = [1, 1]} : vector<8x512xf32> to vector<8x128xf32>
    %cst_85 = arith.constant 5.000000e-01 : f32
    %258 = vector.broadcast %cst_85 : f32 to vector<8x128xf32>
    %259 = arith.mulf %258, %257 : vector<8x128xf32>
    %260 = math.tanh %259 : vector<8x128xf32>
    %cst_86 = arith.constant 5.000000e-01 : f32
    %261 = vector.broadcast %cst_86 : f32 to vector<8x128xf32>
    %262 = arith.mulf %261, %260 : vector<8x128xf32>
    %cst_87 = arith.constant 5.000000e-01 : f32
    %263 = vector.broadcast %cst_87 : f32 to vector<8x128xf32>
    %264 = arith.addf %262, %263 : vector<8x128xf32>
    %265 = vector.extract_strided_slice %254 {offsets = [0, 128], sizes = [8, 128], strides = [1, 1]} : vector<8x256xf32> to vector<8x128xf32>
    %266 = arith.mulf %265, %237 : vector<8x128xf32>
    %267 = vector.extract_strided_slice %254 {offsets = [0, 0], sizes = [8, 128], strides = [1, 1]} : vector<8x256xf32> to vector<8x128xf32>
    %268 = arith.mulf %267, %256 : vector<8x128xf32>
    %269 = arith.addf %266, %268 : vector<8x128xf32>
    %270 = math.tanh %269 : vector<8x128xf32>
    %271 = arith.mulf %264, %270 : vector<8x128xf32>
    %c8_i32_88 = arith.constant 8 : i32
    %c0_89 = arith.constant 0 : index
    %c0_90 = arith.constant 0 : index
    %272 = vector.load %arg8[%c0_89, %c0_90] : memref<8x128xf32, #tpu.memory_space<vmem>>, vector<8x128xf32>
    tpu.vector_store %arg8[%c0_89, %c0_90], %271 {strides = array<i32>} : memref<8x128xf32, #tpu.memory_space<vmem>>, vector<8x128xf32>,
    %c0_91 = arith.constant 0 : index
    %c0_92 = arith.constant 0 : index
    %273 = vector.load %arg9[%c0_91, %c0_92] : memref<8x128xf32, #tpu.memory_space<vmem>>, vector<8x128xf32>
    tpu.vector_store %arg9[%c0_91, %c0_92], %269 {strides = array<i32>} : memref<8x128xf32, #tpu.memory_space<vmem>>, vector<8x128xf32>,
    %c0_i32_93 = arith.constant 0 : i32
    %274 = arith.cmpi eq, %arg0, %c0_i32_93 : i32
    %275 = arith.extui %274 : i1 to i32
    %c0_i32_94 = arith.constant 0 : i32
    %276 = arith.cmpi ne, %275, %c0_i32_94 : i32
    scf.if %276 {
      %277 = arith.truncf %271 : vector<8x128xf32> to vector<8x128xbf16>
      %c0_95 = arith.constant 0 : index
      %c0_96 = arith.constant 0 : index
      %278 = vector.load %arg5[%c0_95, %c0_96] : memref<128x128xbf16, #tpu.memory_space<vmem>>, vector<128x128xbf16>
      %cst_97 = arith.constant dense<0.000000e+00> : vector<8x128xf32>
      %279 = tpu.matmul %277, %278, %cst_97 {dimension_numbers = #tpu.dot_dimension_numbers<[1], [0], [0], [1], [0, 0, 1, 1], [], []>} : vector<8x128xbf16>, vector<128x128xbf16>, vector<8x128xf32> -> vector<8x128xf32>
      %c0_98 = arith.constant 0 : index
      %c0_99 = arith.constant 0 : index
      %280 = vector.load %arg6[%c0_98, %c0_99] : memref<1x128xf32, #tpu.memory_space<vmem>>, vector<1x128xf32>
      %281 = vector.broadcast %280 : vector<1x128xf32> to vector<8x128xf32>
      %282 = arith.addf %279, %281 : vector<8x128xf32>
      %c0_100 = arith.constant 0 : index
      %c0_101 = arith.constant 0 : index
      %283 = vector.load %arg7[%c0_100, %c0_101] : memref<8x128xf32, #tpu.memory_space<vmem>>, vector<8x128xf32>
      tpu.vector_store %arg7[%c0_100, %c0_101], %282 {strides = array<i32>} : memref<8x128xf32, #tpu.memory_space<vmem>>, vector<8x128xf32>,
    } else {
    }
    return
  }
  func.func @transform_0(%arg0: i32) -> (i32, i32) {
    %c0_i32 = arith.constant 0 : i32
    %c0_i32_0 = arith.constant 0 : i32
    return %arg0, %c0_i32 : i32, i32
  }
  func.func @transform_1(%arg0: i32) -> (i32, i32) {
    %c0_i32 = arith.constant 0 : i32
    %c0_i32_0 = arith.constant 0 : i32
    %c0_i32_1 = arith.constant 0 : i32
    return %c0_i32, %c0_i32_0 : i32, i32
  }
  func.func @transform_2(%arg0: i32) -> (i32, i32) {
    %c0_i32 = arith.constant 0 : i32
    %c0_i32_0 = arith.constant 0 : i32
    %c0_i32_1 = arith.constant 0 : i32
    return %c0_i32, %c0_i32_0 : i32, i32
  }
  func.func @transform_3(%arg0: i32) -> (i32, i32) {
    %c0_i32 = arith.constant 0 : i32
    %c0_i32_0 = arith.constant 0 : i32
    %c0_i32_1 = arith.constant 0 : i32
    return %c0_i32, %c0_i32_0 : i32, i32
  }
  func.func @transform_4(%arg0: i32) -> (i32, i32) {
    %c0_i32 = arith.constant 0 : i32
    %c0_i32_0 = arith.constant 0 : i32
    %c0_i32_1 = arith.constant 0 : i32
    return %c0_i32, %c0_i32_0 : i32, i32
  }
  func.func @transform_5(%arg0: i32) -> (i32, i32) {
    %c0_i32 = arith.constant 0 : i32
    %c0_i32_0 = arith.constant 0 : i32
    %c0_i32_1 = arith.constant 0 : i32
    return %c0_i32, %c0_i32_0 : i32, i32
  }
  func.func @transform_6(%arg0: i32) -> (i32, i32) {
    %c0_i32 = arith.constant 0 : i32
    %c0_i32_0 = arith.constant 0 : i32
    %c0_i32_1 = arith.constant 0 : i32
    return %c0_i32, %c0_i32_0 : i32, i32
  }
}

</mosaic_0001>

<bundles_post_ra>
// kernel: _lambda_.2
= control target key start
LH: loop header
LB: loop body
LE: loop exit
PB: predicated region body
PF: predicated region fallthrough
CT: control target
= control target key end

     0   :  { %9 = vsyncpa [#allocation6], 0  ;;  %s2327_s0 = inlined_call_operand.vmem [shape: bf16[64,128], index: 0, kind: input, shape index: {}]   ;;  %s2328_s1 = inlined_call_operand.hbm [shape: bf16[128,512], index: 1, kind: input, shape index: {}]   ;;  %s2329_s2 = inlined_call_operand.hbm [shape: bf16[128,512], index: 2, kind: input, shape index: {}]   ;;  %s2330_s3 = inlined_call_operand.vmem [shape: f32[1,512], index: 3, kind: input, shape index: {}]   ;;  %s2331_s4 = inlined_call_operand.vmem [shape: bf16[64,128], index: 4, kind: output, shape index: {}]  }
   0x1   :  { %s17_s17 = sshll.u32 %s2328_s1, 4  ;;  %s18_s17 = int_to_ptr.hbm [resolvable:$true] %s17_s17 }
   0x2   :  { %10 = vsyncpa [#allocation8], 0  ;;  %s1802_s18 = smov [#allocation5]   ;;  %s30_s22 = sshll.u32 %s2329_s2, 4  ;;  %s31_s22 = int_to_ptr.hbm [resolvable:$true] %s30_s22 }
   0x3   :  { %s19_s19 = sshll.u32 %s1802_s18, 4  ;;  %s1803_s23 = smov 256   ;;  %s20_s19 = int_to_ptr.vmem [resolvable:$true] %s19_s19 }
   0x4   :  { %s1804_s24 = smov 16   ;;  %s1805_s25 = smov [#allocation7]  }
   0x5   :  { %25 = dma.hbm_to_vmem [thread:$0]  %s18_s17, 4096, %s20_s19, [#allocation6], %s1803_s23, %s1803_s23, %s1804_s24  }
   0x6   :  { %s32_s26 = sshll.u32 %s1805_s25, 4  ;;  %s33_s26 = int_to_ptr.vmem [resolvable:$true] %s32_s26 }
   0x7   :  { %38 = dma.hbm_to_vmem [thread:$0]  %s31_s22, 4096, %s33_s26, [#allocation8], %s1803_s23, %s1803_s23, %s1804_s24  }
   0x8   :  { %1798 = dma.done.wait [#allocation6], 4096  }
   0x9   :  { %1799 = vsyncadd [#allocation6], 4294963200 }
   0xa   :  { %1800 = dma.done.wait [#allocation8], 4096  }
   0xb   :  { %1801 = vsyncadd [#allocation8], 4294963200  ;;  %v1448_v0 = vld [vmem:[#allocation5 + $0xe0] sm:$0xf]  ;;  %v1631_v1 = vld [vmem:[#allocation5 + $0xec] sm:$0xf0] }
   0xc   :  { %v1629_v2 = vld [vmem:[#allocation5 + $0xe4] sm:$0xf]  ;;  %v1449_v3 = vor.u32 %v1631_v1, %v1448_v0  ;;  %v1450_v4 = vld [vmem:[#allocation5 + $0xf0] sm:$0xf0]  ;;  %v1456_v5 = vld [vmem:[#allocation5 + $0xe8] sm:$0xf] }
   0xd   :  { %v1632_v6 = vld [vmem:[#allocation5 + $0xf4] sm:$0xf0]  ;;  %v1453_v7 = vor.u32 %v1629_v2, %v1450_v4  ;;  %v1630_v9 = vld [vmem:[#allocation5 + $0xec] sm:$0xf]  ;;  %v1458_v10 = vld [vmem:[#allocation5 + $0xf8] sm:$0xf0] }
   0xe   :  { %v1457_v8 = vor.u32 %v1632_v6, %v1456_v5  ;;  %v1432_v11 = vld [vmem:[#allocation5 + $0xc0] sm:$0xf]  ;;  %289 = vmatpush.bf16.msra.mxu0 %v1449_v3  ;;  %v1461_v12 = vor.u32 %v1630_v9, %v1458_v10  ;;  %v1627_v13 = vld [vmem:[#allocation5 + $0xcc] sm:$0xf0]  ;;  %v1625_v14 = vld [vmem:[#allocation5 + $0xc4] sm:$0xf] }
   0xf   :  { %v1434_v15 = vld [vmem:[#allocation5 + $0xd0] sm:$0xf0]  ;;  %318 = vmatpush.bf16.msra.mxu1 %v1453_v7  ;;  %v1433_v16 = vor.u32 %v1627_v13, %v1432_v11  ;;  %v1440_v18 = vld [vmem:[#allocation5 + $0xc8] sm:$0xf]  ;;  %v1628_v19 = vld [vmem:[#allocation5 + $0xd4] sm:$0xf0] }
  0x10   :  { %347 = vmatpush.bf16.msra.mxu2 %v1457_v8  ;;  %v1437_v17 = vor.u32 %v1625_v14, %v1434_v15  ;;  %v1626_v20 = vld [vmem:[#allocation5 + $0xcc] sm:$0xf]  ;;  %376 = vmatpush.bf16.msra.mxu3 %v1461_v12  ;;  %v1441_v21 = vor.u32 %v1628_v19, %v1440_v18  ;;  %v1442_v22 = vld [vmem:[#allocation5 + $0xd8] sm:$0xf0]  ;;  %v1416_v23 = vld [vmem:[#allocation5 + $0xa0] sm:$0xf] }
  0x11   :  { %v1623_v24 = vld [vmem:[#allocation5 + $0xac] sm:$0xf0]  ;;  %v1445_v25 = vor.u32 %v1626_v20, %v1442_v22  ;;  %v1621_v26 = vld [vmem:[#allocation5 + $0xa4] sm:$0xf]  ;;  %v1418_v27 = vld [vmem:[#allocation5 + $0xb0] sm:$0xf0] }
  0x12   :  { %v1424_v28 = vld [vmem:[#allocation5 + $0xa8] sm:$0xf]  ;;  %290 = vmatpush.bf16.msra.mxu0 %v1433_v16  ;;  %v1417_v29 = vor.u32 %v1623_v24, %v1416_v23  ;;  %v1624_v30 = vld [vmem:[#allocation5 + $0xb4] sm:$0xf0]  ;;  %v1622_v31 = vld [vmem:[#allocation5 + $0xac] sm:$0xf]  ;;  %v1421_v33 = vor.u32 %v1621_v26, %v1418_v27 }
  0x13   :  { %v1426_v32 = vld [vmem:[#allocation5 + $0xb8] sm:$0xf0]  ;;  %319 = vmatpush.bf16.msra.mxu1 %v1437_v17  ;;  %v1425_v34 = vor.u32 %v1624_v30, %v1424_v28  ;;  %v1400_v35 = vld [vmem:[#allocation5 + $0x80] sm:$0xf]  ;;  %v1619_v36 = vld [vmem:[#allocation5 + $0x8c] sm:$0xf0] }
  0x14   :  { %348 = vmatpush.bf16.msra.mxu2 %v1441_v21  ;;  %v1617_v37 = vld [vmem:[#allocation5 + $0x84] sm:$0xf]  ;;  %377 = vmatpush.bf16.msra.mxu3 %v1445_v25  ;;  %v1429_v38 = vor.u32 %v1622_v31, %v1426_v32  ;;  %v1402_v39 = vld [vmem:[#allocation5 + $0x90] sm:$0xf0]  ;;  %v1408_v40 = vld [vmem:[#allocation5 + $0x88] sm:$0xf]  ;;  %v1401_v44 = vor.u32 %v1619_v36, %v1400_v35 }
  0x15   :  { %v1620_v41 = vld [vmem:[#allocation5 + $0x94] sm:$0xf0]  ;;  %v1618_v42 = vld [vmem:[#allocation5 + $0x8c] sm:$0xf]  ;;  %v1410_v43 = vld [vmem:[#allocation5 + $0x98] sm:$0xf0]  ;;  %v1405_v45 = vor.u32 %v1617_v37, %v1402_v39 }
  0x16   :  { %291 = vmatpush.bf16.msra.mxu0 %v1417_v29  ;;  %v1409_v46 = vor.u32 %v1620_v41, %v1408_v40  ;;  %v1384_v47 = vld [vmem:[#allocation5 + $0x60] sm:$0xf]  ;;  %v1615_v48 = vld [vmem:[#allocation5 + $0x6c] sm:$0xf0]  ;;  %v1613_v49 = vld [vmem:[#allocation5 + $0x64] sm:$0xf]  ;;  %v1413_v50 = vor.u32 %v1618_v42, %v1410_v43 }
  0x17   :  { %320 = vmatpush.bf16.msra.mxu1 %v1421_v33  ;;  %v1386_v51 = vld [vmem:[#allocation5 + $0x70] sm:$0xf0]  ;;  %v1392_v52 = vld [vmem:[#allocation5 + $0x68] sm:$0xf]  ;;  %v1616_v53 = vld [vmem:[#allocation5 + $0x74] sm:$0xf0]  ;;  %v1385_v56 = vor.u32 %v1615_v48, %v1384_v47 }
  0x18   :  { %349 = vmatpush.bf16.msra.mxu2 %v1425_v34  ;;  %378 = vmatpush.bf16.msra.mxu3 %v1429_v38  ;;  %v1614_v54 = vld [vmem:[#allocation5 + $0x6c] sm:$0xf]  ;;  %v1394_v55 = vld [vmem:[#allocation5 + $0x78] sm:$0xf0]  ;;  %v1389_v57 = vor.u32 %v1613_v49, %v1386_v51  ;;  %v1393_v58 = vor.u32 %v1616_v53, %v1392_v52  ;;  %v1368_v59 = vld [vmem:[#allocation5 + $0x40] sm:$0xf] }
  0x19   :  { %v1611_v60 = vld [vmem:[#allocation5 + $0x4c] sm:$0xf0]  ;;  %v1609_v61 = vld [vmem:[#allocation5 + $0x44] sm:$0xf]  ;;  %v1397_v62 = vor.u32 %v1614_v54, %v1394_v55  ;;  %v1370_v63 = vld [vmem:[#allocation5 + $0x50] sm:$0xf0] }
  0x1a   :  { %292 = vmatpush.bf16.msra.mxu0 %v1401_v44  ;;  %v1376_v0 = vld [vmem:[#allocation5 + $0x48] sm:$0xf]  ;;  %v1612_v1 = vld [vmem:[#allocation5 + $0x54] sm:$0xf0]  ;;  %v1610_v2 = vld [vmem:[#allocation5 + $0x4c] sm:$0xf]  ;;  %v1369_v4 = vor.u32 %v1611_v60, %v1368_v59  ;;  %v1373_v5 = vor.u32 %v1609_v61, %v1370_v63 }
  0x1b   :  { %321 = vmatpush.bf16.msra.mxu1 %v1405_v45  ;;  %v1378_v3 = vld [vmem:[#allocation5 + $0x58] sm:$0xf0]  ;;  %v1377_v6 = vor.u32 %v1612_v1, %v1376_v0  ;;  %v1352_v7 = vld [vmem:[#allocation5 + $0x20] sm:$0xf]  ;;  %v1607_v8 = vld [vmem:[#allocation5 + $0x2c] sm:$0xf0] }
  0x1c   :  { %350 = vmatpush.bf16.msra.mxu2 %v1409_v46  ;;  %379 = vmatpush.bf16.msra.mxu3 %v1413_v50  ;;  %v1605_v9 = vld [vmem:[#allocation5 + $0x24] sm:$0xf]  ;;  %v1381_v10 = vor.u32 %v1610_v2, %v1378_v3  ;;  %v1354_v11 = vld [vmem:[#allocation5 + $0x30] sm:$0xf0]  ;;  %v1360_v12 = vld [vmem:[#allocation5 + $0x28] sm:$0xf]  ;;  %v1353_v16 = vor.u32 %v1607_v8, %v1352_v7 }
  0x1d   :  { %v1608_v13 = vld [vmem:[#allocation5 + $0x34] sm:$0xf0]  ;;  %v1606_v14 = vld [vmem:[#allocation5 + $0x2c] sm:$0xf]  ;;  %v1362_v15 = vld [vmem:[#allocation5 + $0x38] sm:$0xf0]  ;;  %v1357_v18 = vor.u32 %v1605_v9, %v1354_v11 }
  0x1e   :  { %293 = vmatpush.bf16.msra.mxu0 %v1385_v56  ;;  %v1336_v17 = vld [vmem:[#allocation5] sm:$0xf]  ;;  %v1361_v19 = vor.u32 %v1608_v13, %v1360_v12  ;;  %v1603_v20 = vld [vmem:[#allocation5 + $0xc] sm:$0xf0]  ;;  %v1601_v21 = vld [vmem:[#allocation5 + $0x4] sm:$0xf]  ;;  %v1365_v23 = vor.u32 %v1606_v14, %v1362_v15 }
  0x1f   :  { %322 = vmatpush.bf16.msra.mxu1 %v1389_v57  ;;  %v1338_v22 = vld [vmem:[#allocation5 + $0x10] sm:$0xf0]  ;;  %v1344_v24 = vld [vmem:[#allocation5 + $0x8] sm:$0xf]  ;;  %v1604_v25 = vld [vmem:[#allocation5 + $0x14] sm:$0xf0]  ;;  %v1337_v30 = vor.u32 %v1603_v20, %v1336_v17 }
  0x20   :  { %351 = vmatpush.bf16.msra.mxu2 %v1393_v58  ;;  %380 = vmatpush.bf16.msra.mxu3 %v1397_v62  ;;  %v1602_v26 = vld [vmem:[#allocation5 + $0xc] sm:$0xf]  ;;  %v1346_v27 = vld [vmem:[#allocation5 + $0x18] sm:$0xf0]  ;;  %v1576_v28 = vld [vmem:[#allocation7 + $0xe0] sm:$0xf]  ;;  %v1341_v33 = vor.u32 %v1601_v21, %v1338_v22  ;;  %v1345_v34 = vor.u32 %v1604_v25, %v1344_v24 }
  0x21   :  { %v1663_v29 = vld [vmem:[#allocation7 + $0xec] sm:$0xf0]  ;;  %v1661_v31 = vld [vmem:[#allocation7 + $0xe4] sm:$0xf]  ;;  %v1578_v32 = vld [vmem:[#allocation7 + $0xf0] sm:$0xf0]  ;;  %v1349_v36 = vor.u32 %v1602_v26, %v1346_v27 }
  0x22   :  { %294 = vmatpush.bf16.msra.mxu0 %v1369_v4  ;;  %v1597_v35 = vld [vmem:[%s2327_s0] sm:$0xff]  ;;  %v1841_v37 = vor.u32 %v1663_v29, %v1576_v28  ;;  %v1584_v38 = vld [vmem:[#allocation7 + $0xe8] sm:$0xf]  ;;  %v1664_v39 = vld [vmem:[#allocation7 + $0xf4] sm:$0xf0]  ;;  %v1843_v41 = vor.u32 %v1661_v31, %v1578_v32 }
  0x23   :  { %323 = vmatpush.bf16.msra.mxu1 %v1373_v5  ;;  %v1662_v40 = vld [vmem:[#allocation7 + $0xec] sm:$0xf]  ;;  %v1586_v42 = vld [vmem:[#allocation7 + $0xf8] sm:$0xf0]  ;;  %v1560_v43 = vld [vmem:[#allocation7 + $0xc0] sm:$0xf]  ;;  %v1845_v47 = vor.u32 %v1664_v39, %v1584_v38 }
  0x24   :  { %352 = vmatpush.bf16.msra.mxu2 %v1377_v6  ;;  %381 = vmatpush.bf16.msra.mxu3 %v1381_v10  ;;  %v1659_v44 = vld [vmem:[#allocation7 + $0xcc] sm:$0xf0]  ;;  %v1657_v45 = vld [vmem:[#allocation7 + $0xc4] sm:$0xf]  ;;  %v1562_v46 = vld [vmem:[#allocation7 + $0xd0] sm:$0xf0]  ;;  %v1848_v48 = vor.u32 %v1662_v40, %v1586_v42 }
  0x25   :  { %v1850_v49 = vor.u32 %v1659_v44, %v1560_v43  ;;  %v1568_v50 = vld [vmem:[#allocation7 + $0xc8] sm:$0xf]  ;;  %v1660_v51 = vld [vmem:[#allocation7 + $0xd4] sm:$0xf0]  ;;  %v1658_v52 = vld [vmem:[#allocation7 + $0xcc] sm:$0xf]  ;;  %v1853_v53 = vor.u32 %v1657_v45, %v1562_v46 }
  0x26   :  { %295 = vmatpush.bf16.msra.mxu0 %v1353_v16  ;;  %v1570_v54 = vld [vmem:[#allocation7 + $0xd8] sm:$0xf0]  ;;  %v1544_v55 = vld [vmem:[#allocation7 + $0xa0] sm:$0xf]  ;;  %v1655_v56 = vld [vmem:[#allocation7 + $0xac] sm:$0xf0]  ;;  %v1856_v59 = vor.u32 %v1660_v51, %v1568_v50 }
  0x27   :  { %324 = vmatpush.bf16.msra.mxu1 %v1357_v18  ;;  %v1653_v57 = vld [vmem:[#allocation7 + $0xa4] sm:$0xf]  ;;  %v1546_v58 = vld [vmem:[#allocation7 + $0xb0] sm:$0xf0]  ;;  %v1860_v60 = vor.u32 %v1658_v52, %v1570_v54  ;;  %v1862_v61 = vor.u32 %v1655_v56, %v1544_v55  ;;  %v1552_v62 = vld [vmem:[#allocation7 + $0xa8] sm:$0xf] }
  0x28   :  { %353 = vmatpush.bf16.msra.mxu2 %v1361_v19  ;;  %382 = vmatpush.bf16.msra.mxu3 %v1365_v23  ;;  %v1656_v63 = vld [vmem:[#allocation7 + $0xb4] sm:$0xf0]  ;;  %v1654_v0 = vld [vmem:[#allocation7 + $0xac] sm:$0xf]  ;;  %v1865_v1 = vor.u32 %v1653_v57, %v1546_v58  ;;  %v1554_v2 = vld [vmem:[#allocation7 + $0xb8] sm:$0xf0] }
  0x29   :  { %v1528_v3 = vld [vmem:[#allocation7 + $0x80] sm:$0xf]  ;;  %v1651_v4 = vld [vmem:[#allocation7 + $0x8c] sm:$0xf0]  ;;  %v1649_v5 = vld [vmem:[#allocation7 + $0x84] sm:$0xf]  ;;  %v1868_v7 = vor.u32 %v1656_v63, %v1552_v62  ;;  %v1872_v8 = vor.u32 %v1654_v0, %v1554_v2 }
  0x2a   :  { %296 = vmatpush.bf16.msra.mxu0 %v1337_v30  ;;  %v1530_v6 = vld [vmem:[#allocation7 + $0x90] sm:$0xf0]  ;;  %v1874_v9 = vor.u32 %v1651_v4, %v1528_v3  ;;  %v1536_v10 = vld [vmem:[#allocation7 + $0x88] sm:$0xf]  ;;  %v1652_v11 = vld [vmem:[#allocation7 + $0x94] sm:$0xf0] }
  0x2b   :  { %325 = vmatpush.bf16.msra.mxu1 %v1341_v33  ;;  %v1650_v12 = vld [vmem:[#allocation7 + $0x8c] sm:$0xf]  ;;  %v1877_v13 = vor.u32 %v1649_v5, %v1530_v6  ;;  %v1538_v14 = vld [vmem:[#allocation7 + $0x98] sm:$0xf0]  ;;  %v1512_v15 = vld [vmem:[#allocation7 + $0x60] sm:$0xf]  ;;  %v1883_v20 = vor.u32 %v1652_v11, %v1536_v10 }
  0x2c   :  { %354 = vmatpush.bf16.msra.mxu2 %v1345_v34  ;;  %383 = vmatpush.bf16.msra.mxu3 %v1349_v36  ;;  %v1647_v16 = vld [vmem:[#allocation7 + $0x6c] sm:$0xf0]  ;;  %v1645_v17 = vld [vmem:[#allocation7 + $0x64] sm:$0xf]  ;;  %v1514_v18 = vld [vmem:[#allocation7 + $0x70] sm:$0xf0]  ;;  %v1887_v21 = vor.u32 %v1650_v12, %v1538_v14 }
  0x2d   :  { %297 = vmatmul.bf16.vlgmr.msra.gmra.mxu0 %v1597_v35  ;;  %v1598_v19 = vld [vmem:[%s2327_s0 + $0x8] sm:$0xff]  ;;  %v1889_v22 = vor.u32 %v1647_v16, %v1512_v15  ;;  %v1648_v24 = vld [vmem:[#allocation7 + $0x74] sm:$0xf0]  ;;  %v1892_v26 = vor.u32 %v1645_v17, %v1514_v18  ;;  %v1522_v27 = vld [vmem:[#allocation7 + $0x78] sm:$0xf0]  ;;  %v1806_v18 = vmov 0.0|0.0  }
  0x2e   :  { %639 = vmatpush.bf16.msrb.mxu0 %v1841_v37  ;;  %326 = vmatmul.bf16.vlgmr.msra.gmra.mxu1 %v1597_v35  ;;  %v1520_v23 = vld [vmem:[#allocation7 + $0x68] sm:$0xf]  ;;  %v1646_v25 = vld [vmem:[#allocation7 + $0x6c] sm:$0xf]  ;;  %v1496_v28 = vld [vmem:[#allocation7 + $0x40] sm:$0xf] }
  0x2f   :  { %652 = vmatpush.bf16.msrb.mxu1 %v1843_v41  ;;  %355 = vmatmul.bf16.vlgmr.msra.gmra.mxu2 %v1597_v35  ;;  %v1643_v29 = vld [vmem:[#allocation7 + $0x4c] sm:$0xf0]  ;;  %v1641_v30 = vld [vmem:[#allocation7 + $0x44] sm:$0xf]  ;;  %v1498_v31 = vld [vmem:[#allocation7 + $0x50] sm:$0xf0]  ;;  %v1895_v32 = vor.u32 %v1648_v24, %v1520_v23  ;;  %v1899_v33 = vor.u32 %v1646_v25, %v1522_v27 }
  0x30   :  { %384 = vmatmul.bf16.vlgmr.msra.gmra.mxu3 %v1597_v35  ;;  %665 = vmatpush.bf16.msrb.mxu2 %v1845_v47  ;;  %v1901_v34 = vor.u32 %v1643_v29, %v1496_v28  ;;  %v1504_v35 = vld [vmem:[#allocation7 + $0x48] sm:$0xf]  ;;  %v1644_v36 = vld [vmem:[#allocation7 + $0x54] sm:$0xf0]  ;;  %v1904_v38 = vor.u32 %v1641_v30, %v1498_v31  ;;  %v1642_v39 = vld [vmem:[#allocation7 + $0x4c] sm:$0xf] }
  0x31   :  { %678 = vmatpush.bf16.msrb.mxu3 %v1848_v48  ;;  %v1506_v40 = vld [vmem:[#allocation7 + $0x58] sm:$0xf0]  ;;  %v1907_v42 = vor.u32 %v1644_v36, %v1504_v35  ;;  %v1480_v43 = vld [vmem:[#allocation7 + $0x20] sm:$0xf]  ;;  %v1639_v44 = vld [vmem:[#allocation7 + $0x2c] sm:$0xf0] }
  0x32   :  { %640 = vmatpush.bf16.msrb.mxu0 %v1850_v49  ;;  %v1637_v45 = vld [vmem:[#allocation7 + $0x24] sm:$0xf]  ;;  %v1911_v46 = vor.u32 %v1642_v39, %v1506_v40  ;;  %v1913_v50 = vor.u32 %v1639_v44, %v1480_v43  ;;  %v1482_v51 = vld [vmem:[#allocation7 + $0x30] sm:$0xf0]  ;;  %v1488_v52 = vld [vmem:[#allocation7 + $0x28] sm:$0xf] }
  0x33   :  { %653 = vmatpush.bf16.msrb.mxu1 %v1853_v53  ;;  %v1640_v54 = vld [vmem:[#allocation7 + $0x34] sm:$0xf0]  ;;  %v1916_v55 = vor.u32 %v1637_v45, %v1482_v51  ;;  %v1638_v56 = vld [vmem:[#allocation7 + $0x2c] sm:$0xf]  ;;  %v1490_v57 = vld [vmem:[#allocation7 + $0x38] sm:$0xf0] }
  0x34   :  { %666 = vmatpush.bf16.msrb.mxu2 %v1856_v59  ;;  %v1464_v58 = vld [vmem:[#allocation7] sm:$0xf]  ;;  %v1635_v62 = vld [vmem:[#allocation7 + $0xc] sm:$0xf0]  ;;  %v1633_v63 = vld [vmem:[#allocation7 + $0x4] sm:$0xf]  ;;  %v1919_v2 = vor.u32 %v1640_v54, %v1488_v52  ;;  %v1923_v3 = vor.u32 %v1638_v56, %v1490_v57 }
  0x35   :  { %679 = vmatpush.bf16.msrb.mxu3 %v1860_v60  ;;  %v1466_v0 = vld [vmem:[#allocation7 + $0x10] sm:$0xf0]  ;;  %v1925_v4 = vor.u32 %v1635_v62, %v1464_v58  ;;  %v1472_v5 = vld [vmem:[#allocation7 + $0x8] sm:$0xf]  ;;  %v1636_v6 = vld [vmem:[#allocation7 + $0x14] sm:$0xf0] }
  0x36   :  { %641 = vmatpush.bf16.msrb.mxu0 %v1862_v61  ;;  %v1928_v10 = vor.u32 %v1633_v63, %v1466_v0  ;;  %v1634_v11 = vld [vmem:[#allocation7 + $0xc] sm:$0xf]  ;;  %v1474_v12 = vld [vmem:[#allocation7 + $0x18] sm:$0xf0]  ;;  %v1931_v14 = vor.u32 %v1636_v6, %v1472_v5  ;;  %v1599_v16 = vld [vmem:[%s2327_s0 + $0x10] sm:$0xff] }
  0x37   :  { %654 = vmatpush.bf16.msrb.mxu1 %v1865_v1  ;;  %v1935_v15 = vor.u32 %v1634_v11, %v1474_v12  ;;  %v1600_v17 = vld [vmem:[%s2327_s0 + $0x18] sm:$0xff]  ;;  %v95_v24 = vld [vmem:[%s2330_s3] sm:$0xf] }
  0x38   :  { %667 = vmatpush.bf16.msrb.mxu2 %v1868_v7  ;;  %v97_v25 = vperm.slane %v95_v24, 0  ;;  %v98_v28 = vperm.slane %v95_v24, 1  ;;  %v2021_v39 = vperm.slane %v95_v24, 2  ;;  %v2023_v40 = vperm.slane %v95_v24, 3 }
  0x39   :  { %680 = vmatpush.bf16.msrb.mxu3 %v1872_v8 }
  0x3a   :  { %642 = vmatpush.bf16.msrb.mxu0 %v1874_v9 }
  0x3b   :  { %655 = vmatpush.bf16.msrb.mxu1 %v1877_v13 }
  0x3c   :  { %668 = vmatpush.bf16.msrb.mxu2 %v1883_v20 }
  0x3d   :  { %681 = vmatpush.bf16.msrb.mxu3 %v1887_v21  ;;  %302 = vmatmul.bf16.gmra.mxu0 %v1598_v19 }
  0x3e   :  { %643 = vmatpush.bf16.msrb.mxu0 %v1889_v22  ;;  %331 = vmatmul.bf16.gmra.mxu1 %v1598_v19 }
  0x3f   :  { %656 = vmatpush.bf16.msrb.mxu1 %v1892_v26  ;;  %360 = vmatmul.bf16.gmra.mxu2 %v1598_v19 }
  0x40   :  { %389 = vmatmul.bf16.gmra.mxu3 %v1598_v19  ;;  %669 = vmatpush.bf16.msrb.mxu2 %v1895_v32 }
  0x41   :  { %682 = vmatpush.bf16.msrb.mxu3 %v1899_v33 }
  0x42   :  { %644 = vmatpush.bf16.msrb.mxu0 %v1901_v34 }
  0x43   :  { %657 = vmatpush.bf16.msrb.mxu1 %v1904_v38 }
  0x44   :  { %670 = vmatpush.bf16.msrb.mxu2 %v1907_v42 }
  0x45   :  { %683 = vmatpush.bf16.msrb.mxu3 %v1911_v46 }
  0x46   :  { %645 = vmatpush.bf16.msrb.mxu0 %v1913_v50 }
  0x47   :  { %658 = vmatpush.bf16.msrb.mxu1 %v1916_v55 }
  0x48   :  { %671 = vmatpush.bf16.msrb.mxu2 %v1919_v2 }
  0x49   :  { %684 = vmatpush.bf16.msrb.mxu3 %v1923_v3 }
  0x4a   :  { %646 = vmatpush.bf16.msrb.mxu0 %v1925_v4 }
  0x4b   :  { %659 = vmatpush.bf16.msrb.mxu1 %v1928_v10 }
  0x4c   :  { %672 = vmatpush.bf16.msrb.mxu2 %v1931_v14 }
  0x4d   :  { %685 = vmatpush.bf16.msrb.mxu3 %v1935_v15  ;;  %307 = vmatmul.bf16.gmra.mxu0 %v1599_v16 }
  0x4e   :  { %722 = vmatpush.bf16.msra.mxu0 %v1841_v37  ;;  %336 = vmatmul.bf16.gmra.mxu1 %v1599_v16 }
  0x4f   :  { %735 = vmatpush.bf16.msra.mxu1 %v1843_v41  ;;  %365 = vmatmul.bf16.gmra.mxu2 %v1599_v16 }
  0x50   :  { %748 = vmatpush.bf16.msra.mxu2 %v1845_v47  ;;  %394 = vmatmul.bf16.gmra.mxu3 %v1599_v16 }
  0x51   :  { %761 = vmatpush.bf16.msra.mxu3 %v1848_v48 }
  0x52   :  { %723 = vmatpush.bf16.msra.mxu0 %v1850_v49 }
  0x53   :  { %736 = vmatpush.bf16.msra.mxu1 %v1853_v53 }
  0x54   :  { %749 = vmatpush.bf16.msra.mxu2 %v1856_v59 }
  0x55   :  { %762 = vmatpush.bf16.msra.mxu3 %v1860_v60 }
  0x56   :  { %724 = vmatpush.bf16.msra.mxu0 %v1862_v61 }
  0x57   :  { %737 = vmatpush.bf16.msra.mxu1 %v1865_v1 }
  0x58   :  { %750 = vmatpush.bf16.msra.mxu2 %v1868_v7 }
  0x59   :  { %763 = vmatpush.bf16.msra.mxu3 %v1872_v8 }
  0x5a   :  { %725 = vmatpush.bf16.msra.mxu0 %v1874_v9 }
  0x5b   :  { %738 = vmatpush.bf16.msra.mxu1 %v1877_v13 }
  0x5c   :  { %751 = vmatpush.bf16.msra.mxu2 %v1883_v20 }
  0x5d   :  { %764 = vmatpush.bf16.msra.mxu3 %v1887_v21  ;;  %312 = vmatmul.bf16.gmra.mxu0 %v1600_v17 }
  0x5e   :  { %726 = vmatpush.bf16.msra.mxu0 %v1889_v22  ;;  %341 = vmatmul.bf16.gmra.mxu1 %v1600_v17 }
  0x5f   :  { %739 = vmatpush.bf16.msra.mxu1 %v1892_v26  ;;  %370 = vmatmul.bf16.gmra.mxu2 %v1600_v17 }
  0x60   :  { %752 = vmatpush.bf16.msra.mxu2 %v1895_v32  ;;  %399 = vmatmul.bf16.gmra.mxu3 %v1600_v17 }
  0x61   :  { %765 = vmatpush.bf16.msra.mxu3 %v1899_v33 }
  0x62   :  { %727 = vmatpush.bf16.msra.mxu0 %v1901_v34 }
  0x63   :  { %740 = vmatpush.bf16.msra.mxu1 %v1904_v38 }
  0x64   :  { %753 = vmatpush.bf16.msra.mxu2 %v1907_v42 }
  0x65   :  { %766 = vmatpush.bf16.msra.mxu3 %v1911_v46 }
  0x66   :  { %728 = vmatpush.bf16.msra.mxu0 %v1913_v50 }
  0x67   :  { %741 = vmatpush.bf16.msra.mxu1 %v1916_v55 }
  0x68   :  { %754 = vmatpush.bf16.msra.mxu2 %v1919_v2 }
  0x69   :  { %767 = vmatpush.bf16.msra.mxu3 %v1923_v3 }
  0x6a   :  { %729 = vmatpush.bf16.msra.mxu0 %v1925_v4 }
  0x6b   :  { %742 = vmatpush.bf16.msra.mxu1 %v1928_v10 }
  0x6c   :  { %755 = vmatpush.bf16.msra.mxu2 %v1931_v14 }
  0x6d   :  { %768 = vmatpush.bf16.msra.mxu3 %v1935_v15  ;;  %647 = vmatmul.bf16.vlgmr.msrb.gmra.mxu0 %v1806_v18 }
  0x6e   :  { %660 = vmatmul.bf16.vlgmr.msrb.gmra.mxu1 %v1806_v18  ;;  %806 = vmatpush.bf16.msrb.mxu0 %v1841_v37 }
  0x6f   :  { %673 = vmatmul.bf16.vlgmr.msrb.gmra.mxu2 %v1806_v18  ;;  %819 = vmatpush.bf16.msrb.mxu1 %v1843_v41 }
  0x70   :  { %686 = vmatmul.bf16.vlgmr.msrb.gmra.mxu3 %v1806_v18  ;;  %832 = vmatpush.bf16.msrb.mxu2 %v1845_v47 }
  0x71   :  { %845 = vmatpush.bf16.msrb.mxu3 %v1848_v48 }
  0x72   :  { %807 = vmatpush.bf16.msrb.mxu0 %v1850_v49 }
  0x73   :  { %820 = vmatpush.bf16.msrb.mxu1 %v1853_v53 }
  0x74   :  { %833 = vmatpush.bf16.msrb.mxu2 %v1856_v59 }
  0x75   :  { %846 = vmatpush.bf16.msrb.mxu3 %v1860_v60 }
  0x76   :  { %808 = vmatpush.bf16.msrb.mxu0 %v1862_v61 }
  0x77   :  { %821 = vmatpush.bf16.msrb.mxu1 %v1865_v1 }
  0x78   :  { %834 = vmatpush.bf16.msrb.mxu2 %v1868_v7 }
  0x79   :  { %847 = vmatpush.bf16.msrb.mxu3 %v1872_v8 }
  0x7a   :  { %809 = vmatpush.bf16.msrb.mxu0 %v1874_v9 }
  0x7b   :  { %822 = vmatpush.bf16.msrb.mxu1 %v1877_v13 }
  0x7c   :  { %835 = vmatpush.bf16.msrb.mxu2 %v1883_v20 }
  0x7d   :  { %848 = vmatpush.bf16.msrb.mxu3 %v1887_v21 }
  0x7e   :  { %810 = vmatpush.bf16.msrb.mxu0 %v1889_v22 }
  0x7f   :  { %823 = vmatpush.bf16.msrb.mxu1 %v1892_v26 }
  0x80   :  { %836 = vmatpush.bf16.msrb.mxu2 %v1895_v32 }
  0x81   :  { %849 = vmatpush.bf16.msrb.mxu3 %v1899_v33 }
  0x82   :  { %811 = vmatpush.bf16.msrb.mxu0 %v1901_v34 }
  0x83   :  { %824 = vmatpush.bf16.msrb.mxu1 %v1904_v38 }
  0x84   :  { %837 = vmatpush.bf16.msrb.mxu2 %v1907_v42 }
  0x85   :  { %850 = vmatpush.bf16.msrb.mxu3 %v1911_v46 }
  0x86   :  { %812 = vmatpush.bf16.msrb.mxu0 %v1913_v50 }
  0x87   :  { %825 = vmatpush.bf16.msrb.mxu1 %v1916_v55 }
  0x88   :  { %838 = vmatpush.bf16.msrb.mxu2 %v1919_v2 }
  0x89   :  { %851 = vmatpush.bf16.msrb.mxu3 %v1923_v3 }
  0x8a   :  { %813 = vmatpush.bf16.msrb.mxu0 %v1925_v4 }
  0x8b   :  { %826 = vmatpush.bf16.msrb.mxu1 %v1928_v10 }
  0x8c   :  { %839 = vmatpush.bf16.msrb.mxu2 %v1931_v14 }
  0x8d   :  { %852 = vmatpush.bf16.msrb.mxu3 %v1935_v15 }
  0xaa   :  { %v298_v19 = vpop.f32.mrf.mxu0 }
  0xab   :  { %v327_v23 = vpop.f32.mrf.mxu1 }
  0xb2   :  { %v2013_v27 = vpop.f32.mrf.mxu2  ;;  %v300_v30 = vpop.f32.mrf.mxu0 }
  0xb3   :  { %v2015_v29 = vpop.f32.mrf.mxu3  ;;  %v2017_v31 = vadd.f32 %v300_v30, %v97_v25  ;;  %v329_v35 = vpop.f32.mrf.mxu1 }
  0xb4   :  { %v2019_v36 = vadd.f32 %v329_v35, %v98_v28 }
  0xba   :  { %v358_v43 = vpop.f32.mrf.mxu2  ;;  %v303_v51 = vpop.f32.mrf.mxu0 }
  0xbb   :  { %v2026_v44 = vadd.f32 %v358_v43, %v2021_v39  ;;  %v387_v45 = vpop.f32.mrf.mxu3  ;;  %v2031_v54 = vadd.f32 %v303_v51, %v97_v25  ;;  %v332_v56 = vpop.f32.mrf.mxu1 }
  0xbc   :  { %v2029_v52 = vadd.f32 %v387_v45, %v2023_v40  ;;  %v2033_v57 = vadd.f32 %v332_v56, %v98_v28 }
  0xc2   :  { %v361_v58 = vpop.f32.mrf.mxu2  ;;  %v305_v0 = vpop.f32.mrf.mxu0 }
  0xc3   :  { %v2036_v62 = vadd.f32 %v361_v58, %v2021_v39  ;;  %v390_v63 = vpop.f32.mrf.mxu3  ;;  %v2041_v6 = vadd.f32 %v305_v0, %v97_v25  ;;  %v334_v11 = vpop.f32.mrf.mxu1 }
  0xc4   :  { %v2039_v5 = vadd.f32 %v390_v63, %v2023_v40  ;;  %v2043_v12 = vadd.f32 %v334_v11, %v98_v28 }
  0xc6   :  { %2332 = vst [vmem:[#allocation11_spill] sm:$0xff] %v2043_v12 }
  0xca   :  { %v363_v16 = vpop.f32.mrf.mxu2  ;;  %v308_v24 = vpop.f32.mrf.mxu0 }
  0xcb   :  { %v2046_v17 = vadd.f32 %v363_v16, %v2021_v39  ;;  %v392_v18 = vpop.f32.mrf.mxu3  ;;  %v2051_v35 = vadd.f32 %v308_v24, %v97_v25  ;;  %v337_v43 = vpop.f32.mrf.mxu1 }
  0xcc   :  { %v2049_v30 = vadd.f32 %v392_v18, %v2023_v40  ;;  %v2053_v45 = vadd.f32 %v337_v43, %v98_v28 }
  0xcd   :  { %2333 = vst [vmem:[#allocation12_spill] sm:$0xff] %v2046_v17 }
  0xce   :  { %2334 = vst [vmem:[#allocation13_spill] sm:$0xff] %v2049_v30 }
  0xcf   :  { %2335 = vst [vmem:[#allocation14_spill] sm:$0xff] %v2051_v35 }
  0xd0   :  { %2336 = vst [vmem:[#allocation15_spill] sm:$0xff] %v2053_v45 }
  0xd2   :  { %v366_v51 = vpop.f32.mrf.mxu2  ;;  %v310_v63 = vpop.f32.mrf.mxu0 }
  0xd3   :  { %v2056_v56 = vadd.f32 %v366_v51, %v2021_v39  ;;  %v395_v58 = vpop.f32.mrf.mxu3  ;;  %v2061_v11 = vadd.f32 %v310_v63, %v97_v25  ;;  %v339_v16 = vpop.f32.mrf.mxu1 }
  0xd4   :  { %v2059_v0 = vadd.f32 %v395_v58, %v2023_v40  ;;  %v2063_v17 = vadd.f32 %v339_v16, %v98_v28 }
  0xd5   :  { %2337 = vst [vmem:[#allocation16_spill] sm:$0xff] %v2056_v56 }
  0xd6   :  { %2338 = vst [vmem:[#allocation17_spill] sm:$0xff] %v2059_v0 }
  0xd7   :  { %2339 = vst [vmem:[#allocation18_spill] sm:$0xff] %v2061_v11 }
  0xd8   :  { %2340 = vst [vmem:[#allocation19_spill] sm:$0xff] %v2063_v17 }
  0xda   :  { %v368_v18 = vpop.f32.mrf.mxu2  ;;  %v313_v45 = vpop.f32.mrf.mxu0 }
  0xdb   :  { %v2066_v24 = vadd.f32 %v368_v18, %v2021_v39  ;;  %v397_v43 = vpop.f32.mrf.mxu3  ;;  %v2071_v51 = vadd.f32 %v313_v45, %v97_v25  ;;  %v342_v56 = vpop.f32.mrf.mxu1 }
  0xdc   :  { %v2069_v35 = vadd.f32 %v397_v43, %v2023_v40  ;;  %v2073_v30 = vadd.f32 %v342_v56, %v98_v28  ;;  %v299_v43 = vadd.f32 %v298_v19, %v97_v25  ;;  %v386_v19 = vadd.f32 %v2015_v29, %v2023_v40 }
  0xdd   :  { %2341 = vst [vmem:[#allocation20_spill] sm:$0xff] %v2066_v24 }
  0xde   :  { %2342 = vst [vmem:[#allocation21_spill] sm:$0xff] %v2069_v35 }
  0xdf   :  { %2343 = vst [vmem:[#allocation22_spill] sm:$0xff] %v2071_v51  ;;  %v328_v51 = vadd.f32 %v327_v23, %v98_v28 }
  0xe0   :  { %2344 = vst [vmem:[#allocation23_spill] sm:$0xff] %v2073_v30 }
  0xe2   :  { %v371_v58 = vpop.f32.mrf.mxu2  ;;  %v315_v17 = vpop.f32.mrf.mxu0 }
  0xe3   :  { %v2076_v63 = vadd.f32 %v371_v58, %v2021_v39  ;;  %v400_v16 = vpop.f32.mrf.mxu3  ;;  %v2081_v18 = vadd.f32 %v315_v17, %v97_v25  ;;  %v344_v24 = vpop.f32.mrf.mxu1 }
  0xe4   :  { %v2079_v11 = vadd.f32 %v400_v16, %v2023_v40  ;;  %v2083_v0 = vadd.f32 %v344_v24, %v98_v28  ;;  %v357_v24 = vadd.f32 %v2013_v27, %v2021_v39 }
  0xe5   :  { %2345 = vst [vmem:[#allocation24_spill] sm:$0xff] %v2076_v63 }
  0xe6   :  { %2346 = vst [vmem:[#allocation25_spill] sm:$0xff] %v2079_v11 }
  0xea   :  { %v373_v45 = vpop.f32.mrf.mxu2  ;;  %v648_v35 = vpop.f32.mrf.mxu0 }
  0xeb   :  { %v2086_v56 = vadd.f32 %v373_v45, %v2021_v39  ;;  %v402_v30 = vpop.f32.mrf.mxu3  ;;  %v691_v63 = vadd.f32 %v648_v35, %v299_v43  ;;  %v661_v12 = vpop.f32.mrf.mxu1 }
  0xec   :  { %v2089_v58 = vadd.f32 %v402_v30, %v2023_v40  ;;  %v692_v16 = vadd.f32 %v661_v12, %v328_v51 }
  0xed   :  { %2347 = vst [vmem:[#allocation26_spill] sm:$0xff] %v2086_v56  ;;  %v695_v11 = vmul.f32 0.5, %v691_v63 }
  0xee   :  { %2348 = vst [vmem:[#allocation27_spill] sm:$0xff] %v2089_v58  ;;  %v696_v17 = vmul.f32 0.5, %v692_v16 }
  0xef   :  { %1670 = vtanh.f32 %v695_v11 }
  0xf0   :  { %1672 = vtanh.f32 %v696_v17 }
  0xf2   :  { %v674_v23 = vpop.f32.mrf.mxu2  ;;  %v650_v45 = vpop.f32.mrf.mxu0 }
  0xf3   :  { %v693_v25 = vadd.f32 %v674_v23, %v357_v24  ;;  %v687_v28 = vpop.f32.mrf.mxu3  ;;  %v663_v30 = vpop.f32.mrf.mxu1 }
  0xf4   :  { %v694_v56 = vadd.f32 %v687_v28, %v386_v19 }
  0xf5   :  { %1674 = vtanh.f32 %v693_v25  ;;  %v1671_v35 = vpop.eup %1670 }
  0xf6   :  { %v704_v43 = vmul.f32 0.5, %v694_v56  ;;  %v1673_v12 = vpop.eup %1672  ;;  %v699_v51 = vmul.f32 0.5, %v1671_v35 }
  0xf7   :  { %v700_v63 = vmul.f32 0.5, %v1673_v12 }
  0xf8   :  { %1676 = vtanh.f32 %v704_v43  ;;  %v701_v11 = vadd.f32 0.5, %v699_v51 }
  0xf9   :  { %v702_v16 = vadd.f32 0.5, %v700_v63 }
  0xfa   :  { %v676_v27 = vpop.f32.mrf.mxu2 }
  0xfb   :  { %v1675_v39 = vpop.eup %1674  ;;  %v689_v17 = vpop.f32.mrf.mxu3  ;;  %v708_v58 = vmul.f32 0.0, %v702_v16 }
  0xfc   :  { %v709_v29 = vmul.f32 %v1675_v39, %v701_v11 }
  0xfe   :  { %v1677_v40 = vpop.eup %1676  ;;  %v2095_v24 = vadd.f32 %v709_v29, %v708_v58 }
  0xff   :  { %v706_v19 = vmul.f32 0.5, %v1677_v40 }
 0x100   :  { %1678 = vtanh.f32 %v2095_v24 }
 0x101   :  { %v707_v23 = vadd.f32 0.5, %v706_v19 }
 0x106   :  { %v1679_v25 = vpop.eup %1678 }
 0x107   :  { %v712_v56 = vmul.f32 %v1679_v25, %v707_v23 }
 0x109   :  { %v713_v28 = vpack.c.bf16 %v712_v56, %v712_v56 }
 0x10b   :  { %714 = vst [vmem:[%s2331_s4] sm:$0xf] %v713_v28  ;;  %730 = vmatmul.bf16.vlgmr.msra.gmra.mxu0 %v713_v28  ;;  %743 = vmatmul.bf16.vlgmr.msra.gmra.mxu1 %v713_v28 }
 0x10c   :  { %756 = vmatmul.bf16.vlgmr.msra.gmra.mxu2 %v713_v28  ;;  %769 = vmatmul.bf16.vlgmr.msra.gmra.mxu3 %v713_v28 }
 0x10d   :  { %890 = vmatpush.bf16.msra.mxu0 %v1841_v37  ;;  %903 = vmatpush.bf16.msra.mxu1 %v1843_v41 }
 0x10e   :  { %916 = vmatpush.bf16.msra.mxu2 %v1845_v47  ;;  %929 = vmatpush.bf16.msra.mxu3 %v1848_v48 }
 0x111   :  { %891 = vmatpush.bf16.msra.mxu0 %v1850_v49  ;;  %904 = vmatpush.bf16.msra.mxu1 %v1853_v53 }
 0x112   :  { %917 = vmatpush.bf16.msra.mxu2 %v1856_v59  ;;  %930 = vmatpush.bf16.msra.mxu3 %v1860_v60 }
 0x115   :  { %892 = vmatpush.bf16.msra.mxu0 %v1862_v61  ;;  %905 = vmatpush.bf16.msra.mxu1 %v1865_v1 }
 0x116   :  { %918 = vmatpush.bf16.msra.mxu2 %v1868_v7  ;;  %931 = vmatpush.bf16.msra.mxu3 %v1872_v8 }
 0x119   :  { %893 = vmatpush.bf16.msra.mxu0 %v1874_v9  ;;  %906 = vmatpush.bf16.msra.mxu1 %v1877_v13 }
 0x11a   :  { %919 = vmatpush.bf16.msra.mxu2 %v1883_v20  ;;  %932 = vmatpush.bf16.msra.mxu3 %v1887_v21 }
 0x11d   :  { %894 = vmatpush.bf16.msra.mxu0 %v1889_v22  ;;  %907 = vmatpush.bf16.msra.mxu1 %v1892_v26 }
 0x11e   :  { %920 = vmatpush.bf16.msra.mxu2 %v1895_v32  ;;  %933 = vmatpush.bf16.msra.mxu3 %v1899_v33 }
 0x121   :  { %895 = vmatpush.bf16.msra.mxu0 %v1901_v34  ;;  %908 = vmatpush.bf16.msra.mxu1 %v1904_v38 }
 0x122   :  { %921 = vmatpush.bf16.msra.mxu2 %v1907_v42  ;;  %934 = vmatpush.bf16.msra.mxu3 %v1911_v46 }
 0x125   :  { %896 = vmatpush.bf16.msra.mxu0 %v1913_v50  ;;  %909 = vmatpush.bf16.msra.mxu1 %v1916_v55 }
 0x126   :  { %922 = vmatpush.bf16.msra.mxu2 %v1919_v2  ;;  %935 = vmatpush.bf16.msra.mxu3 %v1923_v3 }
 0x129   :  { %897 = vmatpush.bf16.msra.mxu0 %v1925_v4  ;;  %910 = vmatpush.bf16.msra.mxu1 %v1928_v10 }
 0x12a   :  { %923 = vmatpush.bf16.msra.mxu2 %v1931_v14  ;;  %936 = vmatpush.bf16.msra.mxu3 %v1935_v15 }
 0x188   :  { %v731_v58 = vpop.f32.mrf.mxu0  ;;  %v744_v45 = vpop.f32.mrf.mxu1 }
 0x189   :  { %v774_v30 = vadd.f32 %v731_v58, %v2017_v31  ;;  %v775_v35 = vadd.f32 %v744_v45, %v2019_v36 }
 0x18b   :  { %v778_v43 = vmul.f32 0.5, %v774_v30  ;;  %v779_v12 = vmul.f32 0.5, %v775_v35 }
 0x18d   :  { %1680 = vtanh.f32 %v778_v43 }
 0x18e   :  { %1682 = vtanh.f32 %v779_v12 }
 0x18f   :  { %v757_v51 = vpop.f32.mrf.mxu2  ;;  %v770_v63 = vpop.f32.mrf.mxu3 }
 0x190   :  { %v776_v11 = vadd.f32 %v757_v51, %v2026_v44  ;;  %v777_v16 = vadd.f32 %v770_v63, %v2029_v52  ;;  %v733_v27 = vpop.f32.mrf.mxu0  ;;  %v746_v39 = vpop.f32.mrf.mxu1 }
 0x192   :  { %1684 = vtanh.f32 %v776_v11  ;;  %v787_v17 = vmul.f32 0.5, %v777_v16 }
 0x193   :  { %v1681_v29 = vpop.eup %1680 }
 0x194   :  { %v1683_v40 = vpop.eup %1682  ;;  %v782_v19 = vmul.f32 0.5, %v1681_v29  ;;  %1686 = vtanh.f32 %v787_v17 }
 0x195   :  { %v783_v31 = vmul.f32 0.5, %v1683_v40 }
 0x196   :  { %v784_v36 = vadd.f32 0.5, %v782_v19 }
 0x197   :  { %v785_v23 = vadd.f32 0.5, %v783_v31  ;;  %v759_v25 = vpop.f32.mrf.mxu2  ;;  %v772_v56 = vpop.f32.mrf.mxu3 }
 0x198   :  { %v1685_v28 = vpop.eup %1684 }
 0x199   :  { %v791_v58 = vmul.f32 %v785_v23, %v2095_v24  ;;  %v792_v45 = vmul.f32 %v1685_v28, %v784_v36 }
 0x19a   :  { %v1687_v44 = vpop.eup %1686 }
 0x19b   :  { %v2138_v30 = vadd.f32 %v792_v45, %v791_v58  ;;  %v789_v52 = vmul.f32 0.5, %v1687_v44 }
 0x19d   :  { %1688 = vtanh.f32 %v2138_v30  ;;  %v790_v35 = vadd.f32 0.5, %v789_v52 }
 0x1a3   :  { %v1689_v43 = vpop.eup %1688 }
 0x1a4   :  { %v795_v12 = vmul.f32 %v1689_v43, %v790_v35 }
 0x1a6   :  { %v796_v51 = vpack.c.bf16 %v795_v12, %v795_v12 }
 0x1a8   :  { %1590 = vst [vmem:[%s2331_s4 + $0x4] sm:$0xf] %v796_v51  ;;  %814 = vmatmul.bf16.vlgmr.msrb.gmra.mxu0 %v796_v51  ;;  %827 = vmatmul.bf16.vlgmr.msrb.gmra.mxu1 %v796_v51 }
 0x1a9   :  { %840 = vmatmul.bf16.vlgmr.msrb.gmra.mxu2 %v796_v51  ;;  %853 = vmatmul.bf16.vlgmr.msrb.gmra.mxu3 %v796_v51 }
 0x1aa   :  { %974 = vmatpush.bf16.msrb.mxu0 %v1841_v37  ;;  %987 = vmatpush.bf16.msrb.mxu1 %v1843_v41 }
 0x1ab   :  { %1000 = vmatpush.bf16.msrb.mxu2 %v1845_v47  ;;  %1013 = vmatpush.bf16.msrb.mxu3 %v1848_v48 }
 0x1ae   :  { %975 = vmatpush.bf16.msrb.mxu0 %v1850_v49  ;;  %988 = vmatpush.bf16.msrb.mxu1 %v1853_v53 }
 0x1af   :  { %1001 = vmatpush.bf16.msrb.mxu2 %v1856_v59  ;;  %1014 = vmatpush.bf16.msrb.mxu3 %v1860_v60 }
 0x1b2   :  { %976 = vmatpush.bf16.msrb.mxu0 %v1862_v61  ;;  %989 = vmatpush.bf16.msrb.mxu1 %v1865_v1 }
 0x1b3   :  { %1002 = vmatpush.bf16.msrb.mxu2 %v1868_v7  ;;  %1015 = vmatpush.bf16.msrb.mxu3 %v1872_v8 }
 0x1b6   :  { %977 = vmatpush.bf16.msrb.mxu0 %v1874_v9  ;;  %990 = vmatpush.bf16.msrb.mxu1 %v1877_v13 }
 0x1b7   :  { %1003 = vmatpush.bf16.msrb.mxu2 %v1883_v20  ;;  %1016 = vmatpush.bf16.msrb.mxu3 %v1887_v21 }
 0x1ba   :  { %978 = vmatpush.bf16.msrb.mxu0 %v1889_v22  ;;  %991 = vmatpush.bf16.msrb.mxu1 %v1892_v26 }
 0x1bb   :  { %1004 = vmatpush.bf16.msrb.mxu2 %v1895_v32  ;;  %1017 = vmatpush.bf16.msrb.mxu3 %v1899_v33 }
 0x1be   :  { %979 = vmatpush.bf16.msrb.mxu0 %v1901_v34  ;;  %992 = vmatpush.bf16.msrb.mxu1 %v1904_v38 }
 0x1bf   :  { %1005 = vmatpush.bf16.msrb.mxu2 %v1907_v42  ;;  %1018 = vmatpush.bf16.msrb.mxu3 %v1911_v46 }
 0x1c2   :  { %980 = vmatpush.bf16.msrb.mxu0 %v1913_v50  ;;  %993 = vmatpush.bf16.msrb.mxu1 %v1916_v55 }
 0x1c3   :  { %1006 = vmatpush.bf16.msrb.mxu2 %v1919_v2  ;;  %1019 = vmatpush.bf16.msrb.mxu3 %v1923_v3 }
 0x1c6   :  { %981 = vmatpush.bf16.msrb.mxu0 %v1925_v4  ;;  %994 = vmatpush.bf16.msrb.mxu1 %v1928_v10 }
 0x1c7   :  { %1007 = vmatpush.bf16.msrb.mxu2 %v1931_v14  ;;  %1020 = vmatpush.bf16.msrb.mxu3 %v1935_v15 }
 0x225   :  { %v815_v24 = vpop.f32.mrf.mxu0  ;;  %v828_v63 = vpop.f32.mrf.mxu1 }
 0x226   :  { %v858_v11 = vadd.f32 %v815_v24, %v2031_v54  ;;  %v859_v16 = vadd.f32 %v828_v63, %v2033_v57 }
 0x228   :  { %v862_v27 = vmul.f32 0.5, %v858_v11  ;;  %v863_v39 = vmul.f32 0.5, %v859_v16 }
 0x22a   :  { %1690 = vtanh.f32 %v862_v27 }
 0x22b   :  { %1692 = vtanh.f32 %v863_v39  ;;  %v2349_v39 = vld [vmem:[#allocation11_spill] sm:$0xff] }
 0x22c   :  { %v841_v17 = vpop.f32.mrf.mxu2  ;;  %v854_v29 = vpop.f32.mrf.mxu3 }
 0x22d   :  { %v860_v40 = vadd.f32 %v841_v17, %v2036_v62  ;;  %v861_v19 = vadd.f32 %v854_v29, %v2039_v5  ;;  %v817_v31 = vpop.f32.mrf.mxu0  ;;  %v830_v36 = vpop.f32.mrf.mxu1 }
 0x22e   :  { %v2350_v36 = vld [vmem:[#allocation12_spill] sm:$0xff] }
 0x22f   :  { %1694 = vtanh.f32 %v860_v40  ;;  %v871_v23 = vmul.f32 0.5, %v861_v19 }
 0x230   :  { %v1691_v25 = vpop.eup %1690 }
 0x231   :  { %v1693_v56 = vpop.eup %1692  ;;  %v866_v28 = vmul.f32 0.5, %v1691_v25  ;;  %1696 = vtanh.f32 %v871_v23  ;;  %v2351_v25 = vld [vmem:[#allocation13_spill] sm:$0xff] }
 0x232   :  { %v867_v54 = vmul.f32 0.5, %v1693_v56 }
 0x233   :  { %v868_v57 = vadd.f32 0.5, %v866_v28 }
 0x234   :  { %v869_v58 = vadd.f32 0.5, %v867_v54  ;;  %v843_v45 = vpop.f32.mrf.mxu2  ;;  %v856_v44 = vpop.f32.mrf.mxu3 }
 0x235   :  { %v1695_v52 = vpop.eup %1694 }
 0x236   :  { %v875_v35 = vmul.f32 %v869_v58, %v2138_v30  ;;  %v876_v43 = vmul.f32 %v1695_v52, %v868_v57 }
 0x237   :  { %v1697_v62 = vpop.eup %1696 }
 0x238   :  { %v2181_v12 = vadd.f32 %v876_v43, %v875_v35  ;;  %v873_v5 = vmul.f32 0.5, %v1697_v62 }
 0x23a   :  { %1698 = vtanh.f32 %v2181_v12  ;;  %v874_v51 = vadd.f32 0.5, %v873_v5 }
 0x240   :  { %v1699_v24 = vpop.eup %1698 }
 0x241   :  { %v879_v63 = vmul.f32 %v1699_v24, %v874_v51 }
 0x243   :  { %v880_v11 = vpack.c.bf16 %v879_v63, %v879_v63 }
 0x245   :  { %1591 = vst [vmem:[%s2331_s4 + $0x8] sm:$0xf] %v880_v11  ;;  %898 = vmatmul.bf16.vlgmr.msra.gmra.mxu0 %v880_v11  ;;  %911 = vmatmul.bf16.vlgmr.msra.gmra.mxu1 %v880_v11 }
 0x246   :  { %924 = vmatmul.bf16.vlgmr.msra.gmra.mxu2 %v880_v11  ;;  %937 = vmatmul.bf16.vlgmr.msra.gmra.mxu3 %v880_v11 }
 0x247   :  { %1058 = vmatpush.bf16.msra.mxu0 %v1841_v37  ;;  %1071 = vmatpush.bf16.msra.mxu1 %v1843_v41 }
 0x248   :  { %1084 = vmatpush.bf16.msra.mxu2 %v1845_v47  ;;  %1097 = vmatpush.bf16.msra.mxu3 %v1848_v48 }
 0x24b   :  { %1059 = vmatpush.bf16.msra.mxu0 %v1850_v49  ;;  %1072 = vmatpush.bf16.msra.mxu1 %v1853_v53 }
 0x24c   :  { %1085 = vmatpush.bf16.msra.mxu2 %v1856_v59  ;;  %1098 = vmatpush.bf16.msra.mxu3 %v1860_v60 }
 0x24f   :  { %1060 = vmatpush.bf16.msra.mxu0 %v1862_v61  ;;  %1073 = vmatpush.bf16.msra.mxu1 %v1865_v1 }
 0x250   :  { %1086 = vmatpush.bf16.msra.mxu2 %v1868_v7  ;;  %1099 = vmatpush.bf16.msra.mxu3 %v1872_v8 }
 0x253   :  { %1061 = vmatpush.bf16.msra.mxu0 %v1874_v9  ;;  %1074 = vmatpush.bf16.msra.mxu1 %v1877_v13 }
 0x254   :  { %1087 = vmatpush.bf16.msra.mxu2 %v1883_v20  ;;  %1100 = vmatpush.bf16.msra.mxu3 %v1887_v21 }
 0x257   :  { %1062 = vmatpush.bf16.msra.mxu0 %v1889_v22  ;;  %1075 = vmatpush.bf16.msra.mxu1 %v1892_v26 }
 0x258   :  { %1088 = vmatpush.bf16.msra.mxu2 %v1895_v32  ;;  %1101 = vmatpush.bf16.msra.mxu3 %v1899_v33 }
 0x25b   :  { %1063 = vmatpush.bf16.msra.mxu0 %v1901_v34  ;;  %1076 = vmatpush.bf16.msra.mxu1 %v1904_v38 }
 0x25c   :  { %1089 = vmatpush.bf16.msra.mxu2 %v1907_v42  ;;  %1102 = vmatpush.bf16.msra.mxu3 %v1911_v46 }
 0x25f   :  { %1064 = vmatpush.bf16.msra.mxu0 %v1913_v50  ;;  %1077 = vmatpush.bf16.msra.mxu1 %v1916_v55 }
 0x260   :  { %1090 = vmatpush.bf16.msra.mxu2 %v1919_v2  ;;  %1103 = vmatpush.bf16.msra.mxu3 %v1923_v3 }
 0x263   :  { %1065 = vmatpush.bf16.msra.mxu0 %v1925_v4  ;;  %1078 = vmatpush.bf16.msra.mxu1 %v1928_v10 }
 0x264   :  { %1091 = vmatpush.bf16.msra.mxu2 %v1931_v14  ;;  %1104 = vmatpush.bf16.msra.mxu3 %v1935_v15 }
 0x2c2   :  { %v899_v30 = vpop.f32.mrf.mxu0  ;;  %v912_v16 = vpop.f32.mrf.mxu1 }
 0x2c3   :  { %v942_v27 = vadd.f32 %v899_v30, %v2041_v6  ;;  %v943_v17 = vadd.f32 %v912_v16, %v2349_v39 }
 0x2c5   :  { %v946_v29 = vmul.f32 0.5, %v942_v27  ;;  %v947_v40 = vmul.f32 0.5, %v943_v17 }
 0x2c7   :  { %1700 = vtanh.f32 %v946_v29 }
 0x2c8   :  { %1702 = vtanh.f32 %v947_v40  ;;  %v2352_v40 = vld [vmem:[#allocation14_spill] sm:$0xff] }
 0x2c9   :  { %v925_v19 = vpop.f32.mrf.mxu2  ;;  %v938_v31 = vpop.f32.mrf.mxu3 }
 0x2ca   :  { %v944_v23 = vadd.f32 %v925_v19, %v2350_v36  ;;  %v945_v56 = vadd.f32 %v938_v31, %v2351_v25  ;;  %v901_v28 = vpop.f32.mrf.mxu0  ;;  %v914_v54 = vpop.f32.mrf.mxu1  ;;  %v2353_v31 = vld [vmem:[#allocation15_spill] sm:$0xff] }
 0x2cb   :  { %v2354_v54 = vld [vmem:[#allocation16_spill] sm:$0xff] }
 0x2cc   :  { %1704 = vtanh.f32 %v944_v23  ;;  %v955_v57 = vmul.f32 0.5, %v945_v56 }
 0x2cd   :  { %v1701_v58 = vpop.eup %1700 }
 0x2ce   :  { %v1703_v45 = vpop.eup %1702  ;;  %v950_v44 = vmul.f32 0.5, %v1701_v58  ;;  %1706 = vtanh.f32 %v955_v57  ;;  %v2355_v58 = vld [vmem:[#allocation17_spill] sm:$0xff] }
 0x2cf   :  { %v951_v6 = vmul.f32 0.5, %v1703_v45 }
 0x2d0   :  { %v952_v52 = vadd.f32 0.5, %v950_v44 }
 0x2d1   :  { %v953_v35 = vadd.f32 0.5, %v951_v6  ;;  %v927_v43 = vpop.f32.mrf.mxu2  ;;  %v940_v62 = vpop.f32.mrf.mxu3 }
 0x2d2   :  { %v1705_v5 = vpop.eup %1704 }
 0x2d3   :  { %v959_v51 = vmul.f32 %v953_v35, %v2181_v12  ;;  %v960_v24 = vmul.f32 %v1705_v5, %v952_v52 }
 0x2d4   :  { %v1707_v63 = vpop.eup %1706 }
 0x2d5   :  { %v2224_v11 = vadd.f32 %v960_v24, %v959_v51  ;;  %v957_v30 = vmul.f32 0.5, %v1707_v63 }
 0x2d7   :  { %1708 = vtanh.f32 %v2224_v11  ;;  %v958_v16 = vadd.f32 0.5, %v957_v30 }
 0x2dd   :  { %v1709_v27 = vpop.eup %1708 }
 0x2de   :  { %v963_v39 = vmul.f32 %v1709_v27, %v958_v16 }
 0x2e0   :  { %v964_v17 = vpack.c.bf16 %v963_v39, %v963_v39 }
 0x2e2   :  { %1592 = vst [vmem:[%s2331_s4 + $0xc] sm:$0xf] %v964_v17  ;;  %982 = vmatmul.bf16.vlgmr.msrb.gmra.mxu0 %v964_v17  ;;  %995 = vmatmul.bf16.vlgmr.msrb.gmra.mxu1 %v964_v17 }
 0x2e3   :  { %1008 = vmatmul.bf16.vlgmr.msrb.gmra.mxu2 %v964_v17  ;;  %1021 = vmatmul.bf16.vlgmr.msrb.gmra.mxu3 %v964_v17 }
 0x2e4   :  { %1142 = vmatpush.bf16.msrb.mxu0 %v1841_v37  ;;  %1155 = vmatpush.bf16.msrb.mxu1 %v1843_v41 }
 0x2e5   :  { %1168 = vmatpush.bf16.msrb.mxu2 %v1845_v47  ;;  %1181 = vmatpush.bf16.msrb.mxu3 %v1848_v48 }
 0x2e8   :  { %1143 = vmatpush.bf16.msrb.mxu0 %v1850_v49  ;;  %1156 = vmatpush.bf16.msrb.mxu1 %v1853_v53 }
 0x2e9   :  { %1169 = vmatpush.bf16.msrb.mxu2 %v1856_v59  ;;  %1182 = vmatpush.bf16.msrb.mxu3 %v1860_v60 }
 0x2ec   :  { %1144 = vmatpush.bf16.msrb.mxu0 %v1862_v61  ;;  %1157 = vmatpush.bf16.msrb.mxu1 %v1865_v1 }
 0x2ed   :  { %1170 = vmatpush.bf16.msrb.mxu2 %v1868_v7  ;;  %1183 = vmatpush.bf16.msrb.mxu3 %v1872_v8 }
 0x2f0   :  { %1145 = vmatpush.bf16.msrb.mxu0 %v1874_v9  ;;  %1158 = vmatpush.bf16.msrb.mxu1 %v1877_v13 }
 0x2f1   :  { %1171 = vmatpush.bf16.msrb.mxu2 %v1883_v20  ;;  %1184 = vmatpush.bf16.msrb.mxu3 %v1887_v21 }
 0x2f4   :  { %1146 = vmatpush.bf16.msrb.mxu0 %v1889_v22  ;;  %1159 = vmatpush.bf16.msrb.mxu1 %v1892_v26 }
 0x2f5   :  { %1172 = vmatpush.bf16.msrb.mxu2 %v1895_v32  ;;  %1185 = vmatpush.bf16.msrb.mxu3 %v1899_v33 }
 0x2f8   :  { %1147 = vmatpush.bf16.msrb.mxu0 %v1901_v34  ;;  %1160 = vmatpush.bf16.msrb.mxu1 %v1904_v38 }
 0x2f9   :  { %1173 = vmatpush.bf16.msrb.mxu2 %v1907_v42  ;;  %1186 = vmatpush.bf16.msrb.mxu3 %v1911_v46 }
 0x2fc   :  { %1148 = vmatpush.bf16.msrb.mxu0 %v1913_v50  ;;  %1161 = vmatpush.bf16.msrb.mxu1 %v1916_v55 }
 0x2fd   :  { %1174 = vmatpush.bf16.msrb.mxu2 %v1919_v2  ;;  %1187 = vmatpush.bf16.msrb.mxu3 %v1923_v3 }
 0x300   :  { %1149 = vmatpush.bf16.msrb.mxu0 %v1925_v4  ;;  %1162 = vmatpush.bf16.msrb.mxu1 %v1928_v10 }
 0x301   :  { %1175 = vmatpush.bf16.msrb.mxu2 %v1931_v14  ;;  %1188 = vmatpush.bf16.msrb.mxu3 %v1935_v15 }
 0x35f   :  { %v983_v12 = vpop.f32.mrf.mxu0  ;;  %v996_v29 = vpop.f32.mrf.mxu1 }
 0x360   :  { %v1026_v19 = vadd.f32 %v983_v12, %v2352_v40  ;;  %v1027_v36 = vadd.f32 %v996_v29, %v2353_v31 }
 0x362   :  { %v1030_v23 = vmul.f32 0.5, %v1026_v19  ;;  %v1031_v25 = vmul.f32 0.5, %v1027_v36 }
 0x364   :  { %1710 = vtanh.f32 %v1030_v23 }
 0x365   :  { %1712 = vtanh.f32 %v1031_v25 }
 0x366   :  { %v1009_v56 = vpop.f32.mrf.mxu2  ;;  %v1022_v28 = vpop.f32.mrf.mxu3 }
 0x367   :  { %v1028_v57 = vadd.f32 %v1009_v56, %v2354_v54  ;;  %v1029_v45 = vadd.f32 %v1022_v28, %v2355_v58  ;;  %v985_v44 = vpop.f32.mrf.mxu0  ;;  %v998_v6 = vpop.f32.mrf.mxu1  ;;  %v2360_v54 = vld [vmem:[#allocation22_spill] sm:$0xff]  ;;  %v2361_v58 = vld [vmem:[#allocation23_spill] sm:$0xff] }
 0x369   :  { %1714 = vtanh.f32 %v1028_v57  ;;  %v1039_v52 = vmul.f32 0.5, %v1029_v45 }
 0x36a   :  { %v1711_v35 = vpop.eup %1710 }
 0x36b   :  { %v1713_v43 = vpop.eup %1712  ;;  %v1034_v62 = vmul.f32 0.5, %v1711_v35  ;;  %1716 = vtanh.f32 %v1039_v52 }
 0x36c   :  { %v1035_v5 = vmul.f32 0.5, %v1713_v43  ;;  %v2362_v43 = vld [vmem:[#allocation24_spill] sm:$0xff] }
 0x36d   :  { %v1036_v51 = vadd.f32 0.5, %v1034_v62 }
 0x36e   :  { %v1037_v24 = vadd.f32 0.5, %v1035_v5  ;;  %v1011_v63 = vpop.f32.mrf.mxu2  ;;  %v1024_v30 = vpop.f32.mrf.mxu3  ;;  %v2363_v5 = vld [vmem:[#allocation25_spill] sm:$0xff] }
 0x36f   :  { %v1715_v16 = vpop.eup %1714 }
 0x370   :  { %v1043_v27 = vmul.f32 %v1037_v24, %v2224_v11  ;;  %v1044_v39 = vmul.f32 %v1715_v16, %v1036_v51 }
 0x371   :  { %v1717_v17 = vpop.eup %1716 }
 0x372   :  { %v2267_v12 = vadd.f32 %v1044_v39, %v1043_v27  ;;  %v1041_v29 = vmul.f32 0.5, %v1717_v17 }
 0x374   :  { %1718 = vtanh.f32 %v2267_v12  ;;  %v1042_v40 = vadd.f32 0.5, %v1041_v29 }
 0x37a   :  { %v1719_v19 = vpop.eup %1718 }
 0x37b   :  { %v1047_v31 = vmul.f32 %v1719_v19, %v1042_v40 }
 0x37d   :  { %v1048_v36 = vpack.c.bf16 %v1047_v31, %v1047_v31 }
 0x37f   :  { %1593 = vst [vmem:[%s2331_s4 + $0x10] sm:$0xf] %v1048_v36  ;;  %1066 = vmatmul.bf16.vlgmr.msra.gmra.mxu0 %v1048_v36  ;;  %1079 = vmatmul.bf16.vlgmr.msra.gmra.mxu1 %v1048_v36 }
 0x380   :  { %1092 = vmatmul.bf16.vlgmr.msra.gmra.mxu2 %v1048_v36  ;;  %1105 = vmatmul.bf16.vlgmr.msra.gmra.mxu3 %v1048_v36 }
 0x381   :  { %1226 = vmatpush.bf16.msra.mxu0 %v1841_v37  ;;  %1239 = vmatpush.bf16.msra.mxu1 %v1843_v41 }
 0x382   :  { %1252 = vmatpush.bf16.msra.mxu2 %v1845_v47  ;;  %1265 = vmatpush.bf16.msra.mxu3 %v1848_v48  ;;  %v2356_v47 = vld [vmem:[#allocation18_spill] sm:$0xff] }
 0x385   :  { %1227 = vmatpush.bf16.msra.mxu0 %v1850_v49  ;;  %1240 = vmatpush.bf16.msra.mxu1 %v1853_v53  ;;  %v2357_v49 = vld [vmem:[#allocation19_spill] sm:$0xff] }
 0x386   :  { %1253 = vmatpush.bf16.msra.mxu2 %v1856_v59  ;;  %1266 = vmatpush.bf16.msra.mxu3 %v1860_v60 }
 0x389   :  { %1228 = vmatpush.bf16.msra.mxu0 %v1862_v61  ;;  %1241 = vmatpush.bf16.msra.mxu1 %v1865_v1 }
 0x38a   :  { %1254 = vmatpush.bf16.msra.mxu2 %v1868_v7  ;;  %1267 = vmatpush.bf16.msra.mxu3 %v1872_v8  ;;  %v2358_v7 = vld [vmem:[#allocation20_spill] sm:$0xff] }
 0x38d   :  { %1229 = vmatpush.bf16.msra.mxu0 %v1874_v9  ;;  %1242 = vmatpush.bf16.msra.mxu1 %v1877_v13  ;;  %v2359_v9 = vld [vmem:[#allocation21_spill] sm:$0xff] }
 0x38e   :  { %1255 = vmatpush.bf16.msra.mxu2 %v1883_v20  ;;  %1268 = vmatpush.bf16.msra.mxu3 %v1887_v21 }
 0x391   :  { %1230 = vmatpush.bf16.msra.mxu0 %v1889_v22  ;;  %1243 = vmatpush.bf16.msra.mxu1 %v1892_v26 }
 0x392   :  { %1256 = vmatpush.bf16.msra.mxu2 %v1895_v32  ;;  %1269 = vmatpush.bf16.msra.mxu3 %v1899_v33 }
 0x395   :  { %1231 = vmatpush.bf16.msra.mxu0 %v1901_v34  ;;  %1244 = vmatpush.bf16.msra.mxu1 %v1904_v38 }
 0x396   :  { %1257 = vmatpush.bf16.msra.mxu2 %v1907_v42  ;;  %1270 = vmatpush.bf16.msra.mxu3 %v1911_v46 }
 0x399   :  { %1232 = vmatpush.bf16.msra.mxu0 %v1913_v50  ;;  %1245 = vmatpush.bf16.msra.mxu1 %v1916_v55 }
 0x39a   :  { %1258 = vmatpush.bf16.msra.mxu2 %v1919_v2  ;;  %1271 = vmatpush.bf16.msra.mxu3 %v1923_v3 }
 0x39d   :  { %1233 = vmatpush.bf16.msra.mxu0 %v1925_v4  ;;  %1246 = vmatpush.bf16.msra.mxu1 %v1928_v10 }
 0x39e   :  { %1259 = vmatpush.bf16.msra.mxu2 %v1931_v14  ;;  %1272 = vmatpush.bf16.msra.mxu3 %v1935_v15 }
 0x3fc   :  { %v1067_v37 = vpop.f32.mrf.mxu0  ;;  %v1080_v41 = vpop.f32.mrf.mxu1 }
 0x3fd   :  { %v1110_v48 = vadd.f32 %v1067_v37, %v2356_v47  ;;  %v1111_v53 = vadd.f32 %v1080_v41, %v2357_v49 }
 0x3ff   :  { %v1114_v59 = vmul.f32 0.5, %v1110_v48  ;;  %v1115_v60 = vmul.f32 0.5, %v1111_v53 }
 0x401   :  { %1720 = vtanh.f32 %v1114_v59 }
 0x402   :  { %1722 = vtanh.f32 %v1115_v60 }
 0x403   :  { %v1093_v61 = vpop.f32.mrf.mxu2  ;;  %v1106_v1 = vpop.f32.mrf.mxu3 }
 0x404   :  { %v1112_v8 = vadd.f32 %v1093_v61, %v2358_v7  ;;  %v1113_v13 = vadd.f32 %v1106_v1, %v2359_v9  ;;  %v1069_v20 = vpop.f32.mrf.mxu0  ;;  %v1082_v21 = vpop.f32.mrf.mxu1 }
 0x406   :  { %1724 = vtanh.f32 %v1112_v8  ;;  %v1123_v22 = vmul.f32 0.5, %v1113_v13 }
 0x407   :  { %v1721_v26 = vpop.eup %1720 }
 0x408   :  { %v1723_v32 = vpop.eup %1722  ;;  %v1118_v33 = vmul.f32 0.5, %v1721_v26  ;;  %1726 = vtanh.f32 %v1123_v22  ;;  %v2364_v22 = vld [vmem:[#allocation26_spill] sm:$0xff] }
 0x409   :  { %v1119_v34 = vmul.f32 0.5, %v1723_v32  ;;  %v2365_v32 = vld [vmem:[#allocation27_spill] sm:$0xff] }
 0x40a   :  { %v1120_v38 = vadd.f32 0.5, %v1118_v33 }
 0x40b   :  { %v1121_v42 = vadd.f32 0.5, %v1119_v34  ;;  %v1095_v46 = vpop.f32.mrf.mxu2  ;;  %v1108_v50 = vpop.f32.mrf.mxu3 }
 0x40c   :  { %v1725_v55 = vpop.eup %1724 }
 0x40d   :  { %v1127_v2 = vmul.f32 %v1121_v42, %v2267_v12  ;;  %v1128_v3 = vmul.f32 %v1725_v55, %v1120_v38 }
 0x40e   :  { %v1727_v4 = vpop.eup %1726 }
 0x40f   :  { %v1129_v10 = vadd.f32 %v1128_v3, %v1127_v2  ;;  %v1125_v14 = vmul.f32 0.5, %v1727_v4 }
 0x411   :  { %1728 = vtanh.f32 %v1129_v10  ;;  %v1126_v15 = vadd.f32 0.5, %v1125_v14 }
 0x417   :  { %v1729_v11 = vpop.eup %1728 }
 0x418   :  { %v1131_v23 = vmul.f32 %v1729_v11, %v1126_v15 }
 0x41a   :  { %v1132_v25 = vpack.c.bf16 %v1131_v23, %v1131_v23 }
 0x41c   :  { %1594 = vst [vmem:[%s2331_s4 + $0x14] sm:$0xf] %v1132_v25  ;;  %1150 = vmatmul.bf16.vlgmr.msrb.gmra.mxu0 %v1132_v25  ;;  %1163 = vmatmul.bf16.vlgmr.msrb.gmra.mxu1 %v1132_v25 }
 0x41d   :  { %1176 = vmatmul.bf16.vlgmr.msrb.gmra.mxu2 %v1132_v25  ;;  %1189 = vmatmul.bf16.vlgmr.msrb.gmra.mxu3 %v1132_v25 }
 0x499   :  { %v1151_v56 = vpop.f32.mrf.mxu0  ;;  %v1164_v28 = vpop.f32.mrf.mxu1 }
 0x49a   :  { %v1194_v57 = vadd.f32 %v1151_v56, %v2360_v54  ;;  %v1195_v45 = vadd.f32 %v1164_v28, %v2361_v58 }
 0x49c   :  { %v1198_v44 = vmul.f32 0.5, %v1194_v57  ;;  %v1199_v6 = vmul.f32 0.5, %v1195_v45 }
 0x49e   :  { %1730 = vtanh.f32 %v1198_v44 }
 0x49f   :  { %1732 = vtanh.f32 %v1199_v6 }
 0x4a0   :  { %v1177_v52 = vpop.f32.mrf.mxu2  ;;  %v1190_v35 = vpop.f32.mrf.mxu3 }
 0x4a1   :  { %v1196_v62 = vadd.f32 %v1177_v52, %v2362_v43  ;;  %v1197_v51 = vadd.f32 %v1190_v35, %v2363_v5  ;;  %v1153_v24 = vpop.f32.mrf.mxu0  ;;  %v1166_v63 = vpop.f32.mrf.mxu1 }
 0x4a3   :  { %1734 = vtanh.f32 %v1196_v62  ;;  %v1207_v30 = vmul.f32 0.5, %v1197_v51 }
 0x4a4   :  { %v1731_v16 = vpop.eup %1730 }
 0x4a5   :  { %v1733_v27 = vpop.eup %1732  ;;  %v1202_v39 = vmul.f32 0.5, %v1731_v16  ;;  %1736 = vtanh.f32 %v1207_v30 }
 0x4a6   :  { %v1203_v17 = vmul.f32 0.5, %v1733_v27 }
 0x4a7   :  { %v1204_v12 = vadd.f32 0.5, %v1202_v39 }
 0x4a8   :  { %v1205_v29 = vadd.f32 0.5, %v1203_v17  ;;  %v1179_v40 = vpop.f32.mrf.mxu2  ;;  %v1192_v19 = vpop.f32.mrf.mxu3 }
 0x4a9   :  { %v1735_v31 = vpop.eup %1734 }
 0x4aa   :  { %v1211_v36 = vmul.f32 %v1205_v29, %v1129_v10  ;;  %v1212_v37 = vmul.f32 %v1735_v31, %v1204_v12 }
 0x4ab   :  { %v1737_v41 = vpop.eup %1736 }
 0x4ac   :  { %v1213_v47 = vadd.f32 %v1212_v37, %v1211_v36  ;;  %v1209_v48 = vmul.f32 0.5, %v1737_v41 }
 0x4ae   :  { %1738 = vtanh.f32 %v1213_v47  ;;  %v1210_v49 = vadd.f32 0.5, %v1209_v48 }
 0x4b4   :  { %v1739_v53 = vpop.eup %1738 }
 0x4b5   :  { %v1215_v59 = vmul.f32 %v1739_v53, %v1210_v49 }
 0x4b7   :  { %v1216_v60 = vpack.c.bf16 %v1215_v59, %v1215_v59 }
 0x4b9   :  { %1595 = vst [vmem:[%s2331_s4 + $0x18] sm:$0xf] %v1216_v60  ;;  %1234 = vmatmul.bf16.vlgmr.msra.gmra.mxu0 %v1216_v60  ;;  %1247 = vmatmul.bf16.vlgmr.msra.gmra.mxu1 %v1216_v60 }
 0x4ba   :  { %1260 = vmatmul.bf16.vlgmr.msra.gmra.mxu2 %v1216_v60  ;;  %1273 = vmatmul.bf16.vlgmr.msra.gmra.mxu3 %v1216_v60 }
 0x536   :  { %v1235_v61 = vpop.f32.mrf.mxu0  ;;  %v1248_v1 = vpop.f32.mrf.mxu1 }
 0x537   :  { %v1278_v7 = vadd.f32 %v1235_v61, %v2081_v18  ;;  %v1279_v8 = vadd.f32 %v1248_v1, %v2083_v0 }
 0x539   :  { %v1282_v9 = vmul.f32 0.5, %v1278_v7  ;;  %v1283_v13 = vmul.f32 0.5, %v1279_v8 }
 0x53b   :  { %1740 = vtanh.f32 %v1282_v9 }
 0x53c   :  { %1742 = vtanh.f32 %v1283_v13 }
 0x53d   :  { %v1261_v20 = vpop.f32.mrf.mxu2  ;;  %v1274_v21 = vpop.f32.mrf.mxu3 }
 0x53e   :  { %v1280_v26 = vadd.f32 %v1261_v20, %v2364_v22  ;;  %v1281_v33 = vadd.f32 %v1274_v21, %v2365_v32  ;;  %v1237_v34 = vpop.f32.mrf.mxu0  ;;  %v1250_v38 = vpop.f32.mrf.mxu1 }
 0x540   :  { %1744 = vtanh.f32 %v1280_v26  ;;  %v1291_v42 = vmul.f32 0.5, %v1281_v33 }
 0x541   :  { %v1741_v46 = vpop.eup %1740 }
 0x542   :  { %v1743_v50 = vpop.eup %1742  ;;  %v1286_v55 = vmul.f32 0.5, %v1741_v46  ;;  %1746 = vtanh.f32 %v1291_v42 }
 0x543   :  { %v1287_v18 = vmul.f32 0.5, %v1743_v50 }
 0x544   :  { %v1288_v0 = vadd.f32 0.5, %v1286_v55 }
 0x545   :  { %v1289_v2 = vadd.f32 0.5, %v1287_v18  ;;  %v1263_v3 = vpop.f32.mrf.mxu2  ;;  %v1276_v4 = vpop.f32.mrf.mxu3 }
 0x546   :  { %v1745_v10 = vpop.eup %1744 }
 0x547   :  { %v1295_v14 = vmul.f32 %v1289_v2, %v1213_v47  ;;  %v1296_v15 = vmul.f32 %v1745_v10, %v1288_v0 }
 0x548   :  { %v1747_v11 = vpop.eup %1746 }
 0x549   :  { %v1297_v23 = vadd.f32 %v1296_v15, %v1295_v14  ;;  %v1293_v25 = vmul.f32 0.5, %v1747_v11 }
 0x54b   :  { %1748 = vtanh.f32 %v1297_v23  ;;  %v1294_v56 = vadd.f32 0.5, %v1293_v25 }
 0x551   :  { %v1749_v28 = vpop.eup %1748 }
 0x552   :  { %v1299_v54 = vmul.f32 %v1749_v28, %v1294_v56 }
 0x554   :  { %v1300_v57 = vpack.c.bf16 %v1299_v54, %v1299_v54 }
 0x556   :  { %1596 = vst [vmem:[%s2331_s4 + $0x1c] sm:$0xf] %v1300_v57 }
 0x557   :  { %1309 = vsyncpa [#allocation6], 1 }
 0x558   :  { %1310 = vsyncpa [#allocation8], 1 }

// kernel: _lambda_.3
= control target key start
LH: loop header
LB: loop body
LE: loop exit
PB: predicated region body
PF: predicated region fallthrough
CT: control target
= control target key end

     0   :  { %s2749_s1 = inlined_call_operand.vmem [shape: bf16[128,512], index: 1, kind: input, shape index: {}]   ;;  %s2750_s2 = inlined_call_operand.vmem [shape: bf16[128,512], index: 2, kind: input, shape index: {}]   ;;  %s2751_s0 = inlined_call_operand.vmem [shape: bf16[64,128], index: 0, kind: input, shape index: {}]   ;;  %s2752_s3 = inlined_call_operand.vmem [shape: f32[1,512], index: 3, kind: input, shape index: {}]   ;;  %s2753_s5 = inlined_call_operand.vmem [shape: f32[1,128], index: 5, kind: input, shape index: {}]   ;;  %s2754_s4 = inlined_call_operand.vmem [shape: bf16[128,128], index: 4, kind: input, shape index: {}]   ;;  %s2755_s6 = inlined_call_operand.vmem [shape: f32[8,128], index: 6, kind: output, shape index: {}]  }
   0x1   :  { %v1491_v0 = vld [vmem:[%s2749_s1 + $0xe0] sm:$0xf]  ;;  %v1699_v1 = vld [vmem:[%s2749_s1 + $0xec] sm:$0xf0]  ;;  %v1697_v2 = vld [vmem:[%s2749_s1 + $0xe4] sm:$0xf] }
   0x2   :  { %v1492_v3 = vor.u32 %v1699_v1, %v1491_v0  ;;  %v1493_v4 = vld [vmem:[%s2749_s1 + $0xf0] sm:$0xf0]  ;;  %v1499_v5 = vld [vmem:[%s2749_s1 + $0xe8] sm:$0xf]  ;;  %v1700_v6 = vld [vmem:[%s2749_s1 + $0xf4] sm:$0xf0] }
   0x3   :  { %v1496_v7 = vor.u32 %v1697_v2, %v1493_v4  ;;  %v1500_v8 = vor.u32 %v1700_v6, %v1499_v5  ;;  %v1698_v9 = vld [vmem:[%s2749_s1 + $0xec] sm:$0xf]  ;;  %v1501_v10 = vld [vmem:[%s2749_s1 + $0xf8] sm:$0xf0]  ;;  %v1475_v11 = vld [vmem:[%s2749_s1 + $0xc0] sm:$0xf] }
   0x4   :  { %264 = vmatpush.bf16.msra.mxu0 %v1492_v3  ;;  %v1504_v12 = vor.u32 %v1698_v9, %v1501_v10  ;;  %v1695_v13 = vld [vmem:[%s2749_s1 + $0xcc] sm:$0xf0]  ;;  %v1693_v14 = vld [vmem:[%s2749_s1 + $0xc4] sm:$0xf]  ;;  %v1477_v15 = vld [vmem:[%s2749_s1 + $0xd0] sm:$0xf0] }
   0x5   :  { %293 = vmatpush.bf16.msra.mxu1 %v1496_v7  ;;  %322 = vmatpush.bf16.msra.mxu2 %v1500_v8  ;;  %v1476_v16 = vor.u32 %v1695_v13, %v1475_v11  ;;  %v1480_v17 = vor.u32 %v1693_v14, %v1477_v15  ;;  %v1483_v18 = vld [vmem:[%s2749_s1 + $0xc8] sm:$0xf]  ;;  %v1696_v19 = vld [vmem:[%s2749_s1 + $0xd4] sm:$0xf0]  ;;  %v1694_v20 = vld [vmem:[%s2749_s1 + $0xcc] sm:$0xf] }
   0x6   :  { %351 = vmatpush.bf16.msra.mxu3 %v1504_v12  ;;  %v1484_v21 = vor.u32 %v1696_v19, %v1483_v18  ;;  %v1485_v22 = vld [vmem:[%s2749_s1 + $0xd8] sm:$0xf0]  ;;  %v1459_v23 = vld [vmem:[%s2749_s1 + $0xa0] sm:$0xf]  ;;  %v1691_v24 = vld [vmem:[%s2749_s1 + $0xac] sm:$0xf0] }
   0x7   :  { %v1488_v25 = vor.u32 %v1694_v20, %v1485_v22  ;;  %v1689_v26 = vld [vmem:[%s2749_s1 + $0xa4] sm:$0xf]  ;;  %v1461_v27 = vld [vmem:[%s2749_s1 + $0xb0] sm:$0xf0]  ;;  %v1467_v28 = vld [vmem:[%s2749_s1 + $0xa8] sm:$0xf]  ;;  %v1460_v29 = vor.u32 %v1691_v24, %v1459_v23 }
   0x8   :  { %265 = vmatpush.bf16.msra.mxu0 %v1476_v16  ;;  %v1692_v30 = vld [vmem:[%s2749_s1 + $0xb4] sm:$0xf0]  ;;  %v1690_v31 = vld [vmem:[%s2749_s1 + $0xac] sm:$0xf]  ;;  %v1469_v32 = vld [vmem:[%s2749_s1 + $0xb8] sm:$0xf0]  ;;  %v1464_v33 = vor.u32 %v1689_v26, %v1461_v27 }
   0x9   :  { %294 = vmatpush.bf16.msra.mxu1 %v1480_v17  ;;  %323 = vmatpush.bf16.msra.mxu2 %v1484_v21  ;;  %v1468_v34 = vor.u32 %v1692_v30, %v1467_v28  ;;  %v1443_v35 = vld [vmem:[%s2749_s1 + $0x80] sm:$0xf]  ;;  %v1687_v36 = vld [vmem:[%s2749_s1 + $0x8c] sm:$0xf0]  ;;  %v1685_v37 = vld [vmem:[%s2749_s1 + $0x84] sm:$0xf]  ;;  %v1472_v38 = vor.u32 %v1690_v31, %v1469_v32 }
   0xa   :  { %352 = vmatpush.bf16.msra.mxu3 %v1488_v25  ;;  %v1445_v39 = vld [vmem:[%s2749_s1 + $0x90] sm:$0xf0]  ;;  %v1451_v40 = vld [vmem:[%s2749_s1 + $0x88] sm:$0xf]  ;;  %v1688_v41 = vld [vmem:[%s2749_s1 + $0x94] sm:$0xf0]  ;;  %v1444_v44 = vor.u32 %v1687_v36, %v1443_v35 }
   0xb   :  { %v1686_v42 = vld [vmem:[%s2749_s1 + $0x8c] sm:$0xf]  ;;  %v1453_v43 = vld [vmem:[%s2749_s1 + $0x98] sm:$0xf0]  ;;  %v1448_v45 = vor.u32 %v1685_v37, %v1445_v39  ;;  %v1452_v46 = vor.u32 %v1688_v41, %v1451_v40  ;;  %v1427_v47 = vld [vmem:[%s2749_s1 + $0x60] sm:$0xf] }
   0xc   :  { %266 = vmatpush.bf16.msra.mxu0 %v1460_v29  ;;  %v1683_v48 = vld [vmem:[%s2749_s1 + $0x6c] sm:$0xf0]  ;;  %v1681_v49 = vld [vmem:[%s2749_s1 + $0x64] sm:$0xf]  ;;  %v1456_v50 = vor.u32 %v1686_v42, %v1453_v43  ;;  %v1429_v51 = vld [vmem:[%s2749_s1 + $0x70] sm:$0xf0] }
   0xd   :  { %295 = vmatpush.bf16.msra.mxu1 %v1464_v33  ;;  %324 = vmatpush.bf16.msra.mxu2 %v1468_v34  ;;  %v1435_v52 = vld [vmem:[%s2749_s1 + $0x68] sm:$0xf]  ;;  %v1684_v53 = vld [vmem:[%s2749_s1 + $0x74] sm:$0xf0]  ;;  %v1682_v54 = vld [vmem:[%s2749_s1 + $0x6c] sm:$0xf]  ;;  %v1428_v56 = vor.u32 %v1683_v48, %v1427_v47  ;;  %v1432_v57 = vor.u32 %v1681_v49, %v1429_v51 }
   0xe   :  { %353 = vmatpush.bf16.msra.mxu3 %v1472_v38  ;;  %v1437_v55 = vld [vmem:[%s2749_s1 + $0x78] sm:$0xf0]  ;;  %v1436_v58 = vor.u32 %v1684_v53, %v1435_v52  ;;  %v1411_v59 = vld [vmem:[%s2749_s1 + $0x40] sm:$0xf]  ;;  %v1679_v60 = vld [vmem:[%s2749_s1 + $0x4c] sm:$0xf0] }
   0xf   :  { %v1677_v61 = vld [vmem:[%s2749_s1 + $0x44] sm:$0xf]  ;;  %v1440_v62 = vor.u32 %v1682_v54, %v1437_v55  ;;  %v1413_v63 = vld [vmem:[%s2749_s1 + $0x50] sm:$0xf0]  ;;  %v1419_v0 = vld [vmem:[%s2749_s1 + $0x48] sm:$0xf]  ;;  %v1412_v4 = vor.u32 %v1679_v60, %v1411_v59 }
  0x10   :  { %267 = vmatpush.bf16.msra.mxu0 %v1444_v44  ;;  %v1680_v1 = vld [vmem:[%s2749_s1 + $0x54] sm:$0xf0]  ;;  %v1678_v2 = vld [vmem:[%s2749_s1 + $0x4c] sm:$0xf]  ;;  %v1421_v3 = vld [vmem:[%s2749_s1 + $0x58] sm:$0xf0]  ;;  %v1416_v5 = vor.u32 %v1677_v61, %v1413_v63 }
  0x11   :  { %296 = vmatpush.bf16.msra.mxu1 %v1448_v45  ;;  %325 = vmatpush.bf16.msra.mxu2 %v1452_v46  ;;  %v1420_v6 = vor.u32 %v1680_v1, %v1419_v0  ;;  %v1395_v7 = vld [vmem:[%s2749_s1 + $0x20] sm:$0xf]  ;;  %v1675_v8 = vld [vmem:[%s2749_s1 + $0x2c] sm:$0xf0]  ;;  %v1673_v9 = vld [vmem:[%s2749_s1 + $0x24] sm:$0xf]  ;;  %v1424_v10 = vor.u32 %v1678_v2, %v1421_v3 }
  0x12   :  { %354 = vmatpush.bf16.msra.mxu3 %v1456_v50  ;;  %v1397_v11 = vld [vmem:[%s2749_s1 + $0x30] sm:$0xf0]  ;;  %v1403_v12 = vld [vmem:[%s2749_s1 + $0x28] sm:$0xf]  ;;  %v1676_v13 = vld [vmem:[%s2749_s1 + $0x34] sm:$0xf0]  ;;  %v1396_v16 = vor.u32 %v1675_v8, %v1395_v7 }
  0x13   :  { %v1674_v14 = vld [vmem:[%s2749_s1 + $0x2c] sm:$0xf]  ;;  %v1405_v15 = vld [vmem:[%s2749_s1 + $0x38] sm:$0xf0]  ;;  %v1379_v17 = vld [vmem:[%s2749_s1] sm:$0xf]  ;;  %v1400_v18 = vor.u32 %v1673_v9, %v1397_v11  ;;  %v1404_v19 = vor.u32 %v1676_v13, %v1403_v12 }
  0x14   :  { %268 = vmatpush.bf16.msra.mxu0 %v1428_v56  ;;  %v1671_v20 = vld [vmem:[%s2749_s1 + $0xc] sm:$0xf0]  ;;  %v1669_v21 = vld [vmem:[%s2749_s1 + $0x4] sm:$0xf]  ;;  %v1381_v22 = vld [vmem:[%s2749_s1 + $0x10] sm:$0xf0]  ;;  %v1408_v23 = vor.u32 %v1674_v14, %v1405_v15 }
  0x15   :  { %297 = vmatpush.bf16.msra.mxu1 %v1432_v57  ;;  %326 = vmatpush.bf16.msra.mxu2 %v1436_v58  ;;  %v1387_v24 = vld [vmem:[%s2749_s1 + $0x8] sm:$0xf]  ;;  %v1672_v25 = vld [vmem:[%s2749_s1 + $0x14] sm:$0xf0]  ;;  %v1670_v26 = vld [vmem:[%s2749_s1 + $0xc] sm:$0xf]  ;;  %v1380_v30 = vor.u32 %v1671_v20, %v1379_v17  ;;  %v1384_v33 = vor.u32 %v1669_v21, %v1381_v22 }
  0x16   :  { %355 = vmatpush.bf16.msra.mxu3 %v1440_v62  ;;  %v1389_v27 = vld [vmem:[%s2749_s1 + $0x18] sm:$0xf0]  ;;  %v1619_v28 = vld [vmem:[%s2750_s2 + $0xe0] sm:$0xf]  ;;  %v1731_v29 = vld [vmem:[%s2750_s2 + $0xec] sm:$0xf0]  ;;  %v1388_v34 = vor.u32 %v1672_v25, %v1387_v24 }
  0x17   :  { %v1729_v31 = vld [vmem:[%s2750_s2 + $0xe4] sm:$0xf]  ;;  %v1621_v32 = vld [vmem:[%s2750_s2 + $0xf0] sm:$0xf0]  ;;  %v1392_v36 = vor.u32 %v1670_v26, %v1389_v27  ;;  %v2067_v37 = vor.u32 %v1731_v29, %v1619_v28  ;;  %v1627_v38 = vld [vmem:[%s2750_s2 + $0xe8] sm:$0xf] }
  0x18   :  { %269 = vmatpush.bf16.msra.mxu0 %v1412_v4  ;;  %v1665_v35 = vld [vmem:[%s2751_s0] sm:$0xff]  ;;  %v1732_v39 = vld [vmem:[%s2750_s2 + $0xf4] sm:$0xf0]  ;;  %v1730_v40 = vld [vmem:[%s2750_s2 + $0xec] sm:$0xf]  ;;  %v2078_v41 = vor.u32 %v1729_v31, %v1621_v32 }
  0x19   :  { %298 = vmatpush.bf16.msra.mxu1 %v1416_v5  ;;  %327 = vmatpush.bf16.msra.mxu2 %v1420_v6  ;;  %v1629_v42 = vld [vmem:[%s2750_s2 + $0xf8] sm:$0xf0]  ;;  %v1603_v43 = vld [vmem:[%s2750_s2 + $0xc0] sm:$0xf]  ;;  %v1727_v44 = vld [vmem:[%s2750_s2 + $0xcc] sm:$0xf0]  ;;  %v2095_v47 = vor.u32 %v1732_v39, %v1627_v38 }
  0x1a   :  { %356 = vmatpush.bf16.msra.mxu3 %v1424_v10  ;;  %v1725_v45 = vld [vmem:[%s2750_s2 + $0xc4] sm:$0xf]  ;;  %v1605_v46 = vld [vmem:[%s2750_s2 + $0xd0] sm:$0xf0]  ;;  %v2098_v48 = vor.u32 %v1730_v40, %v1629_v42  ;;  %v2100_v49 = vor.u32 %v1727_v44, %v1603_v43  ;;  %v1611_v50 = vld [vmem:[%s2750_s2 + $0xc8] sm:$0xf] }
  0x1b   :  { %v1728_v51 = vld [vmem:[%s2750_s2 + $0xd4] sm:$0xf0]  ;;  %v1726_v52 = vld [vmem:[%s2750_s2 + $0xcc] sm:$0xf]  ;;  %v2112_v53 = vor.u32 %v1725_v45, %v1605_v46  ;;  %v1613_v54 = vld [vmem:[%s2750_s2 + $0xd8] sm:$0xf0] }
  0x1c   :  { %270 = vmatpush.bf16.msra.mxu0 %v1396_v16  ;;  %v1587_v55 = vld [vmem:[%s2750_s2 + $0xa0] sm:$0xf]  ;;  %v1723_v56 = vld [vmem:[%s2750_s2 + $0xac] sm:$0xf0]  ;;  %v1721_v57 = vld [vmem:[%s2750_s2 + $0xa4] sm:$0xf]  ;;  %v2130_v59 = vor.u32 %v1728_v51, %v1611_v50  ;;  %v2134_v60 = vor.u32 %v1726_v52, %v1613_v54 }
  0x1d   :  { %299 = vmatpush.bf16.msra.mxu1 %v1400_v18  ;;  %328 = vmatpush.bf16.msra.mxu2 %v1404_v19  ;;  %v1589_v58 = vld [vmem:[%s2750_s2 + $0xb0] sm:$0xf0]  ;;  %v2136_v61 = vor.u32 %v1723_v56, %v1587_v55  ;;  %v1595_v62 = vld [vmem:[%s2750_s2 + $0xa8] sm:$0xf]  ;;  %v1724_v63 = vld [vmem:[%s2750_s2 + $0xb4] sm:$0xf0] }
  0x1e   :  { %357 = vmatpush.bf16.msra.mxu3 %v1408_v23  ;;  %v1722_v0 = vld [vmem:[%s2750_s2 + $0xac] sm:$0xf]  ;;  %v2148_v1 = vor.u32 %v1721_v57, %v1589_v58  ;;  %v1597_v2 = vld [vmem:[%s2750_s2 + $0xb8] sm:$0xf0]  ;;  %v1571_v3 = vld [vmem:[%s2750_s2 + $0x80] sm:$0xf]  ;;  %v2166_v7 = vor.u32 %v1724_v63, %v1595_v62 }
  0x1f   :  { %v1719_v4 = vld [vmem:[%s2750_s2 + $0x8c] sm:$0xf0]  ;;  %v1717_v5 = vld [vmem:[%s2750_s2 + $0x84] sm:$0xf]  ;;  %v1573_v6 = vld [vmem:[%s2750_s2 + $0x90] sm:$0xf0]  ;;  %v2170_v8 = vor.u32 %v1722_v0, %v1597_v2 }
  0x20   :  { %271 = vmatpush.bf16.msra.mxu0 %v1380_v30  ;;  %v2172_v9 = vor.u32 %v1719_v4, %v1571_v3  ;;  %v1579_v10 = vld [vmem:[%s2750_s2 + $0x88] sm:$0xf]  ;;  %v1720_v11 = vld [vmem:[%s2750_s2 + $0x94] sm:$0xf0]  ;;  %v1718_v12 = vld [vmem:[%s2750_s2 + $0x8c] sm:$0xf]  ;;  %v2184_v13 = vor.u32 %v1717_v5, %v1573_v6 }
  0x21   :  { %300 = vmatpush.bf16.msra.mxu1 %v1384_v33  ;;  %329 = vmatpush.bf16.msra.mxu2 %v1388_v34  ;;  %v1581_v14 = vld [vmem:[%s2750_s2 + $0x98] sm:$0xf0]  ;;  %v1555_v15 = vld [vmem:[%s2750_s2 + $0x60] sm:$0xf]  ;;  %v1715_v16 = vld [vmem:[%s2750_s2 + $0x6c] sm:$0xf0]  ;;  %v2205_v20 = vor.u32 %v1720_v11, %v1579_v10 }
  0x22   :  { %358 = vmatpush.bf16.msra.mxu3 %v1392_v36  ;;  %v1713_v17 = vld [vmem:[%s2750_s2 + $0x64] sm:$0xf]  ;;  %v1557_v18 = vld [vmem:[%s2750_s2 + $0x70] sm:$0xf0]  ;;  %v1666_v19 = vld [vmem:[%s2751_s0 + $0x8] sm:$0xff]  ;;  %v2209_v21 = vor.u32 %v1718_v12, %v1581_v14  ;;  %v2211_v22 = vor.u32 %v1715_v16, %v1555_v15 }
  0x23   :  { %272 = vmatmul.bf16.vlgmr.msra.gmra.mxu0 %v1665_v35  ;;  %v1563_v23 = vld [vmem:[%s2750_s2 + $0x68] sm:$0xf]  ;;  %v1716_v24 = vld [vmem:[%s2750_s2 + $0x74] sm:$0xf0]  ;;  %v1714_v25 = vld [vmem:[%s2750_s2 + $0x6c] sm:$0xf]  ;;  %v2223_v26 = vor.u32 %v1713_v17, %v1557_v18 }
  0x24   :  { %614 = vmatpush.bf16.msrb.mxu0 %v2067_v37  ;;  %301 = vmatmul.bf16.vlgmr.msra.gmra.mxu1 %v1665_v35  ;;  %v1565_v27 = vld [vmem:[%s2750_s2 + $0x78] sm:$0xf0]  ;;  %v1539_v28 = vld [vmem:[%s2750_s2 + $0x40] sm:$0xf]  ;;  %v1711_v29 = vld [vmem:[%s2750_s2 + $0x4c] sm:$0xf0]  ;;  %v2241_v32 = vor.u32 %v1716_v24, %v1563_v23 }
  0x25   :  { %627 = vmatpush.bf16.msrb.mxu1 %v2078_v41  ;;  %330 = vmatmul.bf16.vlgmr.msra.gmra.mxu2 %v1665_v35  ;;  %v1709_v30 = vld [vmem:[%s2750_s2 + $0x44] sm:$0xf]  ;;  %v1541_v31 = vld [vmem:[%s2750_s2 + $0x50] sm:$0xf0]  ;;  %v2245_v33 = vor.u32 %v1714_v25, %v1565_v27  ;;  %v2247_v34 = vor.u32 %v1711_v29, %v1539_v28  ;;  %v1712_v36 = vld [vmem:[%s2750_s2 + $0x54] sm:$0xf0] }
  0x26   :  { %359 = vmatmul.bf16.vlgmr.msra.gmra.mxu3 %v1665_v35  ;;  %640 = vmatpush.bf16.msrb.mxu2 %v2095_v47  ;;  %v1547_v35 = vld [vmem:[%s2750_s2 + $0x48] sm:$0xf]  ;;  %v2256_v38 = vor.u32 %v1709_v30, %v1541_v31  ;;  %v1710_v39 = vld [vmem:[%s2750_s2 + $0x4c] sm:$0xf]  ;;  %v1549_v40 = vld [vmem:[%s2750_s2 + $0x58] sm:$0xf0] }
  0x27   :  { %653 = vmatpush.bf16.msrb.mxu3 %v2098_v48  ;;  %v2265_v42 = vor.u32 %v1712_v36, %v1547_v35  ;;  %v1523_v43 = vld [vmem:[%s2750_s2 + $0x20] sm:$0xf]  ;;  %v1707_v44 = vld [vmem:[%s2750_s2 + $0x2c] sm:$0xf0]  ;;  %v1705_v45 = vld [vmem:[%s2750_s2 + $0x24] sm:$0xf]  ;;  %v2278_v46 = vor.u32 %v1710_v39, %v1549_v40 }
  0x28   :  { %615 = vmatpush.bf16.msrb.mxu0 %v2100_v49  ;;  %v2280_v50 = vor.u32 %v1707_v44, %v1523_v43  ;;  %v1525_v51 = vld [vmem:[%s2750_s2 + $0x30] sm:$0xf0]  ;;  %v1531_v52 = vld [vmem:[%s2750_s2 + $0x28] sm:$0xf]  ;;  %v1708_v54 = vld [vmem:[%s2750_s2 + $0x34] sm:$0xf0] }
  0x29   :  { %628 = vmatpush.bf16.msrb.mxu1 %v2112_v53  ;;  %v2292_v55 = vor.u32 %v1705_v45, %v1525_v51  ;;  %v1706_v56 = vld [vmem:[%s2750_s2 + $0x2c] sm:$0xf]  ;;  %v1533_v57 = vld [vmem:[%s2750_s2 + $0x38] sm:$0xf0]  ;;  %v1507_v58 = vld [vmem:[%s2750_s2] sm:$0xf]  ;;  %v2313_v2 = vor.u32 %v1708_v54, %v1531_v52 }
  0x2a   :  { %641 = vmatpush.bf16.msrb.mxu2 %v2130_v59  ;;  %v1703_v62 = vld [vmem:[%s2750_s2 + $0xc] sm:$0xf0]  ;;  %v1701_v63 = vld [vmem:[%s2750_s2 + $0x4] sm:$0xf]  ;;  %v1509_v0 = vld [vmem:[%s2750_s2 + $0x10] sm:$0xf0]  ;;  %v2317_v3 = vor.u32 %v1706_v56, %v1533_v57 }
  0x2b   :  { %654 = vmatpush.bf16.msrb.mxu3 %v2134_v60  ;;  %v2319_v4 = vor.u32 %v1703_v62, %v1507_v58  ;;  %v1515_v5 = vld [vmem:[%s2750_s2 + $0x8] sm:$0xf]  ;;  %v1704_v6 = vld [vmem:[%s2750_s2 + $0x14] sm:$0xf0]  ;;  %v2328_v10 = vor.u32 %v1701_v63, %v1509_v0  ;;  %v1702_v11 = vld [vmem:[%s2750_s2 + $0xc] sm:$0xf] }
  0x2c   :  { %616 = vmatpush.bf16.msrb.mxu0 %v2136_v61  ;;  %v1517_v12 = vld [vmem:[%s2750_s2 + $0x18] sm:$0xf0]  ;;  %v2337_v14 = vor.u32 %v1704_v6, %v1515_v5  ;;  %v1667_v16 = vld [vmem:[%s2751_s0 + $0x10] sm:$0xff]  ;;  %v1824_v18 = vmov 0.0|0.0   ;;  %v70_v24 = vld [vmem:[%s2752_s3] sm:$0xf] }
  0x2d   :  { %629 = vmatpush.bf16.msrb.mxu1 %v2148_v1  ;;  %v2341_v15 = vor.u32 %v1702_v11, %v1517_v12  ;;  %v1668_v17 = vld [vmem:[%s2751_s0 + $0x18] sm:$0xff]  ;;  %v73_v27 = vperm.slane %v70_v24, 1  ;;  %v2427_v35 = vperm.slane %v70_v24, 2  ;;  %v2429_v36 = vperm.slane %v70_v24, 0 }
  0x2e   :  { %642 = vmatpush.bf16.msrb.mxu2 %v2166_v7  ;;  %v2431_v39 = vperm.slane %v70_v24, 3 }
  0x2f   :  { %655 = vmatpush.bf16.msrb.mxu3 %v2170_v8 }
  0x30   :  { %617 = vmatpush.bf16.msrb.mxu0 %v2172_v9 }
  0x31   :  { %630 = vmatpush.bf16.msrb.mxu1 %v2184_v13 }
  0x32   :  { %643 = vmatpush.bf16.msrb.mxu2 %v2205_v20 }
  0x33   :  { %656 = vmatpush.bf16.msrb.mxu3 %v2209_v21  ;;  %277 = vmatmul.bf16.gmra.mxu0 %v1666_v19 }
  0x34   :  { %618 = vmatpush.bf16.msrb.mxu0 %v2211_v22  ;;  %306 = vmatmul.bf16.gmra.mxu1 %v1666_v19 }
  0x35   :  { %631 = vmatpush.bf16.msrb.mxu1 %v2223_v26  ;;  %335 = vmatmul.bf16.gmra.mxu2 %v1666_v19 }
  0x36   :  { %364 = vmatmul.bf16.gmra.mxu3 %v1666_v19  ;;  %644 = vmatpush.bf16.msrb.mxu2 %v2241_v32 }
  0x37   :  { %657 = vmatpush.bf16.msrb.mxu3 %v2245_v33 }
  0x38   :  { %619 = vmatpush.bf16.msrb.mxu0 %v2247_v34 }
  0x39   :  { %632 = vmatpush.bf16.msrb.mxu1 %v2256_v38 }
  0x3a   :  { %645 = vmatpush.bf16.msrb.mxu2 %v2265_v42 }
  0x3b   :  { %658 = vmatpush.bf16.msrb.mxu3 %v2278_v46 }
  0x3c   :  { %620 = vmatpush.bf16.msrb.mxu0 %v2280_v50 }
  0x3d   :  { %633 = vmatpush.bf16.msrb.mxu1 %v2292_v55 }
  0x3e   :  { %646 = vmatpush.bf16.msrb.mxu2 %v2313_v2 }
  0x3f   :  { %659 = vmatpush.bf16.msrb.mxu3 %v2317_v3 }
  0x40   :  { %621 = vmatpush.bf16.msrb.mxu0 %v2319_v4 }
  0x41   :  { %634 = vmatpush.bf16.msrb.mxu1 %v2328_v10 }
  0x42   :  { %647 = vmatpush.bf16.msrb.mxu2 %v2337_v14 }
  0x43   :  { %660 = vmatpush.bf16.msrb.mxu3 %v2341_v15  ;;  %282 = vmatmul.bf16.gmra.mxu0 %v1667_v16 }
  0x44   :  { %696 = vmatpush.bf16.msra.mxu0 %v2067_v37  ;;  %311 = vmatmul.bf16.gmra.mxu1 %v1667_v16 }
  0x45   :  { %709 = vmatpush.bf16.msra.mxu1 %v2078_v41  ;;  %340 = vmatmul.bf16.gmra.mxu2 %v1667_v16 }
  0x46   :  { %722 = vmatpush.bf16.msra.mxu2 %v2095_v47  ;;  %369 = vmatmul.bf16.gmra.mxu3 %v1667_v16 }
  0x47   :  { %735 = vmatpush.bf16.msra.mxu3 %v2098_v48 }
  0x48   :  { %697 = vmatpush.bf16.msra.mxu0 %v2100_v49 }
  0x49   :  { %710 = vmatpush.bf16.msra.mxu1 %v2112_v53 }
  0x4a   :  { %723 = vmatpush.bf16.msra.mxu2 %v2130_v59 }
  0x4b   :  { %736 = vmatpush.bf16.msra.mxu3 %v2134_v60 }
  0x4c   :  { %698 = vmatpush.bf16.msra.mxu0 %v2136_v61 }
  0x4d   :  { %711 = vmatpush.bf16.msra.mxu1 %v2148_v1 }
  0x4e   :  { %724 = vmatpush.bf16.msra.mxu2 %v2166_v7 }
  0x4f   :  { %737 = vmatpush.bf16.msra.mxu3 %v2170_v8 }
  0x50   :  { %699 = vmatpush.bf16.msra.mxu0 %v2172_v9 }
  0x51   :  { %712 = vmatpush.bf16.msra.mxu1 %v2184_v13 }
  0x52   :  { %725 = vmatpush.bf16.msra.mxu2 %v2205_v20 }
  0x53   :  { %738 = vmatpush.bf16.msra.mxu3 %v2209_v21  ;;  %287 = vmatmul.bf16.gmra.mxu0 %v1668_v17 }
  0x54   :  { %700 = vmatpush.bf16.msra.mxu0 %v2211_v22  ;;  %316 = vmatmul.bf16.gmra.mxu1 %v1668_v17 }
  0x55   :  { %713 = vmatpush.bf16.msra.mxu1 %v2223_v26  ;;  %345 = vmatmul.bf16.gmra.mxu2 %v1668_v17 }
  0x56   :  { %726 = vmatpush.bf16.msra.mxu2 %v2241_v32  ;;  %374 = vmatmul.bf16.gmra.mxu3 %v1668_v17 }
  0x57   :  { %739 = vmatpush.bf16.msra.mxu3 %v2245_v33 }
  0x58   :  { %701 = vmatpush.bf16.msra.mxu0 %v2247_v34 }
  0x59   :  { %714 = vmatpush.bf16.msra.mxu1 %v2256_v38 }
  0x5a   :  { %727 = vmatpush.bf16.msra.mxu2 %v2265_v42 }
  0x5b   :  { %740 = vmatpush.bf16.msra.mxu3 %v2278_v46 }
  0x5c   :  { %702 = vmatpush.bf16.msra.mxu0 %v2280_v50 }
  0x5d   :  { %715 = vmatpush.bf16.msra.mxu1 %v2292_v55 }
  0x5e   :  { %728 = vmatpush.bf16.msra.mxu2 %v2313_v2 }
  0x5f   :  { %741 = vmatpush.bf16.msra.mxu3 %v2317_v3 }
  0x60   :  { %703 = vmatpush.bf16.msra.mxu0 %v2319_v4 }
  0x61   :  { %716 = vmatpush.bf16.msra.mxu1 %v2328_v10 }
  0x62   :  { %729 = vmatpush.bf16.msra.mxu2 %v2337_v14 }
  0x63   :  { %742 = vmatpush.bf16.msra.mxu3 %v2341_v15  ;;  %622 = vmatmul.bf16.vlgmr.msrb.gmra.mxu0 %v1824_v18 }
  0x64   :  { %635 = vmatmul.bf16.vlgmr.msrb.gmra.mxu1 %v1824_v18  ;;  %778 = vmatpush.bf16.msrb.mxu0 %v2067_v37 }
  0x65   :  { %648 = vmatmul.bf16.vlgmr.msrb.gmra.mxu2 %v1824_v18  ;;  %791 = vmatpush.bf16.msrb.mxu1 %v2078_v41 }
  0x66   :  { %661 = vmatmul.bf16.vlgmr.msrb.gmra.mxu3 %v1824_v18  ;;  %804 = vmatpush.bf16.msrb.mxu2 %v2095_v47 }
  0x67   :  { %817 = vmatpush.bf16.msrb.mxu3 %v2098_v48 }
  0x68   :  { %779 = vmatpush.bf16.msrb.mxu0 %v2100_v49 }
  0x69   :  { %792 = vmatpush.bf16.msrb.mxu1 %v2112_v53 }
  0x6a   :  { %805 = vmatpush.bf16.msrb.mxu2 %v2130_v59 }
  0x6b   :  { %818 = vmatpush.bf16.msrb.mxu3 %v2134_v60 }
  0x6c   :  { %780 = vmatpush.bf16.msrb.mxu0 %v2136_v61 }
  0x6d   :  { %793 = vmatpush.bf16.msrb.mxu1 %v2148_v1 }
  0x6e   :  { %806 = vmatpush.bf16.msrb.mxu2 %v2166_v7 }
  0x6f   :  { %819 = vmatpush.bf16.msrb.mxu3 %v2170_v8 }
  0x70   :  { %781 = vmatpush.bf16.msrb.mxu0 %v2172_v9 }
  0x71   :  { %794 = vmatpush.bf16.msrb.mxu1 %v2184_v13 }
  0x72   :  { %807 = vmatpush.bf16.msrb.mxu2 %v2205_v20 }
  0x73   :  { %820 = vmatpush.bf16.msrb.mxu3 %v2209_v21 }
  0x74   :  { %782 = vmatpush.bf16.msrb.mxu0 %v2211_v22 }
  0x75   :  { %795 = vmatpush.bf16.msrb.mxu1 %v2223_v26 }
  0x76   :  { %808 = vmatpush.bf16.msrb.mxu2 %v2241_v32 }
  0x77   :  { %821 = vmatpush.bf16.msrb.mxu3 %v2245_v33 }
  0x78   :  { %783 = vmatpush.bf16.msrb.mxu0 %v2247_v34 }
  0x79   :  { %796 = vmatpush.bf16.msrb.mxu1 %v2256_v38 }
  0x7a   :  { %809 = vmatpush.bf16.msrb.mxu2 %v2265_v42 }
  0x7b   :  { %822 = vmatpush.bf16.msrb.mxu3 %v2278_v46 }
  0x7c   :  { %784 = vmatpush.bf16.msrb.mxu0 %v2280_v50 }
  0x7d   :  { %797 = vmatpush.bf16.msrb.mxu1 %v2292_v55 }
  0x7e   :  { %810 = vmatpush.bf16.msrb.mxu2 %v2313_v2 }
  0x7f   :  { %823 = vmatpush.bf16.msrb.mxu3 %v2317_v3 }
  0x80   :  { %785 = vmatpush.bf16.msrb.mxu0 %v2319_v4 }
  0x81   :  { %798 = vmatpush.bf16.msrb.mxu1 %v2328_v10 }
  0x82   :  { %811 = vmatpush.bf16.msrb.mxu2 %v2337_v14 }
  0x83   :  { %824 = vmatpush.bf16.msrb.mxu3 %v2341_v15 }
  0xa0   :  { %v273_v19 = vpop.f32.mrf.mxu0 }
  0xa1   :  { %v302_v23 = vpop.f32.mrf.mxu1 }
  0xa8   :  { %v2419_v25 = vpop.f32.mrf.mxu2  ;;  %v2423_v29 = vpop.f32.mrf.mxu0 }
  0xa9   :  { %v2421_v28 = vpop.f32.mrf.mxu3  ;;  %v304_v30 = vpop.f32.mrf.mxu1 }
  0xaa   :  { %v2425_v31 = vadd.f32 %v304_v30, %v73_v27 }
  0xb0   :  { %v333_v40 = vpop.f32.mrf.mxu2  ;;  %v278_v45 = vpop.f32.mrf.mxu0 }
  0xb1   :  { %v2434_v43 = vadd.f32 %v333_v40, %v2427_v35  ;;  %v362_v44 = vpop.f32.mrf.mxu3  ;;  %v2440_v52 = vadd.f32 %v278_v45, %v2429_v36  ;;  %v307_v54 = vpop.f32.mrf.mxu1 }
  0xb2   :  { %v2437_v51 = vadd.f32 %v362_v44, %v2431_v39  ;;  %v2442_v56 = vadd.f32 %v307_v54, %v73_v27 }
  0xb8   :  { %v336_v57 = vpop.f32.mrf.mxu2  ;;  %v280_v63 = vpop.f32.mrf.mxu0 }
  0xb9   :  { %v2445_v58 = vadd.f32 %v336_v57, %v2427_v35  ;;  %v365_v62 = vpop.f32.mrf.mxu3  ;;  %v2451_v5 = vadd.f32 %v280_v63, %v2429_v36  ;;  %v309_v6 = vpop.f32.mrf.mxu1 }
  0xba   :  { %v2448_v0 = vadd.f32 %v365_v62, %v2431_v39  ;;  %v2453_v11 = vadd.f32 %v309_v6, %v73_v27 }
  0xc0   :  { %v338_v12 = vpop.f32.mrf.mxu2  ;;  %v283_v18 = vpop.f32.mrf.mxu0 }
  0xc1   :  { %v2456_v16 = vadd.f32 %v338_v12, %v2427_v35  ;;  %v367_v17 = vpop.f32.mrf.mxu3  ;;  %v2462_v30 = vadd.f32 %v283_v18, %v2429_v36  ;;  %v312_v40 = vpop.f32.mrf.mxu1 }
  0xc2   :  { %v2459_v24 = vadd.f32 %v367_v17, %v2431_v39  ;;  %v2464_v44 = vadd.f32 %v312_v40, %v73_v27 }
  0xc3   :  { %2756 = vst [vmem:[#allocation5_spill] sm:$0xff] %v2456_v16 }
  0xc4   :  { %2757 = vst [vmem:[#allocation6_spill] sm:$0xff] %v2459_v24 }
  0xc5   :  { %2758 = vst [vmem:[#allocation7_spill] sm:$0xff] %v2462_v30 }
  0xc6   :  { %2759 = vst [vmem:[#allocation8_spill] sm:$0xff] %v2464_v44 }
  0xc8   :  { %v341_v45 = vpop.f32.mrf.mxu2  ;;  %v285_v62 = vpop.f32.mrf.mxu0 }
  0xc9   :  { %v2467_v54 = vadd.f32 %v341_v45, %v2427_v35  ;;  %v370_v57 = vpop.f32.mrf.mxu3  ;;  %v2473_v6 = vadd.f32 %v285_v62, %v2429_v36  ;;  %v314_v12 = vpop.f32.mrf.mxu1 }
  0xca   :  { %v2470_v63 = vadd.f32 %v370_v57, %v2431_v39  ;;  %v2475_v17 = vadd.f32 %v314_v12, %v73_v27 }
  0xcb   :  { %2760 = vst [vmem:[#allocation9_spill] sm:$0xff] %v2467_v54 }
  0xcc   :  { %2761 = vst [vmem:[#allocation10_spill] sm:$0xff] %v2470_v63 }
  0xcd   :  { %2762 = vst [vmem:[#allocation11_spill] sm:$0xff] %v2473_v6 }
  0xce   :  { %2763 = vst [vmem:[#allocation12_spill] sm:$0xff] %v2475_v17 }
  0xd0   :  { %v343_v18 = vpop.f32.mrf.mxu2  ;;  %v288_v44 = vpop.f32.mrf.mxu0 }
  0xd1   :  { %v2478_v30 = vadd.f32 %v343_v18, %v2427_v35  ;;  %v372_v40 = vpop.f32.mrf.mxu3  ;;  %v2484_v54 = vadd.f32 %v288_v44, %v2429_v36  ;;  %v317_v57 = vpop.f32.mrf.mxu1  ;;  %v274_v44 = vadd.f32 %v273_v19, %v2429_v36  ;;  %v361_v19 = vadd.f32 %v2421_v28, %v2431_v39 }
  0xd2   :  { %v2481_v45 = vadd.f32 %v372_v40, %v2431_v39  ;;  %v2486_v63 = vadd.f32 %v317_v57, %v73_v27  ;;  %v303_v57 = vadd.f32 %v302_v23, %v73_v27 }
  0xd3   :  { %2764 = vst [vmem:[#allocation13_spill] sm:$0xff] %v2478_v30 }
  0xd4   :  { %2765 = vst [vmem:[#allocation14_spill] sm:$0xff] %v2481_v45 }
  0xd5   :  { %2766 = vst [vmem:[#allocation15_spill] sm:$0xff] %v2484_v54 }
  0xd6   :  { %2767 = vst [vmem:[#allocation16_spill] sm:$0xff] %v2486_v63 }
  0xd8   :  { %v346_v62 = vpop.f32.mrf.mxu2  ;;  %v290_v17 = vpop.f32.mrf.mxu0 }
  0xd9   :  { %v2489_v6 = vadd.f32 %v346_v62, %v2427_v35  ;;  %v375_v12 = vpop.f32.mrf.mxu3  ;;  %v2495_v30 = vadd.f32 %v290_v17, %v2429_v36  ;;  %v319_v40 = vpop.f32.mrf.mxu1 }
  0xda   :  { %v2492_v18 = vadd.f32 %v375_v12, %v2431_v39  ;;  %v2497_v45 = vadd.f32 %v319_v40, %v73_v27  ;;  %v332_v40 = vadd.f32 %v2419_v25, %v2427_v35 }
  0xdb   :  { %2768 = vst [vmem:[#allocation17_spill] sm:$0xff] %v2489_v6 }
  0xdc   :  { %2769 = vst [vmem:[#allocation18_spill] sm:$0xff] %v2492_v18 }
  0xdd   :  { %2770 = vst [vmem:[#allocation19_spill] sm:$0xff] %v2495_v30 }
  0xde   :  { %2771 = vst [vmem:[#allocation20_spill] sm:$0xff] %v2497_v45 }
  0xe0   :  { %v348_v54 = vpop.f32.mrf.mxu2  ;;  %v623_v6 = vpop.f32.mrf.mxu0 }
  0xe1   :  { %v2501_v63 = vadd.f32 %v348_v54, %v2427_v35  ;;  %v377_v62 = vpop.f32.mrf.mxu3  ;;  %v666_v12 = vadd.f32 %v623_v6, %v274_v44  ;;  %v636_v18 = vpop.f32.mrf.mxu1 }
  0xe2   :  { %v2504_v24 = vadd.f32 %v377_v62, %v2431_v39  ;;  %v667_v16 = vadd.f32 %v636_v18, %v303_v57 }
  0xe3   :  { %2772 = vst [vmem:[#allocation21_spill] sm:$0xff] %v2501_v63  ;;  %v670_v17 = vmul.f32 0.5, %v666_v12 }
  0xe4   :  { %2773 = vst [vmem:[#allocation22_spill] sm:$0xff] %v2504_v24  ;;  %v671_v30 = vmul.f32 0.5, %v667_v16 }
  0xe5   :  { %1744 = vtanh.f32 %v670_v17 }
  0xe6   :  { %1746 = vtanh.f32 %v671_v30 }
  0xe8   :  { %v649_v23 = vpop.f32.mrf.mxu2  ;;  %v625_v63 = vpop.f32.mrf.mxu0 }
  0xe9   :  { %v668_v27 = vadd.f32 %v649_v23, %v332_v40  ;;  %v662_v54 = vpop.f32.mrf.mxu3  ;;  %v638_v62 = vpop.f32.mrf.mxu1 }
  0xea   :  { %v669_v45 = vadd.f32 %v662_v54, %v361_v19 }
  0xeb   :  { %1748 = vtanh.f32 %v668_v27  ;;  %v1745_v6 = vpop.eup %1744 }
  0xec   :  { %v679_v44 = vmul.f32 0.5, %v669_v45  ;;  %v1747_v18 = vpop.eup %1746  ;;  %v674_v57 = vmul.f32 0.5, %v1745_v6 }
  0xed   :  { %v675_v16 = vmul.f32 0.5, %v1747_v18 }
  0xee   :  { %1750 = vtanh.f32 %v679_v44  ;;  %v676_v12 = vadd.f32 0.5, %v674_v57 }
  0xef   :  { %v677_v17 = vadd.f32 0.5, %v675_v16 }
  0xf0   :  { %v651_v25 = vpop.f32.mrf.mxu2 }
  0xf1   :  { %v1749_v35 = vpop.eup %1748  ;;  %v664_v30 = vpop.f32.mrf.mxu3  ;;  %v683_v24 = vmul.f32 0.0, %v677_v17 }
  0xf2   :  { %v684_v28 = vmul.f32 %v1749_v35, %v676_v12 }
  0xf4   :  { %v1751_v39 = vpop.eup %1750  ;;  %v2510_v40 = vadd.f32 %v684_v28, %v683_v24  ;;  %v276_v24 = vadd.f32 %v2423_v29, %v2429_v36 }
  0xf5   :  { %v681_v63 = vmul.f32 0.5, %v1751_v39 }
  0xf6   :  { %1752 = vtanh.f32 %v2510_v40 }
  0xf7   :  { %v682_v19 = vadd.f32 0.5, %v681_v63 }
  0xfc   :  { %v1753_v23 = vpop.eup %1752 }
  0xfd   :  { %v687_v45 = vmul.f32 %v1753_v23, %v682_v19 }
  0xff   :  { %v695_v27 = vpack.c.bf16 %v687_v45, %v687_v45 }
 0x101   :  { %704 = vmatmul.bf16.vlgmr.msra.gmra.mxu0 %v695_v27  ;;  %717 = vmatmul.bf16.vlgmr.msra.gmra.mxu1 %v695_v27 }
 0x102   :  { %730 = vmatmul.bf16.vlgmr.msra.gmra.mxu2 %v695_v27  ;;  %743 = vmatmul.bf16.vlgmr.msra.gmra.mxu3 %v695_v27 }
 0x103   :  { %860 = vmatpush.bf16.msra.mxu0 %v2067_v37  ;;  %873 = vmatpush.bf16.msra.mxu1 %v2078_v41 }
 0x104   :  { %886 = vmatpush.bf16.msra.mxu2 %v2095_v47  ;;  %899 = vmatpush.bf16.msra.mxu3 %v2098_v48 }
 0x107   :  { %861 = vmatpush.bf16.msra.mxu0 %v2100_v49  ;;  %874 = vmatpush.bf16.msra.mxu1 %v2112_v53 }
 0x108   :  { %887 = vmatpush.bf16.msra.mxu2 %v2130_v59  ;;  %900 = vmatpush.bf16.msra.mxu3 %v2134_v60 }
 0x10b   :  { %862 = vmatpush.bf16.msra.mxu0 %v2136_v61  ;;  %875 = vmatpush.bf16.msra.mxu1 %v2148_v1 }
 0x10c   :  { %888 = vmatpush.bf16.msra.mxu2 %v2166_v7  ;;  %901 = vmatpush.bf16.msra.mxu3 %v2170_v8 }
 0x10f   :  { %863 = vmatpush.bf16.msra.mxu0 %v2172_v9  ;;  %876 = vmatpush.bf16.msra.mxu1 %v2184_v13 }
 0x110   :  { %889 = vmatpush.bf16.msra.mxu2 %v2205_v20  ;;  %902 = vmatpush.bf16.msra.mxu3 %v2209_v21 }
 0x113   :  { %864 = vmatpush.bf16.msra.mxu0 %v2211_v22  ;;  %877 = vmatpush.bf16.msra.mxu1 %v2223_v26 }
 0x114   :  { %890 = vmatpush.bf16.msra.mxu2 %v2241_v32  ;;  %903 = vmatpush.bf16.msra.mxu3 %v2245_v33 }
 0x117   :  { %865 = vmatpush.bf16.msra.mxu0 %v2247_v34  ;;  %878 = vmatpush.bf16.msra.mxu1 %v2256_v38 }
 0x118   :  { %891 = vmatpush.bf16.msra.mxu2 %v2265_v42  ;;  %904 = vmatpush.bf16.msra.mxu3 %v2278_v46 }
 0x11b   :  { %866 = vmatpush.bf16.msra.mxu0 %v2280_v50  ;;  %879 = vmatpush.bf16.msra.mxu1 %v2292_v55 }
 0x11c   :  { %892 = vmatpush.bf16.msra.mxu2 %v2313_v2  ;;  %905 = vmatpush.bf16.msra.mxu3 %v2317_v3 }
 0x11f   :  { %867 = vmatpush.bf16.msra.mxu0 %v2319_v4  ;;  %880 = vmatpush.bf16.msra.mxu1 %v2328_v10 }
 0x120   :  { %893 = vmatpush.bf16.msra.mxu2 %v2337_v14  ;;  %906 = vmatpush.bf16.msra.mxu3 %v2341_v15 }
 0x17e   :  { %v705_v54 = vpop.f32.mrf.mxu0  ;;  %v718_v62 = vpop.f32.mrf.mxu1 }
 0x17f   :  { %v748_v6 = vadd.f32 %v705_v54, %v276_v24  ;;  %v749_v44 = vadd.f32 %v718_v62, %v2425_v31 }
 0x181   :  { %v752_v18 = vmul.f32 0.5, %v748_v6  ;;  %v753_v57 = vmul.f32 0.5, %v749_v44 }
 0x183   :  { %1754 = vtanh.f32 %v752_v18 }
 0x184   :  { %1756 = vtanh.f32 %v753_v57 }
 0x185   :  { %v731_v16 = vpop.f32.mrf.mxu2  ;;  %v744_v12 = vpop.f32.mrf.mxu3 }
 0x186   :  { %v750_v17 = vadd.f32 %v731_v16, %v2434_v43  ;;  %v751_v25 = vadd.f32 %v744_v12, %v2437_v51  ;;  %v707_v35 = vpop.f32.mrf.mxu0  ;;  %v720_v30 = vpop.f32.mrf.mxu1 }
 0x188   :  { %1758 = vtanh.f32 %v750_v17  ;;  %v761_v28 = vmul.f32 0.5, %v751_v25 }
 0x189   :  { %v1755_v29 = vpop.eup %1754 }
 0x18a   :  { %v1757_v36 = vpop.eup %1756  ;;  %v756_v39 = vmul.f32 0.5, %v1755_v29  ;;  %1760 = vtanh.f32 %v761_v28 }
 0x18b   :  { %v757_v63 = vmul.f32 0.5, %v1757_v36 }
 0x18c   :  { %v758_v31 = vadd.f32 0.5, %v756_v39 }
 0x18d   :  { %v759_v19 = vadd.f32 0.5, %v757_v63  ;;  %v733_v23 = vpop.f32.mrf.mxu2  ;;  %v746_v45 = vpop.f32.mrf.mxu3 }
 0x18e   :  { %v1759_v27 = vpop.eup %1758 }
 0x18f   :  { %v765_v24 = vmul.f32 %v759_v19, %v2510_v40  ;;  %v766_v54 = vmul.f32 %v1759_v27, %v758_v31 }
 0x190   :  { %v1761_v43 = vpop.eup %1760 }
 0x191   :  { %v2551_v62 = vadd.f32 %v766_v54, %v765_v24  ;;  %v763_v51 = vmul.f32 0.5, %v1761_v43 }
 0x193   :  { %1762 = vtanh.f32 %v2551_v62  ;;  %v764_v6 = vadd.f32 0.5, %v763_v51 }
 0x199   :  { %v1763_v44 = vpop.eup %1762 }
 0x19a   :  { %v769_v18 = vmul.f32 %v1763_v44, %v764_v6 }
 0x19c   :  { %v777_v57 = vpack.c.bf16 %v769_v18, %v769_v18 }
 0x19e   :  { %786 = vmatmul.bf16.vlgmr.msrb.gmra.mxu0 %v777_v57  ;;  %799 = vmatmul.bf16.vlgmr.msrb.gmra.mxu1 %v777_v57 }
 0x19f   :  { %812 = vmatmul.bf16.vlgmr.msrb.gmra.mxu2 %v777_v57  ;;  %825 = vmatmul.bf16.vlgmr.msrb.gmra.mxu3 %v777_v57 }
 0x1a0   :  { %942 = vmatpush.bf16.msrb.mxu0 %v2067_v37  ;;  %955 = vmatpush.bf16.msrb.mxu1 %v2078_v41 }
 0x1a1   :  { %968 = vmatpush.bf16.msrb.mxu2 %v2095_v47  ;;  %981 = vmatpush.bf16.msrb.mxu3 %v2098_v48 }
 0x1a4   :  { %943 = vmatpush.bf16.msrb.mxu0 %v2100_v49  ;;  %956 = vmatpush.bf16.msrb.mxu1 %v2112_v53 }
 0x1a5   :  { %969 = vmatpush.bf16.msrb.mxu2 %v2130_v59  ;;  %982 = vmatpush.bf16.msrb.mxu3 %v2134_v60 }
 0x1a8   :  { %944 = vmatpush.bf16.msrb.mxu0 %v2136_v61  ;;  %957 = vmatpush.bf16.msrb.mxu1 %v2148_v1 }
 0x1a9   :  { %970 = vmatpush.bf16.msrb.mxu2 %v2166_v7  ;;  %983 = vmatpush.bf16.msrb.mxu3 %v2170_v8 }
 0x1ac   :  { %945 = vmatpush.bf16.msrb.mxu0 %v2172_v9  ;;  %958 = vmatpush.bf16.msrb.mxu1 %v2184_v13 }
 0x1ad   :  { %971 = vmatpush.bf16.msrb.mxu2 %v2205_v20  ;;  %984 = vmatpush.bf16.msrb.mxu3 %v2209_v21 }
 0x1b0   :  { %946 = vmatpush.bf16.msrb.mxu0 %v2211_v22  ;;  %959 = vmatpush.bf16.msrb.mxu1 %v2223_v26 }
 0x1b1   :  { %972 = vmatpush.bf16.msrb.mxu2 %v2241_v32  ;;  %985 = vmatpush.bf16.msrb.mxu3 %v2245_v33 }
 0x1b4   :  { %947 = vmatpush.bf16.msrb.mxu0 %v2247_v34  ;;  %960 = vmatpush.bf16.msrb.mxu1 %v2256_v38 }
 0x1b5   :  { %973 = vmatpush.bf16.msrb.mxu2 %v2265_v42  ;;  %986 = vmatpush.bf16.msrb.mxu3 %v2278_v46 }
 0x1b8   :  { %948 = vmatpush.bf16.msrb.mxu0 %v2280_v50  ;;  %961 = vmatpush.bf16.msrb.mxu1 %v2292_v55 }
 0x1b9   :  { %974 = vmatpush.bf16.msrb.mxu2 %v2313_v2  ;;  %987 = vmatpush.bf16.msrb.mxu3 %v2317_v3 }
 0x1bc   :  { %949 = vmatpush.bf16.msrb.mxu0 %v2319_v4  ;;  %962 = vmatpush.bf16.msrb.mxu1 %v2328_v10 }
 0x1bd   :  { %975 = vmatpush.bf16.msrb.mxu2 %v2337_v14  ;;  %988 = vmatpush.bf16.msrb.mxu3 %v2341_v15 }
 0x21b   :  { %v787_v40 = vpop.f32.mrf.mxu0  ;;  %v800_v16 = vpop.f32.mrf.mxu1 }
 0x21c   :  { %v830_v12 = vadd.f32 %v787_v40, %v2440_v52  ;;  %v831_v17 = vadd.f32 %v800_v16, %v2442_v56 }
 0x21e   :  { %v834_v25 = vmul.f32 0.5, %v830_v12  ;;  %v835_v35 = vmul.f32 0.5, %v831_v17 }
 0x220   :  { %1764 = vtanh.f32 %v834_v25 }
 0x221   :  { %1766 = vtanh.f32 %v835_v35 }
 0x222   :  { %v813_v30 = vpop.f32.mrf.mxu2  ;;  %v826_v28 = vpop.f32.mrf.mxu3 }
 0x223   :  { %v832_v29 = vadd.f32 %v813_v30, %v2445_v58  ;;  %v833_v36 = vadd.f32 %v826_v28, %v2448_v0  ;;  %v789_v39 = vpop.f32.mrf.mxu0  ;;  %v802_v63 = vpop.f32.mrf.mxu1 }
 0x224   :  { %v2775_v63 = vld [vmem:[#allocation6_spill] sm:$0xff] }
 0x225   :  { %1768 = vtanh.f32 %v832_v29  ;;  %v843_v31 = vmul.f32 0.5, %v833_v36  ;;  %v2774_v36 = vld [vmem:[#allocation5_spill] sm:$0xff] }
 0x226   :  { %v1765_v19 = vpop.eup %1764 }
 0x227   :  { %v1767_v23 = vpop.eup %1766  ;;  %v838_v45 = vmul.f32 0.5, %v1765_v19  ;;  %1770 = vtanh.f32 %v843_v31 }
 0x228   :  { %v839_v52 = vmul.f32 0.5, %v1767_v23 }
 0x229   :  { %v840_v56 = vadd.f32 0.5, %v838_v45 }
 0x22a   :  { %v841_v27 = vadd.f32 0.5, %v839_v52  ;;  %v815_v24 = vpop.f32.mrf.mxu2  ;;  %v828_v54 = vpop.f32.mrf.mxu3 }
 0x22b   :  { %v1769_v43 = vpop.eup %1768 }
 0x22c   :  { %v847_v51 = vmul.f32 %v841_v27, %v2551_v62  ;;  %v848_v6 = vmul.f32 %v1769_v43, %v840_v56 }
 0x22d   :  { %v1771_v58 = vpop.eup %1770 }
 0x22e   :  { %v2591_v44 = vadd.f32 %v848_v6, %v847_v51  ;;  %v845_v0 = vmul.f32 0.5, %v1771_v58 }
 0x230   :  { %1772 = vtanh.f32 %v2591_v44  ;;  %v846_v18 = vadd.f32 0.5, %v845_v0 }
 0x236   :  { %v1773_v57 = vpop.eup %1772 }
 0x237   :  { %v851_v40 = vmul.f32 %v1773_v57, %v846_v18 }
 0x239   :  { %v859_v16 = vpack.c.bf16 %v851_v40, %v851_v40 }
 0x23b   :  { %868 = vmatmul.bf16.vlgmr.msra.gmra.mxu0 %v859_v16  ;;  %881 = vmatmul.bf16.vlgmr.msra.gmra.mxu1 %v859_v16 }
 0x23c   :  { %894 = vmatmul.bf16.vlgmr.msra.gmra.mxu2 %v859_v16  ;;  %907 = vmatmul.bf16.vlgmr.msra.gmra.mxu3 %v859_v16 }
 0x23d   :  { %1024 = vmatpush.bf16.msra.mxu0 %v2067_v37  ;;  %1037 = vmatpush.bf16.msra.mxu1 %v2078_v41 }
 0x23e   :  { %1050 = vmatpush.bf16.msra.mxu2 %v2095_v47  ;;  %1063 = vmatpush.bf16.msra.mxu3 %v2098_v48 }
 0x241   :  { %1025 = vmatpush.bf16.msra.mxu0 %v2100_v49  ;;  %1038 = vmatpush.bf16.msra.mxu1 %v2112_v53 }
 0x242   :  { %1051 = vmatpush.bf16.msra.mxu2 %v2130_v59  ;;  %1064 = vmatpush.bf16.msra.mxu3 %v2134_v60 }
 0x245   :  { %1026 = vmatpush.bf16.msra.mxu0 %v2136_v61  ;;  %1039 = vmatpush.bf16.msra.mxu1 %v2148_v1 }
 0x246   :  { %1052 = vmatpush.bf16.msra.mxu2 %v2166_v7  ;;  %1065 = vmatpush.bf16.msra.mxu3 %v2170_v8 }
 0x249   :  { %1027 = vmatpush.bf16.msra.mxu0 %v2172_v9  ;;  %1040 = vmatpush.bf16.msra.mxu1 %v2184_v13 }
 0x24a   :  { %1053 = vmatpush.bf16.msra.mxu2 %v2205_v20  ;;  %1066 = vmatpush.bf16.msra.mxu3 %v2209_v21 }
 0x24d   :  { %1028 = vmatpush.bf16.msra.mxu0 %v2211_v22  ;;  %1041 = vmatpush.bf16.msra.mxu1 %v2223_v26 }
 0x24e   :  { %1054 = vmatpush.bf16.msra.mxu2 %v2241_v32  ;;  %1067 = vmatpush.bf16.msra.mxu3 %v2245_v33 }
 0x251   :  { %1029 = vmatpush.bf16.msra.mxu0 %v2247_v34  ;;  %1042 = vmatpush.bf16.msra.mxu1 %v2256_v38 }
 0x252   :  { %1055 = vmatpush.bf16.msra.mxu2 %v2265_v42  ;;  %1068 = vmatpush.bf16.msra.mxu3 %v2278_v46 }
 0x255   :  { %1030 = vmatpush.bf16.msra.mxu0 %v2280_v50  ;;  %1043 = vmatpush.bf16.msra.mxu1 %v2292_v55 }
 0x256   :  { %1056 = vmatpush.bf16.msra.mxu2 %v2313_v2  ;;  %1069 = vmatpush.bf16.msra.mxu3 %v2317_v3 }
 0x259   :  { %1031 = vmatpush.bf16.msra.mxu0 %v2319_v4  ;;  %1044 = vmatpush.bf16.msra.mxu1 %v2328_v10 }
 0x25a   :  { %1057 = vmatpush.bf16.msra.mxu2 %v2337_v14  ;;  %1070 = vmatpush.bf16.msra.mxu3 %v2341_v15 }
 0x2b8   :  { %v869_v62 = vpop.f32.mrf.mxu0  ;;  %v882_v12 = vpop.f32.mrf.mxu1 }
 0x2b9   :  { %v912_v17 = vadd.f32 %v869_v62, %v2451_v5  ;;  %v913_v25 = vadd.f32 %v882_v12, %v2453_v11 }
 0x2bb   :  { %v916_v35 = vmul.f32 0.5, %v912_v17  ;;  %v917_v30 = vmul.f32 0.5, %v913_v25  ;;  %v2776_v25 = vld [vmem:[#allocation7_spill] sm:$0xff] }
 0x2bd   :  { %1774 = vtanh.f32 %v916_v35 }
 0x2be   :  { %1776 = vtanh.f32 %v917_v30  ;;  %v2777_v30 = vld [vmem:[#allocation8_spill] sm:$0xff] }
 0x2bf   :  { %v895_v28 = vpop.f32.mrf.mxu2  ;;  %v908_v29 = vpop.f32.mrf.mxu3 }
 0x2c0   :  { %v914_v39 = vadd.f32 %v895_v28, %v2774_v36  ;;  %v915_v31 = vadd.f32 %v908_v29, %v2775_v63  ;;  %v871_v19 = vpop.f32.mrf.mxu0  ;;  %v884_v23 = vpop.f32.mrf.mxu1 }
 0x2c1   :  { %v2779_v23 = vld [vmem:[#allocation10_spill] sm:$0xff] }
 0x2c2   :  { %1778 = vtanh.f32 %v914_v39  ;;  %v925_v45 = vmul.f32 0.5, %v915_v31  ;;  %v2778_v31 = vld [vmem:[#allocation9_spill] sm:$0xff] }
 0x2c3   :  { %v1775_v52 = vpop.eup %1774 }
 0x2c4   :  { %v1777_v56 = vpop.eup %1776  ;;  %v920_v27 = vmul.f32 0.5, %v1775_v52  ;;  %1780 = vtanh.f32 %v925_v45 }
 0x2c5   :  { %v921_v5 = vmul.f32 0.5, %v1777_v56 }
 0x2c6   :  { %v922_v11 = vadd.f32 0.5, %v920_v27 }
 0x2c7   :  { %v923_v24 = vadd.f32 0.5, %v921_v5  ;;  %v897_v54 = vpop.f32.mrf.mxu2  ;;  %v910_v43 = vpop.f32.mrf.mxu3 }
 0x2c8   :  { %v1779_v51 = vpop.eup %1778 }
 0x2c9   :  { %v929_v6 = vmul.f32 %v923_v24, %v2591_v44  ;;  %v930_v58 = vmul.f32 %v1779_v51, %v922_v11 }
 0x2ca   :  { %v1781_v0 = vpop.eup %1780 }
 0x2cb   :  { %v2631_v18 = vadd.f32 %v930_v58, %v929_v6  ;;  %v927_v57 = vmul.f32 0.5, %v1781_v0 }
 0x2cd   :  { %1782 = vtanh.f32 %v2631_v18  ;;  %v928_v40 = vadd.f32 0.5, %v927_v57 }
 0x2d3   :  { %v1783_v16 = vpop.eup %1782 }
 0x2d4   :  { %v933_v62 = vmul.f32 %v1783_v16, %v928_v40 }
 0x2d6   :  { %v941_v12 = vpack.c.bf16 %v933_v62, %v933_v62 }
 0x2d8   :  { %950 = vmatmul.bf16.vlgmr.msrb.gmra.mxu0 %v941_v12  ;;  %963 = vmatmul.bf16.vlgmr.msrb.gmra.mxu1 %v941_v12 }
 0x2d9   :  { %976 = vmatmul.bf16.vlgmr.msrb.gmra.mxu2 %v941_v12  ;;  %989 = vmatmul.bf16.vlgmr.msrb.gmra.mxu3 %v941_v12 }
 0x2da   :  { %1106 = vmatpush.bf16.msrb.mxu0 %v2067_v37  ;;  %1119 = vmatpush.bf16.msrb.mxu1 %v2078_v41 }
 0x2db   :  { %1132 = vmatpush.bf16.msrb.mxu2 %v2095_v47  ;;  %1145 = vmatpush.bf16.msrb.mxu3 %v2098_v48 }
 0x2de   :  { %1107 = vmatpush.bf16.msrb.mxu0 %v2100_v49  ;;  %1120 = vmatpush.bf16.msrb.mxu1 %v2112_v53 }
 0x2df   :  { %1133 = vmatpush.bf16.msrb.mxu2 %v2130_v59  ;;  %1146 = vmatpush.bf16.msrb.mxu3 %v2134_v60 }
 0x2e2   :  { %1108 = vmatpush.bf16.msrb.mxu0 %v2136_v61  ;;  %1121 = vmatpush.bf16.msrb.mxu1 %v2148_v1 }
 0x2e3   :  { %1134 = vmatpush.bf16.msrb.mxu2 %v2166_v7  ;;  %1147 = vmatpush.bf16.msrb.mxu3 %v2170_v8 }
 0x2e6   :  { %1109 = vmatpush.bf16.msrb.mxu0 %v2172_v9  ;;  %1122 = vmatpush.bf16.msrb.mxu1 %v2184_v13 }
 0x2e7   :  { %1135 = vmatpush.bf16.msrb.mxu2 %v2205_v20  ;;  %1148 = vmatpush.bf16.msrb.mxu3 %v2209_v21 }
 0x2ea   :  { %1110 = vmatpush.bf16.msrb.mxu0 %v2211_v22  ;;  %1123 = vmatpush.bf16.msrb.mxu1 %v2223_v26 }
 0x2eb   :  { %1136 = vmatpush.bf16.msrb.mxu2 %v2241_v32  ;;  %1149 = vmatpush.bf16.msrb.mxu3 %v2245_v33 }
 0x2ee   :  { %1111 = vmatpush.bf16.msrb.mxu0 %v2247_v34  ;;  %1124 = vmatpush.bf16.msrb.mxu1 %v2256_v38 }
 0x2ef   :  { %1137 = vmatpush.bf16.msrb.mxu2 %v2265_v42  ;;  %1150 = vmatpush.bf16.msrb.mxu3 %v2278_v46 }
 0x2f2   :  { %1112 = vmatpush.bf16.msrb.mxu0 %v2280_v50  ;;  %1125 = vmatpush.bf16.msrb.mxu1 %v2292_v55 }
 0x2f3   :  { %1138 = vmatpush.bf16.msrb.mxu2 %v2313_v2  ;;  %1151 = vmatpush.bf16.msrb.mxu3 %v2317_v3 }
 0x2f6   :  { %1113 = vmatpush.bf16.msrb.mxu0 %v2319_v4  ;;  %1126 = vmatpush.bf16.msrb.mxu1 %v2328_v10 }
 0x2f7   :  { %1139 = vmatpush.bf16.msrb.mxu2 %v2337_v14  ;;  %1152 = vmatpush.bf16.msrb.mxu3 %v2341_v15 }
 0x355   :  { %v951_v44 = vpop.f32.mrf.mxu0  ;;  %v964_v17 = vpop.f32.mrf.mxu1 }
 0x356   :  { %v994_v35 = vadd.f32 %v951_v44, %v2776_v25  ;;  %v995_v28 = vadd.f32 %v964_v17, %v2777_v30 }
 0x358   :  { %v998_v29 = vmul.f32 0.5, %v994_v35  ;;  %v999_v36 = vmul.f32 0.5, %v995_v28 }
 0x35a   :  { %1784 = vtanh.f32 %v998_v29 }
 0x35b   :  { %1786 = vtanh.f32 %v999_v36 }
 0x35c   :  { %v977_v39 = vpop.f32.mrf.mxu2  ;;  %v990_v63 = vpop.f32.mrf.mxu3 }
 0x35d   :  { %v996_v19 = vadd.f32 %v977_v39, %v2778_v31  ;;  %v997_v45 = vadd.f32 %v990_v63, %v2779_v23  ;;  %v953_v52 = vpop.f32.mrf.mxu0  ;;  %v966_v56 = vpop.f32.mrf.mxu1  ;;  %v2784_v39 = vld [vmem:[#allocation15_spill] sm:$0xff]  ;;  %v2785_v31 = vld [vmem:[#allocation16_spill] sm:$0xff] }
 0x35f   :  { %1788 = vtanh.f32 %v996_v19  ;;  %v1007_v27 = vmul.f32 0.5, %v997_v45 }
 0x360   :  { %v1785_v5 = vpop.eup %1784 }
 0x361   :  { %v1787_v11 = vpop.eup %1786  ;;  %v1002_v24 = vmul.f32 0.5, %v1785_v5  ;;  %1790 = vtanh.f32 %v1007_v27  ;;  %v2786_v27 = vld [vmem:[#allocation17_spill] sm:$0xff] }
 0x362   :  { %v1003_v54 = vmul.f32 0.5, %v1787_v11  ;;  %v2787_v11 = vld [vmem:[#allocation18_spill] sm:$0xff] }
 0x363   :  { %v1004_v43 = vadd.f32 0.5, %v1002_v24 }
 0x364   :  { %v1005_v51 = vadd.f32 0.5, %v1003_v54  ;;  %v979_v6 = vpop.f32.mrf.mxu2  ;;  %v992_v58 = vpop.f32.mrf.mxu3 }
 0x365   :  { %v1789_v0 = vpop.eup %1788 }
 0x366   :  { %v1011_v57 = vmul.f32 %v1005_v51, %v2631_v18  ;;  %v1012_v40 = vmul.f32 %v1789_v0, %v1004_v43 }
 0x367   :  { %v1791_v16 = vpop.eup %1790 }
 0x368   :  { %v2671_v62 = vadd.f32 %v1012_v40, %v1011_v57  ;;  %v1009_v12 = vmul.f32 0.5, %v1791_v16 }
 0x36a   :  { %1792 = vtanh.f32 %v2671_v62  ;;  %v1010_v44 = vadd.f32 0.5, %v1009_v12 }
 0x370   :  { %v1793_v17 = vpop.eup %1792 }
 0x371   :  { %v1015_v25 = vmul.f32 %v1793_v17, %v1010_v44 }
 0x373   :  { %v1023_v35 = vpack.c.bf16 %v1015_v25, %v1015_v25 }
 0x375   :  { %1032 = vmatmul.bf16.vlgmr.msra.gmra.mxu0 %v1023_v35  ;;  %1045 = vmatmul.bf16.vlgmr.msra.gmra.mxu1 %v1023_v35 }
 0x376   :  { %1058 = vmatmul.bf16.vlgmr.msra.gmra.mxu2 %v1023_v35  ;;  %1071 = vmatmul.bf16.vlgmr.msra.gmra.mxu3 %v1023_v35 }
 0x377   :  { %1188 = vmatpush.bf16.msra.mxu0 %v2067_v37  ;;  %1201 = vmatpush.bf16.msra.mxu1 %v2078_v41 }
 0x378   :  { %1214 = vmatpush.bf16.msra.mxu2 %v2095_v47  ;;  %1227 = vmatpush.bf16.msra.mxu3 %v2098_v48  ;;  %v2780_v47 = vld [vmem:[#allocation11_spill] sm:$0xff] }
 0x37b   :  { %1189 = vmatpush.bf16.msra.mxu0 %v2100_v49  ;;  %1202 = vmatpush.bf16.msra.mxu1 %v2112_v53  ;;  %v2781_v49 = vld [vmem:[#allocation12_spill] sm:$0xff] }
 0x37c   :  { %1215 = vmatpush.bf16.msra.mxu2 %v2130_v59  ;;  %1228 = vmatpush.bf16.msra.mxu3 %v2134_v60 }
 0x37f   :  { %1190 = vmatpush.bf16.msra.mxu0 %v2136_v61  ;;  %1203 = vmatpush.bf16.msra.mxu1 %v2148_v1 }
 0x380   :  { %1216 = vmatpush.bf16.msra.mxu2 %v2166_v7  ;;  %1229 = vmatpush.bf16.msra.mxu3 %v2170_v8  ;;  %v2782_v7 = vld [vmem:[#allocation13_spill] sm:$0xff] }
 0x383   :  { %1191 = vmatpush.bf16.msra.mxu0 %v2172_v9  ;;  %1204 = vmatpush.bf16.msra.mxu1 %v2184_v13  ;;  %v2783_v9 = vld [vmem:[#allocation14_spill] sm:$0xff] }
 0x384   :  { %1217 = vmatpush.bf16.msra.mxu2 %v2205_v20  ;;  %1230 = vmatpush.bf16.msra.mxu3 %v2209_v21 }
 0x387   :  { %1192 = vmatpush.bf16.msra.mxu0 %v2211_v22  ;;  %1205 = vmatpush.bf16.msra.mxu1 %v2223_v26 }
 0x388   :  { %1218 = vmatpush.bf16.msra.mxu2 %v2241_v32  ;;  %1231 = vmatpush.bf16.msra.mxu3 %v2245_v33 }
 0x38b   :  { %1193 = vmatpush.bf16.msra.mxu0 %v2247_v34  ;;  %1206 = vmatpush.bf16.msra.mxu1 %v2256_v38 }
 0x38c   :  { %1219 = vmatpush.bf16.msra.mxu2 %v2265_v42  ;;  %1232 = vmatpush.bf16.msra.mxu3 %v2278_v46 }
 0x38f   :  { %1194 = vmatpush.bf16.msra.mxu0 %v2280_v50  ;;  %1207 = vmatpush.bf16.msra.mxu1 %v2292_v55 }
 0x390   :  { %1220 = vmatpush.bf16.msra.mxu2 %v2313_v2  ;;  %1233 = vmatpush.bf16.msra.mxu3 %v2317_v3 }
 0x393   :  { %1195 = vmatpush.bf16.msra.mxu0 %v2319_v4  ;;  %1208 = vmatpush.bf16.msra.mxu1 %v2328_v10 }
 0x394   :  { %1221 = vmatpush.bf16.msra.mxu2 %v2337_v14  ;;  %1234 = vmatpush.bf16.msra.mxu3 %v2341_v15 }
 0x3f2   :  { %v1033_v37 = vpop.f32.mrf.mxu0  ;;  %v1046_v41 = vpop.f32.mrf.mxu1 }
 0x3f3   :  { %v1076_v48 = vadd.f32 %v1033_v37, %v2780_v47  ;;  %v1077_v53 = vadd.f32 %v1046_v41, %v2781_v49 }
 0x3f5   :  { %v1080_v59 = vmul.f32 0.5, %v1076_v48  ;;  %v1081_v60 = vmul.f32 0.5, %v1077_v53 }
 0x3f7   :  { %1794 = vtanh.f32 %v1080_v59  ;;  %v1740_v59 = vld [vmem:[%s2754_s4 + $0x38] sm:$0xff] }
 0x3f8   :  { %1796 = vtanh.f32 %v1081_v60  ;;  %v1739_v60 = vld [vmem:[%s2754_s4 + $0x30] sm:$0xff] }
 0x3f9   :  { %v1059_v61 = vpop.f32.mrf.mxu2  ;;  %v1072_v1 = vpop.f32.mrf.mxu3 }
 0x3fa   :  { %v1078_v8 = vadd.f32 %v1059_v61, %v2782_v7  ;;  %v1079_v13 = vadd.f32 %v1072_v1, %v2783_v9  ;;  %v1035_v20 = vpop.f32.mrf.mxu0  ;;  %v1048_v21 = vpop.f32.mrf.mxu1  ;;  %v1738_v61 = vld [vmem:[%s2754_s4 + $0x28] sm:$0xff]  ;;  %v1737_v1 = vld [vmem:[%s2754_s4 + $0x20] sm:$0xff]  ;;  %v1736_v7 = vld [vmem:[%s2754_s4 + $0x18] sm:$0xff] }
 0x3fb   :  { %v1734_v9 = vld [vmem:[%s2754_s4 + $0x8] sm:$0xff] }
 0x3fc   :  { %1798 = vtanh.f32 %v1078_v8  ;;  %v1089_v22 = vmul.f32 0.5, %v1079_v13  ;;  %v1735_v8 = vld [vmem:[%s2754_s4 + $0x10] sm:$0xff]  ;;  %v1733_v13 = vld [vmem:[%s2754_s4] sm:$0xff] }
 0x3fd   :  { %v1795_v26 = vpop.eup %1794 }
 0x3fe   :  { %v1797_v32 = vpop.eup %1796  ;;  %v1084_v33 = vmul.f32 0.5, %v1795_v26  ;;  %1800 = vtanh.f32 %v1089_v22  ;;  %v2788_v22 = vld [vmem:[#allocation19_spill] sm:$0xff] }
 0x3ff   :  { %v1085_v34 = vmul.f32 0.5, %v1797_v32  ;;  %v2789_v32 = vld [vmem:[#allocation20_spill] sm:$0xff] }
 0x400   :  { %v1086_v38 = vadd.f32 0.5, %v1084_v33 }
 0x401   :  { %v1087_v42 = vadd.f32 0.5, %v1085_v34  ;;  %v1061_v46 = vpop.f32.mrf.mxu2  ;;  %v1074_v50 = vpop.f32.mrf.mxu3 }
 0x402   :  { %v1799_v55 = vpop.eup %1798  ;;  %v2790_v50 = vld [vmem:[#allocation21_spill] sm:$0xff] }
 0x403   :  { %v1093_v2 = vmul.f32 %v1087_v42, %v2671_v62  ;;  %v1094_v3 = vmul.f32 %v1799_v55, %v1086_v38 }
 0x404   :  { %v1801_v4 = vpop.eup %1800 }
 0x405   :  { %v1095_v10 = vadd.f32 %v1094_v3, %v1093_v2  ;;  %v1091_v14 = vmul.f32 0.5, %v1801_v4  ;;  %v2791_v2 = vld [vmem:[#allocation22_spill] sm:$0xff] }
 0x407   :  { %1802 = vtanh.f32 %v1095_v10  ;;  %v1092_v15 = vadd.f32 0.5, %v1091_v14 }
 0x40d   :  { %v1803_v18 = vpop.eup %1802 }
 0x40e   :  { %v1097_v30 = vmul.f32 %v1803_v18, %v1092_v15 }
 0x410   :  { %v1105_v28 = vpack.c.bf16 %v1097_v30, %v1097_v30 }
 0x412   :  { %1114 = vmatmul.bf16.vlgmr.msrb.gmra.mxu0 %v1105_v28  ;;  %1127 = vmatmul.bf16.vlgmr.msrb.gmra.mxu1 %v1105_v28 }
 0x413   :  { %1140 = vmatmul.bf16.vlgmr.msrb.gmra.mxu2 %v1105_v28  ;;  %1153 = vmatmul.bf16.vlgmr.msrb.gmra.mxu3 %v1105_v28 }
 0x414   :  { %1336 = vmatpush.bf16.msrb.mxu0 %v1740_v59 }
 0x418   :  { %1337 = vmatpush.bf16.msrb.mxu0 %v1739_v60 }
 0x41c   :  { %1338 = vmatpush.bf16.msrb.mxu0 %v1738_v61 }
 0x420   :  { %1339 = vmatpush.bf16.msrb.mxu0 %v1737_v1 }
 0x424   :  { %1340 = vmatpush.bf16.msrb.mxu0 %v1736_v7 }
 0x428   :  { %1341 = vmatpush.bf16.msrb.mxu0 %v1735_v8 }
 0x42c   :  { %1342 = vmatpush.bf16.msrb.mxu0 %v1734_v9 }
 0x430   :  { %1343 = vmatpush.bf16.msrb.mxu0 %v1733_v13 }
 0x48f   :  { %v1115_v29 = vpop.f32.mrf.mxu0  ;;  %v1128_v36 = vpop.f32.mrf.mxu1 }
 0x490   :  { %v1158_v63 = vadd.f32 %v1115_v29, %v2784_v39  ;;  %v1159_v19 = vadd.f32 %v1128_v36, %v2785_v31 }
 0x492   :  { %v1162_v23 = vmul.f32 0.5, %v1158_v63  ;;  %v1163_v45 = vmul.f32 0.5, %v1159_v19 }
 0x494   :  { %1804 = vtanh.f32 %v1162_v23 }
 0x495   :  { %1806 = vtanh.f32 %v1163_v45 }
 0x496   :  { %v1141_v52 = vpop.f32.mrf.mxu2  ;;  %v1154_v56 = vpop.f32.mrf.mxu3 }
 0x497   :  { %v1160_v5 = vadd.f32 %v1141_v52, %v2786_v27  ;;  %v1161_v24 = vadd.f32 %v1154_v56, %v2787_v11  ;;  %v1117_v54 = vpop.f32.mrf.mxu0  ;;  %v1130_v43 = vpop.f32.mrf.mxu1 }
 0x498   :  { %v1743_v54 = vld [vmem:[%s2753_s5] ss:$0 sm:$0xff] }
 0x499   :  { %1808 = vtanh.f32 %v1160_v5  ;;  %v1171_v51 = vmul.f32 0.5, %v1161_v24 }
 0x49a   :  { %v1805_v6 = vpop.eup %1804 }
 0x49b   :  { %v1807_v58 = vpop.eup %1806  ;;  %v1166_v0 = vmul.f32 0.5, %v1805_v6  ;;  %1810 = vtanh.f32 %v1171_v51 }
 0x49c   :  { %v1167_v57 = vmul.f32 0.5, %v1807_v58 }
 0x49d   :  { %v1168_v40 = vadd.f32 0.5, %v1166_v0 }
 0x49e   :  { %v1169_v16 = vadd.f32 0.5, %v1167_v57  ;;  %v1143_v62 = vpop.f32.mrf.mxu2  ;;  %v1156_v12 = vpop.f32.mrf.mxu3 }
 0x49f   :  { %v1809_v44 = vpop.eup %1808 }
 0x4a0   :  { %v1175_v17 = vmul.f32 %v1169_v16, %v1095_v10  ;;  %v1176_v25 = vmul.f32 %v1809_v44, %v1168_v40 }
 0x4a1   :  { %v1811_v35 = vpop.eup %1810 }
 0x4a2   :  { %v1177_v37 = vadd.f32 %v1176_v25, %v1175_v17  ;;  %v1173_v41 = vmul.f32 0.5, %v1811_v35 }
 0x4a4   :  { %1812 = vtanh.f32 %v1177_v37  ;;  %v1174_v47 = vadd.f32 0.5, %v1173_v41 }
 0x4aa   :  { %v1813_v48 = vpop.eup %1812 }
 0x4ab   :  { %v1179_v49 = vmul.f32 %v1813_v48, %v1174_v47 }
 0x4ad   :  { %v1187_v53 = vpack.c.bf16 %v1179_v49, %v1179_v49 }
 0x4af   :  { %1196 = vmatmul.bf16.vlgmr.msra.gmra.mxu0 %v1187_v53  ;;  %1209 = vmatmul.bf16.vlgmr.msra.gmra.mxu1 %v1187_v53 }
 0x4b0   :  { %1222 = vmatmul.bf16.vlgmr.msra.gmra.mxu2 %v1187_v53  ;;  %1235 = vmatmul.bf16.vlgmr.msra.gmra.mxu3 %v1187_v53 }
 0x52c   :  { %v1197_v20 = vpop.f32.mrf.mxu0  ;;  %v1210_v21 = vpop.f32.mrf.mxu1 }
 0x52d   :  { %v1240_v26 = vadd.f32 %v1197_v20, %v2788_v22  ;;  %v1241_v33 = vadd.f32 %v1210_v21, %v2789_v32 }
 0x52f   :  { %v1244_v34 = vmul.f32 0.5, %v1240_v26  ;;  %v1245_v38 = vmul.f32 0.5, %v1241_v33 }
 0x531   :  { %1814 = vtanh.f32 %v1244_v34 }
 0x532   :  { %1816 = vtanh.f32 %v1245_v38 }
 0x533   :  { %v1223_v42 = vpop.f32.mrf.mxu2  ;;  %v1236_v46 = vpop.f32.mrf.mxu3 }
 0x534   :  { %v1242_v55 = vadd.f32 %v1223_v42, %v2790_v50  ;;  %v1243_v3 = vadd.f32 %v1236_v46, %v2791_v2  ;;  %v1199_v4 = vpop.f32.mrf.mxu0  ;;  %v1212_v10 = vpop.f32.mrf.mxu1 }
 0x536   :  { %1818 = vtanh.f32 %v1242_v55  ;;  %v1253_v14 = vmul.f32 0.5, %v1243_v3 }
 0x537   :  { %v1815_v15 = vpop.eup %1814 }
 0x538   :  { %v1817_v18 = vpop.eup %1816  ;;  %v1248_v30 = vmul.f32 0.5, %v1815_v15  ;;  %1820 = vtanh.f32 %v1253_v14 }
 0x539   :  { %v1249_v28 = vmul.f32 0.5, %v1817_v18 }
 0x53a   :  { %v1250_v29 = vadd.f32 0.5, %v1248_v30 }
 0x53b   :  { %v1251_v36 = vadd.f32 0.5, %v1249_v28  ;;  %v1225_v39 = vpop.f32.mrf.mxu2  ;;  %v1238_v63 = vpop.f32.mrf.mxu3 }
 0x53c   :  { %v1819_v31 = vpop.eup %1818 }
 0x53d   :  { %v1257_v19 = vmul.f32 %v1251_v36, %v1177_v37  ;;  %v1258_v23 = vmul.f32 %v1819_v31, %v1250_v29 }
 0x53e   :  { %v1821_v45 = vpop.eup %1820 }
 0x53f   :  { %v1259_v52 = vadd.f32 %v1258_v23, %v1257_v19  ;;  %v1255_v56 = vmul.f32 0.5, %v1821_v45 }
 0x541   :  { %1822 = vtanh.f32 %v1259_v52  ;;  %v1256_v27 = vadd.f32 0.5, %v1255_v56 }
 0x547   :  { %v1823_v5 = vpop.eup %1822 }
 0x548   :  { %v1261_v11 = vmul.f32 %v1823_v5, %v1256_v27 }
 0x54a   :  { %v1267_v24 = vpack.c.bf16 %v1261_v11, %v1261_v11 }
 0x54c   :  { %1344 = vmatmul.bf16.vlgmr.msrb.gmra.mxu0 %v1267_v24 }
 0x5c9   :  { %v1345_v43 = vpop.f32.mrf.mxu0 }
 0x5ca   :  { %v1346_v51 = vadd.f32 %v1743_v54, %v1345_v43 }
 0x5cc   :  { %1349 = vst [vmem:[%s2755_s6] sm:$0xff] %v1346_v51 }
 0x5d1   :  { %v1347_v6 = vpop.f32.mrf.mxu0 }

</bundles_post_ra>
